<compile_context>
chip_gen: v7x
topology: tpu7x:2x2x1
jax: 0.10.0
libtpu: 0.0.40
codegen_flags: <defaults>
</compile_context>

<pallas_src>
import math
from functools import partial

import jax
import jax.numpy as jnp
from jax import lax
from jax.experimental import pallas as pl
from jax.experimental.pallas import tpu as pltpu

F32 = jnp.float32
BF16 = jnp.bfloat16


# ----------------------------- in-kernel helpers -----------------------------

def _layer_norm(z, gamma, beta, eps):
    """Two-pass LayerNorm over the last axis (f32)."""
    mu = jnp.mean(z, axis=-1, keepdims=True)
    zc = z - mu
    var = jnp.mean(zc * zc, axis=-1, keepdims=True)
    return zc * lax.rsqrt(var + eps) * gamma + beta


def _attention(q, k, v, neg, dk):
    """Batched-over-heads scaled dot-product attention.

    q: (H, Lq, dk) bf16; k, v: (H, Lk, dk) bf16; neg broadcastable to (H, Lq, Lk).
    Returns (probs f32 (H, Lq, Lk), context f32 (H, Lq, dk)).
    """
    s = jnp.einsum('hqd,hkd->hqk', q, k, preferred_element_type=F32)
    s = s * (1.0 / math.sqrt(dk)) + neg
    s = s - jnp.max(s, axis=-1, keepdims=True)
    e = jnp.exp(s)
    p = e / jnp.sum(e, axis=-1, keepdims=True)          # exact softmax (f32)
    o = jnp.einsum('hqk,hkd->hqd', p.astype(BF16), v, preferred_element_type=F32)
    return p, o


def _merge_heads(o, wo, bo):
    """Per-head output projection + head merge without concat/reshape.

    o: (H, Lq, dk) f32; wo: (H, dk, D) bf16; bo: (1, D) f32 -> (Lq, D) f32.
    """
    parts = jnp.einsum('hqd,hdo->hqo', o.astype(BF16), wo,
                       preferred_element_type=F32)
    return jnp.sum(parts, axis=0) + bo


# ------------------------------ encoder kernel --------------------------------

def _encoder_stack_kernel(x_ref, mask_ref,
                          wqkv_ref, bqkv_ref, wo_ref, bo_ref,
                          ln1g_ref, ln1b_ref,
                          w1_ref, b1_ref, w2_ref, b2_ref,
                          ln2g_ref, ln2b_ref,
                          out_ref, *, num_head, eps):
    H = num_head
    layer = pl.program_id(1)

    @pl.when(layer == 0)
    def _():
        out_ref[0] = x_ref[0]              # activation stays resident in VMEM

    x = out_ref[0]                         # (L, D) f32
    L, D = x.shape
    dk = D // H
    neg = mask_ref[0] * (-1e9)             # (1, L) padding mask

    # fused per-head QKV projection (one batched matmul over 3H heads)
    xb = x.astype(BF16)
    qkv = jnp.einsum('hld,hdk->hlk',
                     jnp.broadcast_to(xb[None], (3 * H, L, D)),
                     wqkv_ref[0], preferred_element_type=F32) + bqkv_ref[0]
    q = qkv[:H].astype(BF16)
    k = qkv[H:2 * H].astype(BF16)
    v = qkv[2 * H:].astype(BF16)

    _, o = _attention(q, k, v, neg, dk)
    ctx = _merge_heads(o, wo_ref[0], bo_ref[0])
    z1 = _layer_norm(x + ctx, ln1g_ref[0], ln1b_ref[0], eps)

    # feed-forward
    h = jnp.maximum(jnp.dot(z1.astype(BF16), w1_ref[0],
                            preferred_element_type=F32) + b1_ref[0], 0.0)
    y = jnp.dot(h.astype(BF16), w2_ref[0],
                preferred_element_type=F32) + b2_ref[0]
    out_ref[0] = _layer_norm(z1 + y, ln2g_ref[0], ln2b_ref[0], eps)


def pallas_encoder(x, pad_mask, w, *, num_head, eps=1e-5):
    """x: (B, Ls, D) f32, pad_mask: (B, 1, Ls) f32, w: stacked layer weights."""
    B, Ls, D = x.shape
    nl = w['wqkv'].shape[0]
    dk = w['wqkv'].shape[-1]
    H = num_head
    dff = w['w1'].shape[-1]

    act = lambda b, l: (b, 0, 0)
    w3 = lambda b, l: (l, 0, 0)
    w4 = lambda b, l: (l, 0, 0, 0)

    in_specs = [
        pl.BlockSpec((1, Ls, D), act),          # x (consumed at layer 0)
        pl.BlockSpec((1, 1, Ls), act),          # padding mask
        pl.BlockSpec((1, 3 * H, D, dk), w4),    # wqkv  (bf16)
        pl.BlockSpec((1, 3 * H, 1, dk), w4),    # bqkv
        pl.BlockSpec((1, H, dk, D), w4),        # wo    (bf16)
        pl.BlockSpec((1, 1, D), w3),            # bo
        pl.BlockSpec((1, 1, D), w3),            # ln1 gamma
        pl.BlockSpec((1, 1, D), w3),            # ln1 beta
        pl.BlockSpec((1, D, dff), w3),          # ffn w1 (bf16)
        pl.BlockSpec((1, 1, dff), w3),          # ffn b1
        pl.BlockSpec((1, dff, D), w3),          # ffn w2 (bf16)
        pl.BlockSpec((1, 1, D), w3),            # ffn b2
        pl.BlockSpec((1, 1, D), w3),            # ln2 gamma
        pl.BlockSpec((1, 1, D), w3),            # ln2 beta
    ]

    return pl.pallas_call(
        partial(_encoder_stack_kernel, num_head=num_head, eps=eps),
        out_shape=jax.ShapeDtypeStruct((B, Ls, D), F32),
        grid=(B, nl),
        in_specs=in_specs,
        out_specs=pl.BlockSpec((1, Ls, D), act),
        compiler_params=pltpu.CompilerParams(
            dimension_semantics=("parallel", "arbitrary")),
    )(x, pad_mask, w['wqkv'], w['bqkv'], w['wo'], w['bo'],
      w['ln1_g'], w['ln1_b'], w['w1'], w['b1'], w['w2'], w['b2'],
      w['ln2_g'], w['ln2_b'])


# ------------------------------ decoder kernel --------------------------------

def _decoder_stack_kernel(y_ref, enc_ref, la_mask_ref, pad_mask_ref,
                          wqkv1_ref, bqkv1_ref, wo1_ref, bo1_ref,
                          ln1g_ref, ln1b_ref,
                          wq2_ref, bq2_ref, wkv2_ref, bkv2_ref, wo2_ref, bo2_ref,
                          ln2g_ref, ln2b_ref,
                          w1_ref, b1_ref, w2_ref, b2_ref, ln3g_ref, ln3b_ref,
                          out_ref, attn1_ref, attn2_ref, *, num_head, eps):
    H = num_head
    layer = pl.program_id(1)

    @pl.when(layer == 0)
    def _():
        out_ref[0] = y_ref[0]

    x = out_ref[0]                          # (Lt, D) f32, resident activation
    Lt, D = x.shape
    dk = D // H
    enc = enc_ref[0]                        # (Ls, D) f32
    Ls = enc.shape[0]
    neg_la = la_mask_ref[0] * (-1e9)        # (Lt, Lt) combined/look-ahead
    neg_pad = pad_mask_ref[0] * (-1e9)      # (1, Ls) padding

    # -- block 1: masked self-attention + residual + LN --
    xb = x.astype(BF16)
    qkv = jnp.einsum('hld,hdk->hlk',
                     jnp.broadcast_to(xb[None], (3 * H, Lt, D)),
                     wqkv1_ref[0], preferred_element_type=F32) + bqkv1_ref[0]
    q1 = qkv[:H].astype(BF16)
    k1 = qkv[H:2 * H].astype(BF16)
    v1 = qkv[2 * H:].astype(BF16)
    p1, o1 = _attention(q1, k1, v1, neg_la, dk)
    attn1_ref[0] = p1                        # one store per layer
    ctx1 = _merge_heads(o1, wo1_ref[0], bo1_ref[0])
    z1 = _layer_norm(x + ctx1, ln1g_ref[0], ln1b_ref[0], eps)

    # -- block 2: cross attention over encoder output + residual + LN --
    q2 = (jnp.einsum('hld,hdk->hlk',
                     jnp.broadcast_to(z1.astype(BF16)[None], (H, Lt, D)),
                     wq2_ref[0], preferred_element_type=F32)
          + bq2_ref[0]).astype(BF16)
    kv2 = jnp.einsum('hld,hdk->hlk',
                     jnp.broadcast_to(enc.astype(BF16)[None], (2 * H, Ls, D)),
                     wkv2_ref[0], preferred_element_type=F32) + bkv2_ref[0]
    k2 = kv2[:H].astype(BF16)
    v2 = kv2[H:].astype(BF16)
    p2, o2 = _attention(q2, k2, v2, neg_pad, dk)
    attn2_ref[0] = p2
    ctx2 = _merge_heads(o2, wo2_ref[0], bo2_ref[0])
    z2 = _layer_norm(z1 + ctx2, ln2g_ref[0], ln2b_ref[0], eps)

    # -- block 3: FFN + residual + LN --
    h = jnp.maximum(jnp.dot(z2.astype(BF16), w1_ref[0],
                            preferred_element_type=F32) + b1_ref[0], 0.0)
    yff = jnp.dot(h.astype(BF16), w2_ref[0],
                  preferred_element_type=F32) + b2_ref[0]
    out_ref[0] = _layer_norm(z2 + yff, ln3g_ref[0], ln3b_ref[0], eps)


def pallas_decoder(y, enc_out, la_mask, pad_mask, w, *, num_head, eps=1e-5):
    """y: (B, Lt, D), enc_out: (B, Ls, D), la_mask: (B, Lt, Lt),
    pad_mask: (B, 1, Ls). Returns (dec_out, attn1, attn2)."""
    B, Lt, D = y.shape
    Ls = enc_out.shape[1]
    nl = w['wqkv1'].shape[0]
    H = num_head
    dk = D // H
    dff = w['w1'].shape[-1]

    act = lambda b, l: (b, 0, 0)
    w3 = lambda b, l: (l, 0, 0)
    w4 = lambda b, l: (l, 0, 0, 0)

    def attn_map(b, l):
        return (b * nl + l, 0, 0, 0)

    in_specs = [
        pl.BlockSpec((1, Lt, D), act),            # tgt embedding (layer 0 only)
        pl.BlockSpec((1, Ls, D), act),            # encoder output
        pl.BlockSpec((1, Lt, Lt), act),           # combined look-ahead mask
        pl.BlockSpec((1, 1, Ls), act),            # dec padding mask
        pl.BlockSpec((1, 3 * H, D, dk), w4),      # wqkv1 (bf16)
        pl.BlockSpec((1, 3 * H, 1, dk), w4),      # bqkv1
        pl.BlockSpec((1, H, dk, D), w4),          # wo1   (bf16)
        pl.BlockSpec((1, 1, D), w3),              # bo1
        pl.BlockSpec((1, 1, D), w3),              # ln1 gamma
        pl.BlockSpec((1, 1, D), w3),              # ln1 beta
        pl.BlockSpec((1, H, D, dk), w4),          # wq2   (bf16)
        pl.BlockSpec((1, H, 1, dk), w4),          # bq2
        pl.BlockSpec((1, 2 * H, D, dk), w4),      # wkv2  (bf16)
        pl.BlockSpec((1, 2 * H, 1, dk), w4),      # bkv2
        pl.BlockSpec((1, H, dk, D), w4),          # wo2   (bf16)
        pl.BlockSpec((1, 1, D), w3),              # bo2
        pl.BlockSpec((1, 1, D), w3),              # ln2 gamma
        pl.BlockSpec((1, 1, D), w3),              # ln2 beta
        pl.BlockSpec((1, D, dff), w3),            # ffn w1 (bf16)
        pl.BlockSpec((1, 1, dff), w3),            # ffn b1
        pl.BlockSpec((1, dff, D), w3),            # ffn w2 (bf16)
        pl.BlockSpec((1, 1, D), w3),              # ffn b2
        pl.BlockSpec((1, 1, D), w3),              # ln3 gamma
        pl.BlockSpec((1, 1, D), w3),              # ln3 beta
    ]
    out_shape = (jax.ShapeDtypeStruct((B, Lt, D), F32),
                 jax.ShapeDtypeStruct((B * nl, H, Lt, Lt), F32),
                 jax.ShapeDtypeStruct((B * nl, H, Lt, Ls), F32))
    out_specs = (pl.BlockSpec((1, Lt, D), act),
                 pl.BlockSpec((1, H, Lt, Lt), attn_map),
                 pl.BlockSpec((1, H, Lt, Ls), attn_map))

    dec_out, a1, a2 = pl.pallas_call(
        partial(_decoder_stack_kernel, num_head=num_head, eps=eps),
        out_shape=out_shape,
        grid=(B, nl),
        in_specs=in_specs,
        out_specs=out_specs,
        compiler_params=pltpu.CompilerParams(
            dimension_semantics=("parallel", "arbitrary")),
    )(y, enc_out, la_mask, pad_mask,
      w['wqkv1'], w['bqkv1'], w['wo1'], w['bo1'], w['ln1_g'], w['ln1_b'],
      w['wq2'], w['bq2'], w['wkv2'], w['bkv2'], w['wo2'], w['bo2'],
      w['ln2_g'], w['ln2_b'],
      w['w1'], w['b1'], w['w2'], w['b2'], w['ln3_g'], w['ln3_b'])

    return dec_out, a1.reshape(B, nl, H, Lt, Lt), a2.reshape(B, nl, H, Lt, Ls)


# --------------------------- final projection kernel --------------------------

def _final_proj_kernel(x_ref, w_ref, b_ref, o_ref):
    o_ref[...] = jnp.dot(x_ref[...].astype(BF16), w_ref[...],
                         preferred_element_type=F32) + b_ref[...]


def pallas_final_projection(x, w_pad, b_pad, vocab):
    """x: (B, L, D) f32; w_pad: (D, Vp) bf16 (Vp multiple of 128); b_pad: (1, Vp)."""
    B, L, D = x.shape
    Vp = w_pad.shape[1]
    M = B * L
    x2 = x.reshape(M, D)                       # fold batch into M
    tm = 8 if M % 8 == 0 else M
    out = pl.pallas_call(
        _final_proj_kernel,
        out_shape=jax.ShapeDtypeStruct((M, Vp), F32),
        grid=(M // tm,),
        in_specs=[pl.BlockSpec((tm, D), lambda i: (i, 0)),
                  pl.BlockSpec((D, Vp), lambda i: (0, 0)),
                  pl.BlockSpec((1, Vp), lambda i: (0, 0))],
        out_specs=pl.BlockSpec((tm, Vp), lambda i: (i, 0)),   # lane-dense store
        compiler_params=pltpu.CompilerParams(
            dimension_semantics=("parallel",)),
    )(x2, w_pad, b_pad)
    return out[:, :vocab].reshape(B, L, vocab)


# ------------------------------ model glue ------------------------------------

def positional_encoding(max_len, d_model):
    pos = jnp.arange(max_len, dtype=F32)[:, None]
    i = jnp.arange(d_model, dtype=F32)[None, :]
    angle_rates = 1.0 / jnp.power(10000.0, (2.0 * jnp.floor(i / 2.0)) / d_model)
    angles = pos * angle_rates
    pe = jnp.where(jnp.arange(d_model)[None, :] % 2 == 0,
                   jnp.sin(angles), jnp.cos(angles))
    return pe[None]  # (1, max_len, d_model)


def transformer_forward(params, src, tgt,
                        enc_padding_mask, look_ahead_mask, dec_padding_mask,
                        *, num_head, d_model, target_vocab):
    B, Ls = src.shape
    Lt = tgt.shape[1]
    scale = math.sqrt(d_model)

    # embedding gather + positional encoding (plain XLA ops inside the jit)
    src_x = params['src_embedding'][src] * scale + params['pos_enc_src'][:, :Ls, :]
    tgt_x = params['tgt_embedding'][tgt] * scale + params['pos_enc_tgt'][:, :Lt, :]

    enc_pad3 = enc_padding_mask[:, 0].astype(F32)        # (B, 1, Ls)
    la3 = look_ahead_mask[:, 0].astype(F32)              # (B, Lt, Lt)
    dec_pad3 = dec_padding_mask[:, 0].astype(F32)        # (B, 1, Ls)

    enc_out = pallas_encoder(src_x, enc_pad3, params['encoder'],
                             num_head=num_head)

    dec_out, attn1, attn2 = pallas_decoder(tgt_x, enc_out, la3, dec_pad3,
                                           params['decoder'], num_head=num_head)

    dec_attn = {}
    nl = attn1.shape[1]
    for li in range(nl):
        dec_attn[f'decoder_layer{li + 1}_block1'] = attn1[:, li]
        dec_attn[f'decoder_layer{li + 1}_block2'] = attn2[:, li]

    logits = pallas_final_projection(dec_out, params['final_w'],
                                     params['final_b'], target_vocab)
    return logits, dec_attn


# ------------------------- deterministic param init --------------------------

def _init_linear(key, fan_in, fan_out):
    k1, k2 = jax.random.split(key)
    bound = 1.0 / math.sqrt(fan_in)
    w = jax.random.uniform(k1, (fan_in, fan_out), F32, -bound, bound)
    b = jax.random.uniform(k2, (fan_out,), F32, -bound, bound)
    return w, b


def _split_heads_in(w, b, H):
    """(D, D) in-proj weight -> (H, D, dk); (D,) bias -> (H, 1, dk)."""
    D = w.shape[0]
    dk = w.shape[1] // H
    wh = jnp.transpose(w.reshape(D, H, dk), (1, 0, 2))
    bh = b.reshape(H, dk)[:, None, :]
    return wh, bh


def _init_mha(key, d_model):
    ks = jax.random.split(key, 4)
    wq, bq = _init_linear(ks[0], d_model, d_model)
    wk, bk = _init_linear(ks[1], d_model, d_model)
    wv, bv = _init_linear(ks[2], d_model, d_model)
    wo, bo = _init_linear(ks[3], d_model, d_model)
    return dict(wq=wq, bq=bq, wk=wk, bk=bk, wv=wv, bv=bv, wo=wo, bo=bo)


def _mha_kernel_layout(mha, H, fuse_kv_only=False):
    D = mha['wq'].shape[0]
    dk = D // H
    wq, bq = _split_heads_in(mha['wq'], mha['bq'], H)
    wk, bk = _split_heads_in(mha['wk'], mha['bk'], H)
    wv, bv = _split_heads_in(mha['wv'], mha['bv'], H)
    wo = mha['wo'].reshape(H, dk, D)
    bo = mha['bo'][None, :]
    if fuse_kv_only:
        return dict(wq=wq.astype(BF16), bq=bq,
                    wkv=jnp.concatenate([wk, wv], 0).astype(BF16),
                    bkv=jnp.concatenate([bk, bv], 0),
                    wo=wo.astype(BF16), bo=bo)
    return dict(wqkv=jnp.concatenate([wq, wk, wv], 0).astype(BF16),
                bqkv=jnp.concatenate([bq, bk, bv], 0),
                wo=wo.astype(BF16), bo=bo)


def _init_enc_layer(key, d_model, dff, H):
    ks = jax.random.split(key, 3)
    mha = _mha_kernel_layout(_init_mha(ks[0], d_model), H)
    w1, b1 = _init_linear(ks[1], d_model, dff)
    w2, b2 = _init_linear(ks[2], dff, d_model)
    return dict(
        wqkv=mha['wqkv'], bqkv=mha['bqkv'], wo=mha['wo'], bo=mha['bo'],
        ln1_g=jnp.ones((1, d_model), F32), ln1_b=jnp.zeros((1, d_model), F32),
        w1=w1.astype(BF16), b1=b1[None, :],
        w2=w2.astype(BF16), b2=b2[None, :],
        ln2_g=jnp.ones((1, d_model), F32), ln2_b=jnp.zeros((1, d_model), F32))


def _init_dec_layer(key, d_model, dff, H):
    ks = jax.random.split(key, 4)
    mha1 = _mha_kernel_layout(_init_mha(ks[0], d_model), H)
    mha2 = _mha_kernel_layout(_init_mha(ks[1], d_model), H, fuse_kv_only=True)
    w1, b1 = _init_linear(ks[2], d_model, dff)
    w2, b2 = _init_linear(ks[3], dff, d_model)
    ones = lambda: jnp.ones((1, d_model), F32)
    zeros = lambda: jnp.zeros((1, d_model), F32)
    return dict(
        wqkv1=mha1['wqkv'], bqkv1=mha1['bqkv'], wo1=mha1['wo'], bo1=mha1['bo'],
        ln1_g=ones(), ln1_b=zeros(),
        wq2=mha2['wq'], bq2=mha2['bq'], wkv2=mha2['wkv'], bkv2=mha2['bkv'],
        wo2=mha2['wo'], bo2=mha2['bo'],
        ln2_g=ones(), ln2_b=zeros(),
        w1=w1.astype(BF16), b1=b1[None, :],
        w2=w2.astype(BF16), b2=b2[None, :],
        ln3_g=ones(), ln3_b=zeros())


def _stack_layers(layers):
    return {k: jnp.stack([lyr[k] for lyr in layers], axis=0) for k in layers[0]}


def init_transformer(key, num_layers, d_model, num_head, dff,
                     input_vocab, target_vocab, src_max_len, tgt_max_len):
    ks = jax.random.split(key, 3 + 2 * num_layers)
    src_emb = jax.random.normal(ks[0], (input_vocab, d_model), F32)
    tgt_emb = jax.random.normal(ks[1], (target_vocab, d_model), F32)

    fw, fb = _init_linear(ks[2], d_model, target_vocab)
    vp = ((target_vocab + 127) // 128) * 128            # lane-dense vocab pad
    fw_pad = jnp.zeros((d_model, vp), F32).at[:, :target_vocab].set(fw).astype(BF16)
    fb_pad = jnp.zeros((1, vp), F32).at[:, :target_vocab].set(fb)

    enc = _stack_layers([_init_enc_layer(ks[3 + i], d_model, dff, num_head)
                         for i in range(num_layers)])
    dec = _stack_layers([_init_dec_layer(ks[3 + num_layers + i], d_model, dff,
                                         num_head)
                         for i in range(num_layers)])
    return dict(src_embedding=src_emb, tgt_embedding=tgt_emb,
                encoder=enc, decoder=dec,
                final_w=fw_pad, final_b=fb_pad,
                pos_enc_src=positional_encoding(src_max_len, d_model),
                pos_enc_tgt=positional_encoding(tgt_max_len, d_model))


def create_transformer_masks(src, tgt, src_pad_idx, tgt_pad_idx):
    enc_padding_mask = (src == src_pad_idx).astype(F32)[:, None, None, :]
    dec_padding_mask = enc_padding_mask
    Lt = tgt.shape[1]
    look_ahead = 1.0 - jnp.tril(jnp.ones((Lt, Lt), F32))
    tgt_padding = (tgt == tgt_pad_idx).astype(F32)[:, None, None, :]
    combined = jnp.maximum(look_ahead[None, None, :, :], tgt_padding)
    return enc_padding_mask, combined, dec_padding_mask


# ----------------------------------- main ------------------------------------

if __name__ == "__main__":
    num_layers = 2
    d_model = 32
    num_head = 4
    intermediate_dim = 64
    input_vocab_size = 50
    target_vocab_size = 60
    src_max_len = 8
    tgt_max_len = 8
    padding_idx = 0
    batch = 2

    key = jax.random.PRNGKey(0)
    k_params, k_src, k_tgt = jax.random.split(key, 3)

    params = init_transformer(k_params, num_layers, d_model, num_head,
                              intermediate_dim, input_vocab_size,
                              target_vocab_size, src_max_len, tgt_max_len)

    src = jax.random.randint(k_src, (batch, src_max_len), 1, input_vocab_size)
    tgt = jax.random.randint(k_tgt, (batch, tgt_max_len), 1, target_vocab_size)
    src = src.at[:, -2:].set(padding_idx)
    tgt = tgt.at[:, -1:].set(padding_idx)

    enc_padding_mask, combined_mask, dec_padding_mask = create_transformer_masks(
        src, tgt, src_pad_idx=padding_idx, tgt_pad_idx=padding_idx)

    fwd = jax.jit(partial(transformer_forward, num_head=num_head,
                          d_model=d_model, target_vocab=target_vocab_size))
    logits, dec_attn = fwd(params, src, tgt,
                           enc_padding_mask, combined_mask, dec_padding_mask)

    jax.block_until_ready(logits)
    jax.block_until_ready(dec_attn)

    assert logits.shape == (batch, tgt_max_len, target_vocab_size)
    for li in range(num_layers):
        assert dec_attn[f"decoder_layer{li + 1}_block1"].shape == \
            (batch, num_head, tgt_max_len, tgt_max_len)
        assert dec_attn[f"decoder_layer{li + 1}_block2"].shape == \
            (batch, num_head, tgt_max_len, src_max_len)
    print("KERNEL_OK")
</pallas_src>

<mosaic_0001>
module attributes {stable_mosaic.version = 11 : i64} {
  func.func @_encoder_stack_kernel(%arg0: i32, %arg1: i32, %arg2: memref<1x8x32xf32, #tpu.memory_space<vmem>>, %arg3: memref<1x1x8xf32, #tpu.memory_space<vmem>>, %arg4: memref<1x12x32x8xbf16, #tpu.memory_space<vmem>>, %arg5: memref<1x12x1x8xf32, #tpu.memory_space<vmem>>, %arg6: memref<1x4x8x32xbf16, #tpu.memory_space<vmem>>, %arg7: memref<1x1x32xf32, #tpu.memory_space<vmem>>, %arg8: memref<1x1x32xf32, #tpu.memory_space<vmem>>, %arg9: memref<1x1x32xf32, #tpu.memory_space<vmem>>, %arg10: memref<1x32x64xbf16, #tpu.memory_space<vmem>>, %arg11: memref<1x1x64xf32, #tpu.memory_space<vmem>>, %arg12: memref<1x64x32xbf16, #tpu.memory_space<vmem>>, %arg13: memref<1x1x32xf32, #tpu.memory_space<vmem>>, %arg14: memref<1x1x32xf32, #tpu.memory_space<vmem>>, %arg15: memref<1x1x32xf32, #tpu.memory_space<vmem>>, %arg16: memref<1x8x32xf32, #tpu.memory_space<vmem>>) attributes {dimension_semantics = [#tpu.dimension_semantics<parallel>, #tpu.dimension_semantics<arbitrary>], iteration_bounds = array<i64: 2, 2>, scalar_prefetch = 0 : i64, scratch_operands = 0 : i64, tpu.core_type = #tpu.core_type<tc>, window_params = [{transform_indices = @transform_0, window_bounds = array<i64: 1, 8, 32>}, {transform_indices = @transform_1, window_bounds = array<i64: 1, 1, 8>}, {transform_indices = @transform_2, window_bounds = array<i64: 1, 12, 32, 8>}, {transform_indices = @transform_3, window_bounds = array<i64: 1, 12, 1, 8>}, {transform_indices = @transform_4, window_bounds = array<i64: 1, 4, 8, 32>}, {transform_indices = @transform_5, window_bounds = array<i64: 1, 1, 32>}, {transform_indices = @transform_6, window_bounds = array<i64: 1, 1, 32>}, {transform_indices = @transform_7, window_bounds = array<i64: 1, 1, 32>}, {transform_indices = @transform_8, window_bounds = array<i64: 1, 32, 64>}, {transform_indices = @transform_9, window_bounds = array<i64: 1, 1, 64>}, {transform_indices = @transform_10, window_bounds = array<i64: 1, 64, 32>}, {transform_indices = @transform_11, window_bounds = array<i64: 1, 1, 32>}, {transform_indices = @transform_12, window_bounds = array<i64: 1, 1, 32>}, {transform_indices = @transform_13, window_bounds = array<i64: 1, 1, 32>}, {transform_indices = @transform_14, window_bounds = array<i64: 1, 8, 32>}]} {
    %c0_i32 = arith.constant 0 : i32
    %0 = arith.cmpi eq, %arg1, %c0_i32 : i32
    %1 = arith.extui %0 : i1 to i32
    %c0_i32_0 = arith.constant 0 : i32
    %2 = arith.cmpi ne, %1, %c0_i32_0 : i32
    scf.if %2 {
      %c0_69 = arith.constant 0 : index
      %c0_70 = arith.constant 0 : index
      %c0_71 = arith.constant 0 : index
      %123 = vector.load %arg2[%c0_69, %c0_70, %c0_71] : memref<1x8x32xf32, #tpu.memory_space<vmem>>, vector<1x8x32xf32>
      %124 = vector.shape_cast %123 : vector<1x8x32xf32> to vector<8x32xf32>
      %c0_72 = arith.constant 0 : index
      %c0_73 = arith.constant 0 : index
      %c0_74 = arith.constant 0 : index
      %125 = vector.load %arg16[%c0_72, %c0_73, %c0_74] : memref<1x8x32xf32, #tpu.memory_space<vmem>>, vector<1x8x32xf32>
      %126 = vector.shape_cast %125 : vector<1x8x32xf32> to vector<8x32xf32>
      %127 = vector.shape_cast %124 : vector<8x32xf32> to vector<1x8x32xf32>
      tpu.vector_store %arg16[%c0_72, %c0_73, %c0_74], %127 {strides = array<i32>} : memref<1x8x32xf32, #tpu.memory_space<vmem>>, vector<1x8x32xf32>,
    } else {
    }
    %c0 = arith.constant 0 : index
    %c0_1 = arith.constant 0 : index
    %c0_2 = arith.constant 0 : index
    %3 = vector.load %arg16[%c0, %c0_1, %c0_2] : memref<1x8x32xf32, #tpu.memory_space<vmem>>, vector<1x8x32xf32>
    %4 = vector.shape_cast %3 : vector<1x8x32xf32> to vector<8x32xf32>
    %c0_3 = arith.constant 0 : index
    %c0_4 = arith.constant 0 : index
    %c0_5 = arith.constant 0 : index
    %5 = vector.load %arg3[%c0_3, %c0_4, %c0_5] : memref<1x1x8xf32, #tpu.memory_space<vmem>>, vector<1x1x8xf32>
    %6 = vector.shape_cast %5 : vector<1x1x8xf32> to vector<1x8xf32>
    %cst = arith.constant -1.000000e+09 : f32
    %7 = vector.broadcast %cst : f32 to vector<1x8xf32>
    %8 = arith.mulf %6, %7 : vector<1x8xf32>
    %9 = arith.truncf %4 : vector<8x32xf32> to vector<8x32xbf16>
    %10 = vector.shape_cast %9 : vector<8x32xbf16> to vector<1x8x32xbf16>
    %11 = vector.shape_cast %10 : vector<1x8x32xbf16> to vector<1x8x32xbf16>
    %12 = vector.broadcast %11 : vector<1x8x32xbf16> to vector<12x8x32xbf16>
    %c0_6 = arith.constant 0 : index
    %c0_7 = arith.constant 0 : index
    %c0_8 = arith.constant 0 : index
    %c0_9 = arith.constant 0 : index
    %13 = vector.load %arg4[%c0_6, %c0_7, %c0_8, %c0_9] : memref<1x12x32x8xbf16, #tpu.memory_space<vmem>>, vector<1x12x32x8xbf16>
    %14 = vector.shape_cast %13 : vector<1x12x32x8xbf16> to vector<12x32x8xbf16>
    "tpu.trace_start"() <{level = 10 : i32, message = "hld,hdk->hlk"}> : () -> ()
    %cst_10 = arith.constant dense<0.000000e+00> : vector<12x8x8xf32>
    %15 = tpu.matmul %12, %14, %cst_10 {dimension_numbers = #tpu.dot_dimension_numbers<[2], [1], [1], [2], [0, 0, 0, 1, 1, 2], [0], [0]>} : vector<12x8x32xbf16>, vector<12x32x8xbf16>, vector<12x8x8xf32> -> vector<12x8x8xf32>
    "tpu.trace_stop"() : () -> ()
    %c0_11 = arith.constant 0 : index
    %c0_12 = arith.constant 0 : index
    %c0_13 = arith.constant 0 : index
    %c0_14 = arith.constant 0 : index
    %16 = vector.load %arg5[%c0_11, %c0_12, %c0_13, %c0_14] : memref<1x12x1x8xf32, #tpu.memory_space<vmem>>, vector<1x12x1x8xf32>
    %17 = vector.shape_cast %16 : vector<1x12x1x8xf32> to vector<12x1x8xf32>
    %18 = vector.broadcast %17 : vector<12x1x8xf32> to vector<12x8x8xf32>
    %19 = arith.addf %15, %18 : vector<12x8x8xf32>
    %20 = vector.extract_strided_slice %19 {offsets = [0, 0, 0], sizes = [4, 8, 8], strides = [1, 1, 1]} : vector<12x8x8xf32> to vector<4x8x8xf32>
    %21 = arith.truncf %20 : vector<4x8x8xf32> to vector<4x8x8xbf16>
    %22 = vector.extract_strided_slice %19 {offsets = [4, 0, 0], sizes = [4, 8, 8], strides = [1, 1, 1]} : vector<12x8x8xf32> to vector<4x8x8xf32>
    %23 = arith.truncf %22 : vector<4x8x8xf32> to vector<4x8x8xbf16>
    %24 = vector.extract_strided_slice %19 {offsets = [8, 0, 0], sizes = [4, 8, 8], strides = [1, 1, 1]} : vector<12x8x8xf32> to vector<4x8x8xf32>
    %25 = arith.truncf %24 : vector<4x8x8xf32> to vector<4x8x8xbf16>
    "tpu.trace_start"() <{level = 10 : i32, message = "hqd,hkd->hqk"}> : () -> ()
    %cst_15 = arith.constant dense<0.000000e+00> : vector<4x8x8xf32>
    %26 = tpu.matmul %21, %23, %cst_15 {dimension_numbers = #tpu.dot_dimension_numbers<[2], [2], [1], [1], [0, 0, 0, 1, 1, 1], [0], [0]>} : vector<4x8x8xbf16>, vector<4x8x8xbf16>, vector<4x8x8xf32> -> vector<4x8x8xf32>
    "tpu.trace_stop"() : () -> ()
    %cst_16 = arith.constant 0.353553385 : f32
    %27 = vector.broadcast %cst_16 : f32 to vector<4x8x8xf32>
    %28 = arith.mulf %26, %27 : vector<4x8x8xf32>
    %29 = vector.shape_cast %8 : vector<1x8xf32> to vector<1x1x8xf32>
    %30 = vector.broadcast %29 : vector<1x1x8xf32> to vector<4x8x8xf32>
    %31 = arith.addf %28, %30 : vector<4x8x8xf32>
    %cst_17 = arith.constant dense<0xFF800000> : vector<4x8xf32>
    %32 = vector.multi_reduction <maximumf>, %31, %cst_17 [2] : vector<4x8x8xf32> to vector<4x8xf32>
    %33 = vector.shape_cast %32 : vector<4x8xf32> to vector<4x8x1xf32>
    %34 = vector.broadcast %33 : vector<4x8x1xf32> to vector<4x8x8xf32>
    %35 = arith.subf %31, %34 : vector<4x8x8xf32>
    %36 = math.exp %35 : vector<4x8x8xf32>
    %cst_18 = arith.constant dense<0.000000e+00> : vector<4x8xf32>
    %37 = vector.multi_reduction <add>, %36, %cst_18 [2] : vector<4x8x8xf32> to vector<4x8xf32>
    %38 = vector.shape_cast %37 : vector<4x8xf32> to vector<4x8x1xf32>
    %39 = vector.broadcast %38 : vector<4x8x1xf32> to vector<4x8x8xf32>
    %40 = arith.divf %36, %39 : vector<4x8x8xf32>
    %41 = arith.truncf %40 : vector<4x8x8xf32> to vector<4x8x8xbf16>
    "tpu.trace_start"() <{level = 10 : i32, message = "hqk,hkd->hqd"}> : () -> ()
    %cst_19 = arith.constant dense<0.000000e+00> : vector<4x8x8xf32>
    %42 = tpu.matmul %41, %25, %cst_19 {dimension_numbers = #tpu.dot_dimension_numbers<[2], [1], [1], [2], [0, 0, 0, 1, 1, 2], [0], [0]>} : vector<4x8x8xbf16>, vector<4x8x8xbf16>, vector<4x8x8xf32> -> vector<4x8x8xf32>
    "tpu.trace_stop"() : () -> ()
    %c0_20 = arith.constant 0 : index
    %c0_21 = arith.constant 0 : index
    %c0_22 = arith.constant 0 : index
    %c0_23 = arith.constant 0 : index
    %43 = vector.load %arg6[%c0_20, %c0_21, %c0_22, %c0_23] : memref<1x4x8x32xbf16, #tpu.memory_space<vmem>>, vector<1x4x8x32xbf16>
    %44 = vector.shape_cast %43 : vector<1x4x8x32xbf16> to vector<4x8x32xbf16>
    %c0_24 = arith.constant 0 : index
    %c0_25 = arith.constant 0 : index
    %c0_26 = arith.constant 0 : index
    %45 = vector.load %arg7[%c0_24, %c0_25, %c0_26] : memref<1x1x32xf32, #tpu.memory_space<vmem>>, vector<1x1x32xf32>
    %46 = vector.shape_cast %45 : vector<1x1x32xf32> to vector<1x32xf32>
    %47 = arith.truncf %42 : vector<4x8x8xf32> to vector<4x8x8xbf16>
    "tpu.trace_start"() <{level = 10 : i32, message = "hqd,hdo->hqo"}> : () -> ()
    %cst_27 = arith.constant dense<0.000000e+00> : vector<4x8x32xf32>
    %48 = tpu.matmul %47, %44, %cst_27 {dimension_numbers = #tpu.dot_dimension_numbers<[2], [1], [1], [2], [0, 0, 0, 1, 1, 2], [0], [0]>} : vector<4x8x8xbf16>, vector<4x8x32xbf16>, vector<4x8x32xf32> -> vector<4x8x32xf32>
    "tpu.trace_stop"() : () -> ()
    %cst_28 = arith.constant dense<0.000000e+00> : vector<8x32xf32>
    %49 = vector.multi_reduction <add>, %48, %cst_28 [0] : vector<4x8x32xf32> to vector<8x32xf32>
    %50 = vector.broadcast %46 : vector<1x32xf32> to vector<8x32xf32>
    %51 = arith.addf %49, %50 : vector<8x32xf32>
    %52 = arith.addf %4, %51 : vector<8x32xf32>
    %c0_29 = arith.constant 0 : index
    %c0_30 = arith.constant 0 : index
    %c0_31 = arith.constant 0 : index
    %53 = vector.load %arg8[%c0_29, %c0_30, %c0_31] : memref<1x1x32xf32, #tpu.memory_space<vmem>>, vector<1x1x32xf32>
    %54 = vector.shape_cast %53 : vector<1x1x32xf32> to vector<1x32xf32>
    %c0_32 = arith.constant 0 : index
    %c0_33 = arith.constant 0 : index
    %c0_34 = arith.constant 0 : index
    %55 = vector.load %arg9[%c0_32, %c0_33, %c0_34] : memref<1x1x32xf32, #tpu.memory_space<vmem>>, vector<1x1x32xf32>
    %56 = vector.shape_cast %55 : vector<1x1x32xf32> to vector<1x32xf32>
    %cst_35 = arith.constant dense<0.000000e+00> : vector<8xf32>
    %57 = vector.multi_reduction <add>, %52, %cst_35 [1] : vector<8x32xf32> to vector<8xf32>
    %58 = vector.shape_cast %57 : vector<8xf32> to vector<8x1xf32>
    %cst_36 = arith.constant 3.200000e+01 : f32
    %59 = vector.broadcast %cst_36 : f32 to vector<8x1xf32>
    %60 = arith.divf %58, %59 : vector<8x1xf32>
    %61 = vector.broadcast %60 : vector<8x1xf32> to vector<8x32xf32>
    %62 = arith.subf %52, %61 : vector<8x32xf32>
    %63 = arith.mulf %62, %62 : vector<8x32xf32>
    %cst_37 = arith.constant dense<0.000000e+00> : vector<8xf32>
    %64 = vector.multi_reduction <add>, %63, %cst_37 [1] : vector<8x32xf32> to vector<8xf32>
    %65 = vector.shape_cast %64 : vector<8xf32> to vector<8x1xf32>
    %cst_38 = arith.constant 3.200000e+01 : f32
    %66 = vector.broadcast %cst_38 : f32 to vector<8x1xf32>
    %67 = arith.divf %65, %66 : vector<8x1xf32>
    %cst_39 = arith.constant 9.99999974E-6 : f32
    %68 = vector.broadcast %cst_39 : f32 to vector<8x1xf32>
    %69 = arith.addf %67, %68 : vector<8x1xf32>
    %70 = math.rsqrt %69 : vector<8x1xf32>
    %71 = vector.broadcast %70 : vector<8x1xf32> to vector<8x32xf32>
    %72 = arith.mulf %62, %71 : vector<8x32xf32>
    %73 = vector.broadcast %54 : vector<1x32xf32> to vector<8x32xf32>
    %74 = arith.mulf %72, %73 : vector<8x32xf32>
    %75 = vector.broadcast %56 : vector<1x32xf32> to vector<8x32xf32>
    %76 = arith.addf %74, %75 : vector<8x32xf32>
    %77 = arith.truncf %76 : vector<8x32xf32> to vector<8x32xbf16>
    %c0_40 = arith.constant 0 : index
    %c0_41 = arith.constant 0 : index
    %c0_42 = arith.constant 0 : index
    %78 = vector.load %arg10[%c0_40, %c0_41, %c0_42] : memref<1x32x64xbf16, #tpu.memory_space<vmem>>, vector<1x32x64xbf16>
    %79 = vector.shape_cast %78 : vector<1x32x64xbf16> to vector<32x64xbf16>
    %cst_43 = arith.constant dense<0.000000e+00> : vector<8x64xf32>
    %80 = tpu.matmul %77, %79, %cst_43 {dimension_numbers = #tpu.dot_dimension_numbers<[1], [0], [0], [1], [0, 0, 1, 1], [], []>} : vector<8x32xbf16>, vector<32x64xbf16>, vector<8x64xf32> -> vector<8x64xf32>
    %c0_44 = arith.constant 0 : index
    %c0_45 = arith.constant 0 : index
    %c0_46 = arith.constant 0 : index
    %81 = vector.load %arg11[%c0_44, %c0_45, %c0_46] : memref<1x1x64xf32, #tpu.memory_space<vmem>>, vector<1x1x64xf32>
    %82 = vector.shape_cast %81 : vector<1x1x64xf32> to vector<1x64xf32>
    %83 = vector.broadcast %82 : vector<1x64xf32> to vector<8x64xf32>
    %84 = arith.addf %80, %83 : vector<8x64xf32>
    %cst_47 = arith.constant 0.000000e+00 : f32
    %85 = vector.broadcast %cst_47 : f32 to vector<8x64xf32>
    %86 = arith.maximumf %84, %85 : vector<8x64xf32>
    %87 = arith.truncf %86 : vector<8x64xf32> to vector<8x64xbf16>
    %c0_48 = arith.constant 0 : index
    %c0_49 = arith.constant 0 : index
    %c0_50 = arith.constant 0 : index
    %88 = vector.load %arg12[%c0_48, %c0_49, %c0_50] : memref<1x64x32xbf16, #tpu.memory_space<vmem>>, vector<1x64x32xbf16>
    %89 = vector.shape_cast %88 : vector<1x64x32xbf16> to vector<64x32xbf16>
    %cst_51 = arith.constant dense<0.000000e+00> : vector<8x32xf32>
    %90 = tpu.matmul %87, %89, %cst_51 {dimension_numbers = #tpu.dot_dimension_numbers<[1], [0], [0], [1], [0, 0, 1, 1], [], []>} : vector<8x64xbf16>, vector<64x32xbf16>, vector<8x32xf32> -> vector<8x32xf32>
    %c0_52 = arith.constant 0 : index
    %c0_53 = arith.constant 0 : index
    %c0_54 = arith.constant 0 : index
    %91 = vector.load %arg13[%c0_52, %c0_53, %c0_54] : memref<1x1x32xf32, #tpu.memory_space<vmem>>, vector<1x1x32xf32>
    %92 = vector.shape_cast %91 : vector<1x1x32xf32> to vector<1x32xf32>
    %93 = vector.broadcast %92 : vector<1x32xf32> to vector<8x32xf32>
    %94 = arith.addf %90, %93 : vector<8x32xf32>
    %95 = arith.addf %76, %94 : vector<8x32xf32>
    %c0_55 = arith.constant 0 : index
    %c0_56 = arith.constant 0 : index
    %c0_57 = arith.constant 0 : index
    %96 = vector.load %arg14[%c0_55, %c0_56, %c0_57] : memref<1x1x32xf32, #tpu.memory_space<vmem>>, vector<1x1x32xf32>
    %97 = vector.shape_cast %96 : vector<1x1x32xf32> to vector<1x32xf32>
    %c0_58 = arith.constant 0 : index
    %c0_59 = arith.constant 0 : index
    %c0_60 = arith.constant 0 : index
    %98 = vector.load %arg15[%c0_58, %c0_59, %c0_60] : memref<1x1x32xf32, #tpu.memory_space<vmem>>, vector<1x1x32xf32>
    %99 = vector.shape_cast %98 : vector<1x1x32xf32> to vector<1x32xf32>
    %cst_61 = arith.constant dense<0.000000e+00> : vector<8xf32>
    %100 = vector.multi_reduction <add>, %95, %cst_61 [1] : vector<8x32xf32> to vector<8xf32>
    %101 = vector.shape_cast %100 : vector<8xf32> to vector<8x1xf32>
    %cst_62 = arith.constant 3.200000e+01 : f32
    %102 = vector.broadcast %cst_62 : f32 to vector<8x1xf32>
    %103 = arith.divf %101, %102 : vector<8x1xf32>
    %104 = vector.broadcast %103 : vector<8x1xf32> to vector<8x32xf32>
    %105 = arith.subf %95, %104 : vector<8x32xf32>
    %106 = arith.mulf %105, %105 : vector<8x32xf32>
    %cst_63 = arith.constant dense<0.000000e+00> : vector<8xf32>
    %107 = vector.multi_reduction <add>, %106, %cst_63 [1] : vector<8x32xf32> to vector<8xf32>
    %108 = vector.shape_cast %107 : vector<8xf32> to vector<8x1xf32>
    %cst_64 = arith.constant 3.200000e+01 : f32
    %109 = vector.broadcast %cst_64 : f32 to vector<8x1xf32>
    %110 = arith.divf %108, %109 : vector<8x1xf32>
    %cst_65 = arith.constant 9.99999974E-6 : f32
    %111 = vector.broadcast %cst_65 : f32 to vector<8x1xf32>
    %112 = arith.addf %110, %111 : vector<8x1xf32>
    %113 = math.rsqrt %112 : vector<8x1xf32>
    %114 = vector.broadcast %113 : vector<8x1xf32> to vector<8x32xf32>
    %115 = arith.mulf %105, %114 : vector<8x32xf32>
    %116 = vector.broadcast %97 : vector<1x32xf32> to vector<8x32xf32>
    %117 = arith.mulf %115, %116 : vector<8x32xf32>
    %118 = vector.broadcast %99 : vector<1x32xf32> to vector<8x32xf32>
    %119 = arith.addf %117, %118 : vector<8x32xf32>
    %c0_66 = arith.constant 0 : index
    %c0_67 = arith.constant 0 : index
    %c0_68 = arith.constant 0 : index
    %120 = vector.load %arg16[%c0_66, %c0_67, %c0_68] : memref<1x8x32xf32, #tpu.memory_space<vmem>>, vector<1x8x32xf32>
    %121 = vector.shape_cast %120 : vector<1x8x32xf32> to vector<8x32xf32>
    %122 = vector.shape_cast %119 : vector<8x32xf32> to vector<1x8x32xf32>
    tpu.vector_store %arg16[%c0_66, %c0_67, %c0_68], %122 {strides = array<i32>} : memref<1x8x32xf32, #tpu.memory_space<vmem>>, vector<1x8x32xf32>,
    return
  }
  func.func @transform_0(%arg0: i32, %arg1: i32) -> (i32, i32, i32) {
    %c0_i32 = arith.constant 0 : i32
    %c0_i32_0 = arith.constant 0 : i32
    %c0_i32_1 = arith.constant 0 : i32
    return %arg0, %c0_i32, %c0_i32_0 : i32, i32, i32
  }
  func.func @transform_1(%arg0: i32, %arg1: i32) -> (i32, i32, i32) {
    %c0_i32 = arith.constant 0 : i32
    %c0_i32_0 = arith.constant 0 : i32
    %c0_i32_1 = arith.constant 0 : i32
    return %arg0, %c0_i32, %c0_i32_0 : i32, i32, i32
  }
  func.func @transform_2(%arg0: i32, %arg1: i32) -> (i32, i32, i32, i32) {
    %c0_i32 = arith.constant 0 : i32
    %c0_i32_0 = arith.constant 0 : i32
    %c0_i32_1 = arith.constant 0 : i32
    %c0_i32_2 = arith.constant 0 : i32
    return %arg1, %c0_i32, %c0_i32_0, %c0_i32_1 : i32, i32, i32, i32
  }
  func.func @transform_3(%arg0: i32, %arg1: i32) -> (i32, i32, i32, i32) {
    %c0_i32 = arith.constant 0 : i32
    %c0_i32_0 = arith.constant 0 : i32
    %c0_i32_1 = arith.constant 0 : i32
    %c0_i32_2 = arith.constant 0 : i32
    return %arg1, %c0_i32, %c0_i32_0, %c0_i32_1 : i32, i32, i32, i32
  }
  func.func @transform_4(%arg0: i32, %arg1: i32) -> (i32, i32, i32, i32) {
    %c0_i32 = arith.constant 0 : i32
    %c0_i32_0 = arith.constant 0 : i32
    %c0_i32_1 = arith.constant 0 : i32
    %c0_i32_2 = arith.constant 0 : i32
    return %arg1, %c0_i32, %c0_i32_0, %c0_i32_1 : i32, i32, i32, i32
  }
  func.func @transform_5(%arg0: i32, %arg1: i32) -> (i32, i32, i32) {
    %c0_i32 = arith.constant 0 : i32
    %c0_i32_0 = arith.constant 0 : i32
    %c0_i32_1 = arith.constant 0 : i32
    return %arg1, %c0_i32, %c0_i32_0 : i32, i32, i32
  }
  func.func @transform_6(%arg0: i32, %arg1: i32) -> (i32, i32, i32) {
    %c0_i32 = arith.constant 0 : i32
    %c0_i32_0 = arith.constant 0 : i32
    %c0_i32_1 = arith.constant 0 : i32
    return %arg1, %c0_i32, %c0_i32_0 : i32, i32, i32
  }
  func.func @transform_7(%arg0: i32, %arg1: i32) -> (i32, i32, i32) {
    %c0_i32 = arith.constant 0 : i32
    %c0_i32_0 = arith.constant 0 : i32
    %c0_i32_1 = arith.constant 0 : i32
    return %arg1, %c0_i32, %c0_i32_0 : i32, i32, i32
  }
  func.func @transform_8(%arg0: i32, %arg1: i32) -> (i32, i32, i32) {
    %c0_i32 = arith.constant 0 : i32
    %c0_i32_0 = arith.constant 0 : i32
    %c0_i32_1 = arith.constant 0 : i32
    return %arg1, %c0_i32, %c0_i32_0 : i32, i32, i32
  }
  func.func @transform_9(%arg0: i32, %arg1: i32) -> (i32, i32, i32) {
    %c0_i32 = arith.constant 0 : i32
    %c0_i32_0 = arith.constant 0 : i32
    %c0_i32_1 = arith.constant 0 : i32
    return %arg1, %c0_i32, %c0_i32_0 : i32, i32, i32
  }
  func.func @transform_10(%arg0: i32, %arg1: i32) -> (i32, i32, i32) {
    %c0_i32 = arith.constant 0 : i32
    %c0_i32_0 = arith.constant 0 : i32
    %c0_i32_1 = arith.constant 0 : i32
    return %arg1, %c0_i32, %c0_i32_0 : i32, i32, i32
  }
  func.func @transform_11(%arg0: i32, %arg1: i32) -> (i32, i32, i32) {
    %c0_i32 = arith.constant 0 : i32
    %c0_i32_0 = arith.constant 0 : i32
    %c0_i32_1 = arith.constant 0 : i32
    return %arg1, %c0_i32, %c0_i32_0 : i32, i32, i32
  }
  func.func @transform_12(%arg0: i32, %arg1: i32) -> (i32, i32, i32) {
    %c0_i32 = arith.constant 0 : i32
    %c0_i32_0 = arith.constant 0 : i32
    %c0_i32_1 = arith.constant 0 : i32
    return %arg1, %c0_i32, %c0_i32_0 : i32, i32, i32
  }
  func.func @transform_13(%arg0: i32, %arg1: i32) -> (i32, i32, i32) {
    %c0_i32 = arith.constant 0 : i32
    %c0_i32_0 = arith.constant 0 : i32
    %c0_i32_1 = arith.constant 0 : i32
    return %arg1, %c0_i32, %c0_i32_0 : i32, i32, i32
  }
  func.func @transform_14(%arg0: i32, %arg1: i32) -> (i32, i32, i32) {
    %c0_i32 = arith.constant 0 : i32
    %c0_i32_0 = arith.constant 0 : i32
    %c0_i32_1 = arith.constant 0 : i32
    return %arg0, %c0_i32, %c0_i32_0 : i32, i32, i32
  }
}

module attributes {stable_mosaic.version = 11 : i64} {
  func.func @_final_proj_kernel(%arg0: i32, %arg1: memref<8x32xf32, #tpu.memory_space<vmem>>, %arg2: memref<32x128xbf16, #tpu.memory_space<vmem>>, %arg3: memref<1x128xf32, #tpu.memory_space<vmem>>, %arg4: memref<8x128xf32, #tpu.memory_space<vmem>>) attributes {dimension_semantics = [#tpu.dimension_semantics<parallel>], iteration_bounds = array<i64: 2>, scalar_prefetch = 0 : i64, scratch_operands = 0 : i64, tpu.core_type = #tpu.core_type<tc>, window_params = [{transform_indices = @transform_0, window_bounds = array<i64: 8, 32>}, {pipeline_mode = #tpu.pipeline_mode<synchronous>, transform_indices = @transform_1, window_bounds = array<i64: 32, 128>}, {pipeline_mode = #tpu.pipeline_mode<synchronous>, transform_indices = @transform_2, window_bounds = array<i64: 1, 128>}, {transform_indices = @transform_3, window_bounds = array<i64: 8, 128>}]} {
    %c0 = arith.constant 0 : index
    %c0_0 = arith.constant 0 : index
    %0 = vector.load %arg1[%c0, %c0_0] : memref<8x32xf32, #tpu.memory_space<vmem>>, vector<8x32xf32>
    %1 = arith.truncf %0 : vector<8x32xf32> to vector<8x32xbf16>
    %c0_1 = arith.constant 0 : index
    %c0_2 = arith.constant 0 : index
    %2 = vector.load %arg2[%c0_1, %c0_2] : memref<32x128xbf16, #tpu.memory_space<vmem>>, vector<32x128xbf16>
    %cst = arith.constant dense<0.000000e+00> : vector<8x128xf32>
    %3 = tpu.matmul %1, %2, %cst {dimension_numbers = #tpu.dot_dimension_numbers<[1], [0], [0], [1], [0, 0, 1, 1], [], []>} : vector<8x32xbf16>, vector<32x128xbf16>, vector<8x128xf32> -> vector<8x128xf32>
    %c0_3 = arith.constant 0 : index
    %c0_4 = arith.constant 0 : index
    %4 = vector.load %arg3[%c0_3, %c0_4] : memref<1x128xf32, #tpu.memory_space<vmem>>, vector<1x128xf32>
    %5 = vector.broadcast %4 : vector<1x128xf32> to vector<8x128xf32>
    %6 = arith.addf %3, %5 : vector<8x128xf32>
    %c0_5 = arith.constant 0 : index
    %c0_6 = arith.constant 0 : index
    %7 = vector.load %arg4[%c0_5, %c0_6] : memref<8x128xf32, #tpu.memory_space<vmem>>, vector<8x128xf32>
    tpu.vector_store %arg4[%c0_5, %c0_6], %6 {strides = array<i32>} : memref<8x128xf32, #tpu.memory_space<vmem>>, vector<8x128xf32>,
    return
  }
  func.func @transform_0(%arg0: i32) -> (i32, i32) {
    %c0_i32 = arith.constant 0 : i32
    %c0_i32_0 = arith.constant 0 : i32
    return %arg0, %c0_i32 : i32, i32
  }
  func.func @transform_1(%arg0: i32) -> (i32, i32) {
    %c0_i32 = arith.constant 0 : i32
    %c0_i32_0 = arith.constant 0 : i32
    %c0_i32_1 = arith.constant 0 : i32
    return %c0_i32, %c0_i32_0 : i32, i32
  }
  func.func @transform_2(%arg0: i32) -> (i32, i32) {
    %c0_i32 = arith.constant 0 : i32
    %c0_i32_0 = arith.constant 0 : i32
    %c0_i32_1 = arith.constant 0 : i32
    return %c0_i32, %c0_i32_0 : i32, i32
  }
  func.func @transform_3(%arg0: i32) -> (i32, i32) {
    %c0_i32 = arith.constant 0 : i32
    %c0_i32_0 = arith.constant 0 : i32
    return %arg0, %c0_i32 : i32, i32
  }
}

module attributes {stable_mosaic.version = 11 : i64} {
  func.func @_decoder_stack_kernel(%arg0: i32, %arg1: i32, %arg2: memref<1x8x32xf32, #tpu.memory_space<vmem>>, %arg3: memref<1x8x32xf32, #tpu.memory_space<vmem>>, %arg4: memref<1x8x8xf32, #tpu.memory_space<vmem>>, %arg5: memref<1x1x8xf32, #tpu.memory_space<vmem>>, %arg6: memref<1x12x32x8xbf16, #tpu.memory_space<vmem>>, %arg7: memref<1x12x1x8xf32, #tpu.memory_space<vmem>>, %arg8: memref<1x4x8x32xbf16, #tpu.memory_space<vmem>>, %arg9: memref<1x1x32xf32, #tpu.memory_space<vmem>>, %arg10: memref<1x1x32xf32, #tpu.memory_space<vmem>>, %arg11: memref<1x1x32xf32, #tpu.memory_space<vmem>>, %arg12: memref<1x4x32x8xbf16, #tpu.memory_space<vmem>>, %arg13: memref<1x4x1x8xf32, #tpu.memory_space<vmem>>, %arg14: memref<1x8x32x8xbf16, #tpu.memory_space<vmem>>, %arg15: memref<1x8x1x8xf32, #tpu.memory_space<vmem>>, %arg16: memref<1x4x8x32xbf16, #tpu.memory_space<vmem>>, %arg17: memref<1x1x32xf32, #tpu.memory_space<vmem>>, %arg18: memref<1x1x32xf32, #tpu.memory_space<vmem>>, %arg19: memref<1x1x32xf32, #tpu.memory_space<vmem>>, %arg20: memref<1x32x64xbf16, #tpu.memory_space<vmem>>, %arg21: memref<1x1x64xf32, #tpu.memory_space<vmem>>, %arg22: memref<1x64x32xbf16, #tpu.memory_space<vmem>>, %arg23: memref<1x1x32xf32, #tpu.memory_space<vmem>>, %arg24: memref<1x1x32xf32, #tpu.memory_space<vmem>>, %arg25: memref<1x1x32xf32, #tpu.memory_space<vmem>>, %arg26: memref<1x8x32xf32, #tpu.memory_space<vmem>>, %arg27: memref<1x4x8x8xf32, #tpu.memory_space<vmem>>, %arg28: memref<1x4x8x8xf32, #tpu.memory_space<vmem>>) attributes {dimension_semantics = [#tpu.dimension_semantics<parallel>, #tpu.dimension_semantics<arbitrary>], iteration_bounds = array<i64: 2, 2>, scalar_prefetch = 0 : i64, scratch_operands = 0 : i64, tpu.core_type = #tpu.core_type<tc>, window_params = [{transform_indices = @transform_0, window_bounds = array<i64: 1, 8, 32>}, {transform_indices = @transform_1, window_bounds = array<i64: 1, 8, 32>}, {transform_indices = @transform_2, window_bounds = array<i64: 1, 8, 8>}, {transform_indices = @transform_3, window_bounds = array<i64: 1, 1, 8>}, {transform_indices = @transform_4, window_bounds = array<i64: 1, 12, 32, 8>}, {transform_indices = @transform_5, window_bounds = array<i64: 1, 12, 1, 8>}, {transform_indices = @transform_6, window_bounds = array<i64: 1, 4, 8, 32>}, {transform_indices = @transform_7, window_bounds = array<i64: 1, 1, 32>}, {transform_indices = @transform_8, window_bounds = array<i64: 1, 1, 32>}, {transform_indices = @transform_9, window_bounds = array<i64: 1, 1, 32>}, {transform_indices = @transform_10, window_bounds = array<i64: 1, 4, 32, 8>}, {transform_indices = @transform_11, window_bounds = array<i64: 1, 4, 1, 8>}, {transform_indices = @transform_12, window_bounds = array<i64: 1, 8, 32, 8>}, {transform_indices = @transform_13, window_bounds = array<i64: 1, 8, 1, 8>}, {transform_indices = @transform_14, window_bounds = array<i64: 1, 4, 8, 32>}, {transform_indices = @transform_15, window_bounds = array<i64: 1, 1, 32>}, {transform_indices = @transform_16, window_bounds = array<i64: 1, 1, 32>}, {transform_indices = @transform_17, window_bounds = array<i64: 1, 1, 32>}, {transform_indices = @transform_18, window_bounds = array<i64: 1, 32, 64>}, {transform_indices = @transform_19, window_bounds = array<i64: 1, 1, 64>}, {transform_indices = @transform_20, window_bounds = array<i64: 1, 64, 32>}, {transform_indices = @transform_21, window_bounds = array<i64: 1, 1, 32>}, {transform_indices = @transform_22, window_bounds = array<i64: 1, 1, 32>}, {transform_indices = @transform_23, window_bounds = array<i64: 1, 1, 32>}, {transform_indices = @transform_24, window_bounds = array<i64: 1, 8, 32>}, {transform_indices = @transform_25, window_bounds = array<i64: 1, 4, 8, 8>}, {transform_indices = @transform_26, window_bounds = array<i64: 1, 4, 8, 8>}]} {
    %c0_i32 = arith.constant 0 : i32
    %0 = arith.cmpi eq, %arg1, %c0_i32 : i32
    %1 = arith.extui %0 : i1 to i32
    %c0_i32_0 = arith.constant 0 : i32
    %2 = arith.cmpi ne, %1, %c0_i32_0 : i32
    scf.if %2 {
      %c0_127 = arith.constant 0 : index
      %c0_128 = arith.constant 0 : index
      %c0_129 = arith.constant 0 : index
      %213 = vector.load %arg2[%c0_127, %c0_128, %c0_129] : memref<1x8x32xf32, #tpu.memory_space<vmem>>, vector<1x8x32xf32>
      %214 = vector.shape_cast %213 : vector<1x8x32xf32> to vector<8x32xf32>
      %c0_130 = arith.constant 0 : index
      %c0_131 = arith.constant 0 : index
      %c0_132 = arith.constant 0 : index
      %215 = vector.load %arg26[%c0_130, %c0_131, %c0_132] : memref<1x8x32xf32, #tpu.memory_space<vmem>>, vector<1x8x32xf32>
      %216 = vector.shape_cast %215 : vector<1x8x32xf32> to vector<8x32xf32>
      %217 = vector.shape_cast %214 : vector<8x32xf32> to vector<1x8x32xf32>
      tpu.vector_store %arg26[%c0_130, %c0_131, %c0_132], %217 {strides = array<i32>} : memref<1x8x32xf32, #tpu.memory_space<vmem>>, vector<1x8x32xf32>,
    } else {
    }
    %c0 = arith.constant 0 : index
    %c0_1 = arith.constant 0 : index
    %c0_2 = arith.constant 0 : index
    %3 = vector.load %arg26[%c0, %c0_1, %c0_2] : memref<1x8x32xf32, #tpu.memory_space<vmem>>, vector<1x8x32xf32>
    %4 = vector.shape_cast %3 : vector<1x8x32xf32> to vector<8x32xf32>
    %c0_3 = arith.constant 0 : index
    %c0_4 = arith.constant 0 : index
    %c0_5 = arith.constant 0 : index
    %5 = vector.load %arg3[%c0_3, %c0_4, %c0_5] : memref<1x8x32xf32, #tpu.memory_space<vmem>>, vector<1x8x32xf32>
    %6 = vector.shape_cast %5 : vector<1x8x32xf32> to vector<8x32xf32>
    %c0_6 = arith.constant 0 : index
    %c0_7 = arith.constant 0 : index
    %c0_8 = arith.constant 0 : index
    %7 = vector.load %arg4[%c0_6, %c0_7, %c0_8] : memref<1x8x8xf32, #tpu.memory_space<vmem>>, vector<1x8x8xf32>
    %8 = vector.shape_cast %7 : vector<1x8x8xf32> to vector<8x8xf32>
    %cst = arith.constant -1.000000e+09 : f32
    %9 = vector.broadcast %cst : f32 to vector<8x8xf32>
    %10 = arith.mulf %8, %9 : vector<8x8xf32>
    %c0_9 = arith.constant 0 : index
    %c0_10 = arith.constant 0 : index
    %c0_11 = arith.constant 0 : index
    %11 = vector.load %arg5[%c0_9, %c0_10, %c0_11] : memref<1x1x8xf32, #tpu.memory_space<vmem>>, vector<1x1x8xf32>
    %12 = vector.shape_cast %11 : vector<1x1x8xf32> to vector<1x8xf32>
    %cst_12 = arith.constant -1.000000e+09 : f32
    %13 = vector.broadcast %cst_12 : f32 to vector<1x8xf32>
    %14 = arith.mulf %12, %13 : vector<1x8xf32>
    %15 = arith.truncf %4 : vector<8x32xf32> to vector<8x32xbf16>
    %16 = vector.shape_cast %15 : vector<8x32xbf16> to vector<1x8x32xbf16>
    %17 = vector.shape_cast %16 : vector<1x8x32xbf16> to vector<1x8x32xbf16>
    %18 = vector.broadcast %17 : vector<1x8x32xbf16> to vector<12x8x32xbf16>
    %c0_13 = arith.constant 0 : index
    %c0_14 = arith.constant 0 : index
    %c0_15 = arith.constant 0 : index
    %c0_16 = arith.constant 0 : index
    %19 = vector.load %arg6[%c0_13, %c0_14, %c0_15, %c0_16] : memref<1x12x32x8xbf16, #tpu.memory_space<vmem>>, vector<1x12x32x8xbf16>
    %20 = vector.shape_cast %19 : vector<1x12x32x8xbf16> to vector<12x32x8xbf16>
    "tpu.trace_start"() <{level = 10 : i32, message = "hld,hdk->hlk"}> : () -> ()
    %cst_17 = arith.constant dense<0.000000e+00> : vector<12x8x8xf32>
    %21 = tpu.matmul %18, %20, %cst_17 {dimension_numbers = #tpu.dot_dimension_numbers<[2], [1], [1], [2], [0, 0, 0, 1, 1, 2], [0], [0]>} : vector<12x8x32xbf16>, vector<12x32x8xbf16>, vector<12x8x8xf32> -> vector<12x8x8xf32>
    "tpu.trace_stop"() : () -> ()
    %c0_18 = arith.constant 0 : index
    %c0_19 = arith.constant 0 : index
    %c0_20 = arith.constant 0 : index
    %c0_21 = arith.constant 0 : index
    %22 = vector.load %arg7[%c0_18, %c0_19, %c0_20, %c0_21] : memref<1x12x1x8xf32, #tpu.memory_space<vmem>>, vector<1x12x1x8xf32>
    %23 = vector.shape_cast %22 : vector<1x12x1x8xf32> to vector<12x1x8xf32>
    %24 = vector.broadcast %23 : vector<12x1x8xf32> to vector<12x8x8xf32>
    %25 = arith.addf %21, %24 : vector<12x8x8xf32>
    %26 = vector.extract_strided_slice %25 {offsets = [0, 0, 0], sizes = [4, 8, 8], strides = [1, 1, 1]} : vector<12x8x8xf32> to vector<4x8x8xf32>
    %27 = arith.truncf %26 : vector<4x8x8xf32> to vector<4x8x8xbf16>
    %28 = vector.extract_strided_slice %25 {offsets = [4, 0, 0], sizes = [4, 8, 8], strides = [1, 1, 1]} : vector<12x8x8xf32> to vector<4x8x8xf32>
    %29 = arith.truncf %28 : vector<4x8x8xf32> to vector<4x8x8xbf16>
    %30 = vector.extract_strided_slice %25 {offsets = [8, 0, 0], sizes = [4, 8, 8], strides = [1, 1, 1]} : vector<12x8x8xf32> to vector<4x8x8xf32>
    %31 = arith.truncf %30 : vector<4x8x8xf32> to vector<4x8x8xbf16>
    "tpu.trace_start"() <{level = 10 : i32, message = "hqd,hkd->hqk"}> : () -> ()
    %cst_22 = arith.constant dense<0.000000e+00> : vector<4x8x8xf32>
    %32 = tpu.matmul %27, %29, %cst_22 {dimension_numbers = #tpu.dot_dimension_numbers<[2], [2], [1], [1], [0, 0, 0, 1, 1, 1], [0], [0]>} : vector<4x8x8xbf16>, vector<4x8x8xbf16>, vector<4x8x8xf32> -> vector<4x8x8xf32>
    "tpu.trace_stop"() : () -> ()
    %cst_23 = arith.constant 0.353553385 : f32
    %33 = vector.broadcast %cst_23 : f32 to vector<4x8x8xf32>
    %34 = arith.mulf %32, %33 : vector<4x8x8xf32>
    %35 = vector.shape_cast %10 : vector<8x8xf32> to vector<1x8x8xf32>
    %36 = vector.broadcast %35 : vector<1x8x8xf32> to vector<4x8x8xf32>
    %37 = arith.addf %34, %36 : vector<4x8x8xf32>
    %cst_24 = arith.constant dense<0xFF800000> : vector<4x8xf32>
    %38 = vector.multi_reduction <maximumf>, %37, %cst_24 [2] : vector<4x8x8xf32> to vector<4x8xf32>
    %39 = vector.shape_cast %38 : vector<4x8xf32> to vector<4x8x1xf32>
    %40 = vector.broadcast %39 : vector<4x8x1xf32> to vector<4x8x8xf32>
    %41 = arith.subf %37, %40 : vector<4x8x8xf32>
    %42 = math.exp %41 : vector<4x8x8xf32>
    %cst_25 = arith.constant dense<0.000000e+00> : vector<4x8xf32>
    %43 = vector.multi_reduction <add>, %42, %cst_25 [2] : vector<4x8x8xf32> to vector<4x8xf32>
    %44 = vector.shape_cast %43 : vector<4x8xf32> to vector<4x8x1xf32>
    %45 = vector.broadcast %44 : vector<4x8x1xf32> to vector<4x8x8xf32>
    %46 = arith.divf %42, %45 : vector<4x8x8xf32>
    %47 = arith.truncf %46 : vector<4x8x8xf32> to vector<4x8x8xbf16>
    "tpu.trace_start"() <{level = 10 : i32, message = "hqk,hkd->hqd"}> : () -> ()
    %cst_26 = arith.constant dense<0.000000e+00> : vector<4x8x8xf32>
    %48 = tpu.matmul %47, %31, %cst_26 {dimension_numbers = #tpu.dot_dimension_numbers<[2], [1], [1], [2], [0, 0, 0, 1, 1, 2], [0], [0]>} : vector<4x8x8xbf16>, vector<4x8x8xbf16>, vector<4x8x8xf32> -> vector<4x8x8xf32>
    "tpu.trace_stop"() : () -> ()
    %c0_27 = arith.constant 0 : index
    %c0_28 = arith.constant 0 : index
    %c0_29 = arith.constant 0 : index
    %c0_30 = arith.constant 0 : index
    %49 = vector.load %arg27[%c0_27, %c0_28, %c0_29, %c0_30] : memref<1x4x8x8xf32, #tpu.memory_space<vmem>>, vector<1x4x8x8xf32>
    %50 = vector.shape_cast %49 : vector<1x4x8x8xf32> to vector<4x8x8xf32>
    %51 = vector.shape_cast %46 : vector<4x8x8xf32> to vector<1x4x8x8xf32>
    tpu.vector_store %arg27[%c0_27, %c0_28, %c0_29, %c0_30], %51 {strides = array<i32>} : memref<1x4x8x8xf32, #tpu.memory_space<vmem>>, vector<1x4x8x8xf32>,
    %c0_31 = arith.constant 0 : index
    %c0_32 = arith.constant 0 : index
    %c0_33 = arith.constant 0 : index
    %c0_34 = arith.constant 0 : index
    %52 = vector.load %arg8[%c0_31, %c0_32, %c0_33, %c0_34] : memref<1x4x8x32xbf16, #tpu.memory_space<vmem>>, vector<1x4x8x32xbf16>
    %53 = vector.shape_cast %52 : vector<1x4x8x32xbf16> to vector<4x8x32xbf16>
    %c0_35 = arith.constant 0 : index
    %c0_36 = arith.constant 0 : index
    %c0_37 = arith.constant 0 : index
    %54 = vector.load %arg9[%c0_35, %c0_36, %c0_37] : memref<1x1x32xf32, #tpu.memory_space<vmem>>, vector<1x1x32xf32>
    %55 = vector.shape_cast %54 : vector<1x1x32xf32> to vector<1x32xf32>
    %56 = arith.truncf %48 : vector<4x8x8xf32> to vector<4x8x8xbf16>
    "tpu.trace_start"() <{level = 10 : i32, message = "hqd,hdo->hqo"}> : () -> ()
    %cst_38 = arith.constant dense<0.000000e+00> : vector<4x8x32xf32>
    %57 = tpu.matmul %56, %53, %cst_38 {dimension_numbers = #tpu.dot_dimension_numbers<[2], [1], [1], [2], [0, 0, 0, 1, 1, 2], [0], [0]>} : vector<4x8x8xbf16>, vector<4x8x32xbf16>, vector<4x8x32xf32> -> vector<4x8x32xf32>
    "tpu.trace_stop"() : () -> ()
    %cst_39 = arith.constant dense<0.000000e+00> : vector<8x32xf32>
    %58 = vector.multi_reduction <add>, %57, %cst_39 [0] : vector<4x8x32xf32> to vector<8x32xf32>
    %59 = vector.broadcast %55 : vector<1x32xf32> to vector<8x32xf32>
    %60 = arith.addf %58, %59 : vector<8x32xf32>
    %61 = arith.addf %4, %60 : vector<8x32xf32>
    %c0_40 = arith.constant 0 : index
    %c0_41 = arith.constant 0 : index
    %c0_42 = arith.constant 0 : index
    %62 = vector.load %arg10[%c0_40, %c0_41, %c0_42] : memref<1x1x32xf32, #tpu.memory_space<vmem>>, vector<1x1x32xf32>
    %63 = vector.shape_cast %62 : vector<1x1x32xf32> to vector<1x32xf32>
    %c0_43 = arith.constant 0 : index
    %c0_44 = arith.constant 0 : index
    %c0_45 = arith.constant 0 : index
    %64 = vector.load %arg11[%c0_43, %c0_44, %c0_45] : memref<1x1x32xf32, #tpu.memory_space<vmem>>, vector<1x1x32xf32>
    %65 = vector.shape_cast %64 : vector<1x1x32xf32> to vector<1x32xf32>
    %cst_46 = arith.constant dense<0.000000e+00> : vector<8xf32>
    %66 = vector.multi_reduction <add>, %61, %cst_46 [1] : vector<8x32xf32> to vector<8xf32>
    %67 = vector.shape_cast %66 : vector<8xf32> to vector<8x1xf32>
    %cst_47 = arith.constant 3.200000e+01 : f32
    %68 = vector.broadcast %cst_47 : f32 to vector<8x1xf32>
    %69 = arith.divf %67, %68 : vector<8x1xf32>
    %70 = vector.broadcast %69 : vector<8x1xf32> to vector<8x32xf32>
    %71 = arith.subf %61, %70 : vector<8x32xf32>
    %72 = arith.mulf %71, %71 : vector<8x32xf32>
    %cst_48 = arith.constant dense<0.000000e+00> : vector<8xf32>
    %73 = vector.multi_reduction <add>, %72, %cst_48 [1] : vector<8x32xf32> to vector<8xf32>
    %74 = vector.shape_cast %73 : vector<8xf32> to vector<8x1xf32>
    %cst_49 = arith.constant 3.200000e+01 : f32
    %75 = vector.broadcast %cst_49 : f32 to vector<8x1xf32>
    %76 = arith.divf %74, %75 : vector<8x1xf32>
    %cst_50 = arith.constant 9.99999974E-6 : f32
    %77 = vector.broadcast %cst_50 : f32 to vector<8x1xf32>
    %78 = arith.addf %76, %77 : vector<8x1xf32>
    %79 = math.rsqrt %78 : vector<8x1xf32>
    %80 = vector.broadcast %79 : vector<8x1xf32> to vector<8x32xf32>
    %81 = arith.mulf %71, %80 : vector<8x32xf32>
    %82 = vector.broadcast %63 : vector<1x32xf32> to vector<8x32xf32>
    %83 = arith.mulf %81, %82 : vector<8x32xf32>
    %84 = vector.broadcast %65 : vector<1x32xf32> to vector<8x32xf32>
    %85 = arith.addf %83, %84 : vector<8x32xf32>
    %86 = arith.truncf %85 : vector<8x32xf32> to vector<8x32xbf16>
    %87 = vector.shape_cast %86 : vector<8x32xbf16> to vector<1x8x32xbf16>
    %88 = vector.shape_cast %87 : vector<1x8x32xbf16> to vector<1x8x32xbf16>
    %89 = vector.broadcast %88 : vector<1x8x32xbf16> to vector<4x8x32xbf16>
    %c0_51 = arith.constant 0 : index
    %c0_52 = arith.constant 0 : index
    %c0_53 = arith.constant 0 : index
    %c0_54 = arith.constant 0 : index
    %90 = vector.load %arg12[%c0_51, %c0_52, %c0_53, %c0_54] : memref<1x4x32x8xbf16, #tpu.memory_space<vmem>>, vector<1x4x32x8xbf16>
    %91 = vector.shape_cast %90 : vector<1x4x32x8xbf16> to vector<4x32x8xbf16>
    "tpu.trace_start"() <{level = 10 : i32, message = "hld,hdk->hlk"}> : () -> ()
    %cst_55 = arith.constant dense<0.000000e+00> : vector<4x8x8xf32>
    %92 = tpu.matmul %89, %91, %cst_55 {dimension_numbers = #tpu.dot_dimension_numbers<[2], [1], [1], [2], [0, 0, 0, 1, 1, 2], [0], [0]>} : vector<4x8x32xbf16>, vector<4x32x8xbf16>, vector<4x8x8xf32> -> vector<4x8x8xf32>
    "tpu.trace_stop"() : () -> ()
    %c0_56 = arith.constant 0 : index
    %c0_57 = arith.constant 0 : index
    %c0_58 = arith.constant 0 : index
    %c0_59 = arith.constant 0 : index
    %93 = vector.load %arg13[%c0_56, %c0_57, %c0_58, %c0_59] : memref<1x4x1x8xf32, #tpu.memory_space<vmem>>, vector<1x4x1x8xf32>
    %94 = vector.shape_cast %93 : vector<1x4x1x8xf32> to vector<4x1x8xf32>
    %95 = vector.broadcast %94 : vector<4x1x8xf32> to vector<4x8x8xf32>
    %96 = arith.addf %92, %95 : vector<4x8x8xf32>
    %97 = arith.truncf %96 : vector<4x8x8xf32> to vector<4x8x8xbf16>
    %98 = arith.truncf %6 : vector<8x32xf32> to vector<8x32xbf16>
    %99 = vector.shape_cast %98 : vector<8x32xbf16> to vector<1x8x32xbf16>
    %100 = vector.shape_cast %99 : vector<1x8x32xbf16> to vector<1x8x32xbf16>
    %101 = vector.broadcast %100 : vector<1x8x32xbf16> to vector<8x8x32xbf16>
    %c0_60 = arith.constant 0 : index
    %c0_61 = arith.constant 0 : index
    %c0_62 = arith.constant 0 : index
    %c0_63 = arith.constant 0 : index
    %102 = vector.load %arg14[%c0_60, %c0_61, %c0_62, %c0_63] : memref<1x8x32x8xbf16, #tpu.memory_space<vmem>>, vector<1x8x32x8xbf16>
    %103 = vector.shape_cast %102 : vector<1x8x32x8xbf16> to vector<8x32x8xbf16>
    "tpu.trace_start"() <{level = 10 : i32, message = "hld,hdk->hlk"}> : () -> ()
    %cst_64 = arith.constant dense<0.000000e+00> : vector<8x8x8xf32>
    %104 = tpu.matmul %101, %103, %cst_64 {dimension_numbers = #tpu.dot_dimension_numbers<[2], [1], [1], [2], [0, 0, 0, 1, 1, 2], [0], [0]>} : vector<8x8x32xbf16>, vector<8x32x8xbf16>, vector<8x8x8xf32> -> vector<8x8x8xf32>
    "tpu.trace_stop"() : () -> ()
    %c0_65 = arith.constant 0 : index
    %c0_66 = arith.constant 0 : index
    %c0_67 = arith.constant 0 : index
    %c0_68 = arith.constant 0 : index
    %105 = vector.load %arg15[%c0_65, %c0_66, %c0_67, %c0_68] : memref<1x8x1x8xf32, #tpu.memory_space<vmem>>, vector<1x8x1x8xf32>
    %106 = vector.shape_cast %105 : vector<1x8x1x8xf32> to vector<8x1x8xf32>
    %107 = vector.broadcast %106 : vector<8x1x8xf32> to vector<8x8x8xf32>
    %108 = arith.addf %104, %107 : vector<8x8x8xf32>
    %109 = vector.extract_strided_slice %108 {offsets = [0, 0, 0], sizes = [4, 8, 8], strides = [1, 1, 1]} : vector<8x8x8xf32> to vector<4x8x8xf32>
    %110 = arith.truncf %109 : vector<4x8x8xf32> to vector<4x8x8xbf16>
    %111 = vector.extract_strided_slice %108 {offsets = [4, 0, 0], sizes = [4, 8, 8], strides = [1, 1, 1]} : vector<8x8x8xf32> to vector<4x8x8xf32>
    %112 = arith.truncf %111 : vector<4x8x8xf32> to vector<4x8x8xbf16>
    "tpu.trace_start"() <{level = 10 : i32, message = "hqd,hkd->hqk"}> : () -> ()
    %cst_69 = arith.constant dense<0.000000e+00> : vector<4x8x8xf32>
    %113 = tpu.matmul %97, %110, %cst_69 {dimension_numbers = #tpu.dot_dimension_numbers<[2], [2], [1], [1], [0, 0, 0, 1, 1, 1], [0], [0]>} : vector<4x8x8xbf16>, vector<4x8x8xbf16>, vector<4x8x8xf32> -> vector<4x8x8xf32>
    "tpu.trace_stop"() : () -> ()
    %cst_70 = arith.constant 0.353553385 : f32
    %114 = vector.broadcast %cst_70 : f32 to vector<4x8x8xf32>
    %115 = arith.mulf %113, %114 : vector<4x8x8xf32>
    %116 = vector.shape_cast %14 : vector<1x8xf32> to vector<1x1x8xf32>
    %117 = vector.broadcast %116 : vector<1x1x8xf32> to vector<4x8x8xf32>
    %118 = arith.addf %115, %117 : vector<4x8x8xf32>
    %cst_71 = arith.constant dense<0xFF800000> : vector<4x8xf32>
    %119 = vector.multi_reduction <maximumf>, %118, %cst_71 [2] : vector<4x8x8xf32> to vector<4x8xf32>
    %120 = vector.shape_cast %119 : vector<4x8xf32> to vector<4x8x1xf32>
    %121 = vector.broadcast %120 : vector<4x8x1xf32> to vector<4x8x8xf32>
    %122 = arith.subf %118, %121 : vector<4x8x8xf32>
    %123 = math.exp %122 : vector<4x8x8xf32>
    %cst_72 = arith.constant dense<0.000000e+00> : vector<4x8xf32>
    %124 = vector.multi_reduction <add>, %123, %cst_72 [2] : vector<4x8x8xf32> to vector<4x8xf32>
    %125 = vector.shape_cast %124 : vector<4x8xf32> to vector<4x8x1xf32>
    %126 = vector.broadcast %125 : vector<4x8x1xf32> to vector<4x8x8xf32>
    %127 = arith.divf %123, %126 : vector<4x8x8xf32>
    %128 = arith.truncf %127 : vector<4x8x8xf32> to vector<4x8x8xbf16>
    "tpu.trace_start"() <{level = 10 : i32, message = "hqk,hkd->hqd"}> : () -> ()
    %cst_73 = arith.constant dense<0.000000e+00> : vector<4x8x8xf32>
    %129 = tpu.matmul %128, %112, %cst_73 {dimension_numbers = #tpu.dot_dimension_numbers<[2], [1], [1], [2], [0, 0, 0, 1, 1, 2], [0], [0]>} : vector<4x8x8xbf16>, vector<4x8x8xbf16>, vector<4x8x8xf32> -> vector<4x8x8xf32>
    "tpu.trace_stop"() : () -> ()
    %c0_74 = arith.constant 0 : index
    %c0_75 = arith.constant 0 : index
    %c0_76 = arith.constant 0 : index
    %c0_77 = arith.constant 0 : index
    %130 = vector.load %arg28[%c0_74, %c0_75, %c0_76, %c0_77] : memref<1x4x8x8xf32, #tpu.memory_space<vmem>>, vector<1x4x8x8xf32>
    %131 = vector.shape_cast %130 : vector<1x4x8x8xf32> to vector<4x8x8xf32>
    %132 = vector.shape_cast %127 : vector<4x8x8xf32> to vector<1x4x8x8xf32>
    tpu.vector_store %arg28[%c0_74, %c0_75, %c0_76, %c0_77], %132 {strides = array<i32>} : memref<1x4x8x8xf32, #tpu.memory_space<vmem>>, vector<1x4x8x8xf32>,
    %c0_78 = arith.constant 0 : index
    %c0_79 = arith.constant 0 : index
    %c0_80 = arith.constant 0 : index
    %c0_81 = arith.constant 0 : index
    %133 = vector.load %arg16[%c0_78, %c0_79, %c0_80, %c0_81] : memref<1x4x8x32xbf16, #tpu.memory_space<vmem>>, vector<1x4x8x32xbf16>
    %134 = vector.shape_cast %133 : vector<1x4x8x32xbf16> to vector<4x8x32xbf16>
    %c0_82 = arith.constant 0 : index
    %c0_83 = arith.constant 0 : index
    %c0_84 = arith.constant 0 : index
    %135 = vector.load %arg17[%c0_82, %c0_83, %c0_84] : memref<1x1x32xf32, #tpu.memory_space<vmem>>, vector<1x1x32xf32>
    %136 = vector.shape_cast %135 : vector<1x1x32xf32> to vector<1x32xf32>
    %137 = arith.truncf %129 : vector<4x8x8xf32> to vector<4x8x8xbf16>
    "tpu.trace_start"() <{level = 10 : i32, message = "hqd,hdo->hqo"}> : () -> ()
    %cst_85 = arith.constant dense<0.000000e+00> : vector<4x8x32xf32>
    %138 = tpu.matmul %137, %134, %cst_85 {dimension_numbers = #tpu.dot_dimension_numbers<[2], [1], [1], [2], [0, 0, 0, 1, 1, 2], [0], [0]>} : vector<4x8x8xbf16>, vector<4x8x32xbf16>, vector<4x8x32xf32> -> vector<4x8x32xf32>
    "tpu.trace_stop"() : () -> ()
    %cst_86 = arith.constant dense<0.000000e+00> : vector<8x32xf32>
    %139 = vector.multi_reduction <add>, %138, %cst_86 [0] : vector<4x8x32xf32> to vector<8x32xf32>
    %140 = vector.broadcast %136 : vector<1x32xf32> to vector<8x32xf32>
    %141 = arith.addf %139, %140 : vector<8x32xf32>
    %142 = arith.addf %85, %141 : vector<8x32xf32>
    %c0_87 = arith.constant 0 : index
    %c0_88 = arith.constant 0 : index
    %c0_89 = arith.constant 0 : index
    %143 = vector.load %arg18[%c0_87, %c0_88, %c0_89] : memref<1x1x32xf32, #tpu.memory_space<vmem>>, vector<1x1x32xf32>
    %144 = vector.shape_cast %143 : vector<1x1x32xf32> to vector<1x32xf32>
    %c0_90 = arith.constant 0 : index
    %c0_91 = arith.constant 0 : index
    %c0_92 = arith.constant 0 : index
    %145 = vector.load %arg19[%c0_90, %c0_91, %c0_92] : memref<1x1x32xf32, #tpu.memory_space<vmem>>, vector<1x1x32xf32>
    %146 = vector.shape_cast %145 : vector<1x1x32xf32> to vector<1x32xf32>
    %cst_93 = arith.constant dense<0.000000e+00> : vector<8xf32>
    %147 = vector.multi_reduction <add>, %142, %cst_93 [1] : vector<8x32xf32> to vector<8xf32>
    %148 = vector.shape_cast %147 : vector<8xf32> to vector<8x1xf32>
    %cst_94 = arith.constant 3.200000e+01 : f32
    %149 = vector.broadcast %cst_94 : f32 to vector<8x1xf32>
    %150 = arith.divf %148, %149 : vector<8x1xf32>
    %151 = vector.broadcast %150 : vector<8x1xf32> to vector<8x32xf32>
    %152 = arith.subf %142, %151 : vector<8x32xf32>
    %153 = arith.mulf %152, %152 : vector<8x32xf32>
    %cst_95 = arith.constant dense<0.000000e+00> : vector<8xf32>
    %154 = vector.multi_reduction <add>, %153, %cst_95 [1] : vector<8x32xf32> to vector<8xf32>
    %155 = vector.shape_cast %154 : vector<8xf32> to vector<8x1xf32>
    %cst_96 = arith.constant 3.200000e+01 : f32
    %156 = vector.broadcast %cst_96 : f32 to vector<8x1xf32>
    %157 = arith.divf %155, %156 : vector<8x1xf32>
    %cst_97 = arith.constant 9.99999974E-6 : f32
    %158 = vector.broadcast %cst_97 : f32 to vector<8x1xf32>
    %159 = arith.addf %157, %158 : vector<8x1xf32>
    %160 = math.rsqrt %159 : vector<8x1xf32>
    %161 = vector.broadcast %160 : vector<8x1xf32> to vector<8x32xf32>
    %162 = arith.mulf %152, %161 : vector<8x32xf32>
    %163 = vector.broadcast %144 : vector<1x32xf32> to vector<8x32xf32>
    %164 = arith.mulf %162, %163 : vector<8x32xf32>
    %165 = vector.broadcast %146 : vector<1x32xf32> to vector<8x32xf32>
    %166 = arith.addf %164, %165 : vector<8x32xf32>
    %167 = arith.truncf %166 : vector<8x32xf32> to vector<8x32xbf16>
    %c0_98 = arith.constant 0 : index
    %c0_99 = arith.constant 0 : index
    %c0_100 = arith.constant 0 : index
    %168 = vector.load %arg20[%c0_98, %c0_99, %c0_100] : memref<1x32x64xbf16, #tpu.memory_space<vmem>>, vector<1x32x64xbf16>
    %169 = vector.shape_cast %168 : vector<1x32x64xbf16> to vector<32x64xbf16>
    %cst_101 = arith.constant dense<0.000000e+00> : vector<8x64xf32>
    %170 = tpu.matmul %167, %169, %cst_101 {dimension_numbers = #tpu.dot_dimension_numbers<[1], [0], [0], [1], [0, 0, 1, 1], [], []>} : vector<8x32xbf16>, vector<32x64xbf16>, vector<8x64xf32> -> vector<8x64xf32>
    %c0_102 = arith.constant 0 : index
    %c0_103 = arith.constant 0 : index
    %c0_104 = arith.constant 0 : index
    %171 = vector.load %arg21[%c0_102, %c0_103, %c0_104] : memref<1x1x64xf32, #tpu.memory_space<vmem>>, vector<1x1x64xf32>
    %172 = vector.shape_cast %171 : vector<1x1x64xf32> to vector<1x64xf32>
    %173 = vector.broadcast %172 : vector<1x64xf32> to vector<8x64xf32>
    %174 = arith.addf %170, %173 : vector<8x64xf32>
    %cst_105 = arith.constant 0.000000e+00 : f32
    %175 = vector.broadcast %cst_105 : f32 to vector<8x64xf32>
    %176 = arith.maximumf %174, %175 : vector<8x64xf32>
    %177 = arith.truncf %176 : vector<8x64xf32> to vector<8x64xbf16>
    %c0_106 = arith.constant 0 : index
    %c0_107 = arith.constant 0 : index
    %c0_108 = arith.constant 0 : index
    %178 = vector.load %arg22[%c0_106, %c0_107, %c0_108] : memref<1x64x32xbf16, #tpu.memory_space<vmem>>, vector<1x64x32xbf16>
    %179 = vector.shape_cast %178 : vector<1x64x32xbf16> to vector<64x32xbf16>
    %cst_109 = arith.constant dense<0.000000e+00> : vector<8x32xf32>
    %180 = tpu.matmul %177, %179, %cst_109 {dimension_numbers = #tpu.dot_dimension_numbers<[1], [0], [0], [1], [0, 0, 1, 1], [], []>} : vector<8x64xbf16>, vector<64x32xbf16>, vector<8x32xf32> -> vector<8x32xf32>
    %c0_110 = arith.constant 0 : index
    %c0_111 = arith.constant 0 : index
    %c0_112 = arith.constant 0 : index
    %181 = vector.load %arg23[%c0_110, %c0_111, %c0_112] : memref<1x1x32xf32, #tpu.memory_space<vmem>>, vector<1x1x32xf32>
    %182 = vector.shape_cast %181 : vector<1x1x32xf32> to vector<1x32xf32>
    %183 = vector.broadcast %182 : vector<1x32xf32> to vector<8x32xf32>
    %184 = arith.addf %180, %183 : vector<8x32xf32>
    %185 = arith.addf %166, %184 : vector<8x32xf32>
    %c0_113 = arith.constant 0 : index
    %c0_114 = arith.constant 0 : index
    %c0_115 = arith.constant 0 : index
    %186 = vector.load %arg24[%c0_113, %c0_114, %c0_115] : memref<1x1x32xf32, #tpu.memory_space<vmem>>, vector<1x1x32xf32>
    %187 = vector.shape_cast %186 : vector<1x1x32xf32> to vector<1x32xf32>
    %c0_116 = arith.constant 0 : index
    %c0_117 = arith.constant 0 : index
    %c0_118 = arith.constant 0 : index
    %188 = vector.load %arg25[%c0_116, %c0_117, %c0_118] : memref<1x1x32xf32, #tpu.memory_space<vmem>>, vector<1x1x32xf32>
    %189 = vector.shape_cast %188 : vector<1x1x32xf32> to vector<1x32xf32>
    %cst_119 = arith.constant dense<0.000000e+00> : vector<8xf32>
    %190 = vector.multi_reduction <add>, %185, %cst_119 [1] : vector<8x32xf32> to vector<8xf32>
    %191 = vector.shape_cast %190 : vector<8xf32> to vector<8x1xf32>
    %cst_120 = arith.constant 3.200000e+01 : f32
    %192 = vector.broadcast %cst_120 : f32 to vector<8x1xf32>
    %193 = arith.divf %191, %192 : vector<8x1xf32>
    %194 = vector.broadcast %193 : vector<8x1xf32> to vector<8x32xf32>
    %195 = arith.subf %185, %194 : vector<8x32xf32>
    %196 = arith.mulf %195, %195 : vector<8x32xf32>
    %cst_121 = arith.constant dense<0.000000e+00> : vector<8xf32>
    %197 = vector.multi_reduction <add>, %196, %cst_121 [1] : vector<8x32xf32> to vector<8xf32>
    %198 = vector.shape_cast %197 : vector<8xf32> to vector<8x1xf32>
    %cst_122 = arith.constant 3.200000e+01 : f32
    %199 = vector.broadcast %cst_122 : f32 to vector<8x1xf32>
    %200 = arith.divf %198, %199 : vector<8x1xf32>
    %cst_123 = arith.constant 9.99999974E-6 : f32
    %201 = vector.broadcast %cst_123 : f32 to vector<8x1xf32>
    %202 = arith.addf %200, %201 : vector<8x1xf32>
    %203 = math.rsqrt %202 : vector<8x1xf32>
    %204 = vector.broadcast %203 : vector<8x1xf32> to vector<8x32xf32>
    %205 = arith.mulf %195, %204 : vector<8x32xf32>
    %206 = vector.broadcast %187 : vector<1x32xf32> to vector<8x32xf32>
    %207 = arith.mulf %205, %206 : vector<8x32xf32>
    %208 = vector.broadcast %189 : vector<1x32xf32> to vector<8x32xf32>
    %209 = arith.addf %207, %208 : vector<8x32xf32>
    %c0_124 = arith.constant 0 : index
    %c0_125 = arith.constant 0 : index
    %c0_126 = arith.constant 0 : index
    %210 = vector.load %arg26[%c0_124, %c0_125, %c0_126] : memref<1x8x32xf32, #tpu.memory_space<vmem>>, vector<1x8x32xf32>
    %211 = vector.shape_cast %210 : vector<1x8x32xf32> to vector<8x32xf32>
    %212 = vector.shape_cast %209 : vector<8x32xf32> to vector<1x8x32xf32>
    tpu.vector_store %arg26[%c0_124, %c0_125, %c0_126], %212 {strides = array<i32>} : memref<1x8x32xf32, #tpu.memory_space<vmem>>, vector<1x8x32xf32>,
    return
  }
  func.func @transform_0(%arg0: i32, %arg1: i32) -> (i32, i32, i32) {
    %c0_i32 = arith.constant 0 : i32
    %c0_i32_0 = arith.constant 0 : i32
    %c0_i32_1 = arith.constant 0 : i32
    return %arg0, %c0_i32, %c0_i32_0 : i32, i32, i32
  }
  func.func @transform_1(%arg0: i32, %arg1: i32) -> (i32, i32, i32) {
    %c0_i32 = arith.constant 0 : i32
    %c0_i32_0 = arith.constant 0 : i32
    %c0_i32_1 = arith.constant 0 : i32
    return %arg0, %c0_i32, %c0_i32_0 : i32, i32, i32
  }
  func.func @transform_2(%arg0: i32, %arg1: i32) -> (i32, i32, i32) {
    %c0_i32 = arith.constant 0 : i32
    %c0_i32_0 = arith.constant 0 : i32
    %c0_i32_1 = arith.constant 0 : i32
    return %arg0, %c0_i32, %c0_i32_0 : i32, i32, i32
  }
  func.func @transform_3(%arg0: i32, %arg1: i32) -> (i32, i32, i32) {
    %c0_i32 = arith.constant 0 : i32
    %c0_i32_0 = arith.constant 0 : i32
    %c0_i32_1 = arith.constant 0 : i32
    return %arg0, %c0_i32, %c0_i32_0 : i32, i32, i32
  }
  func.func @transform_4(%arg0: i32, %arg1: i32) -> (i32, i32, i32, i32) {
    %c0_i32 = arith.constant 0 : i32
    %c0_i32_0 = arith.constant 0 : i32
    %c0_i32_1 = arith.constant 0 : i32
    %c0_i32_2 = arith.constant 0 : i32
    return %arg1, %c0_i32, %c0_i32_0, %c0_i32_1 : i32, i32, i32, i32
  }
  func.func @transform_5(%arg0: i32, %arg1: i32) -> (i32, i32, i32, i32) {
    %c0_i32 = arith.constant 0 : i32
    %c0_i32_0 = arith.constant 0 : i32
    %c0_i32_1 = arith.constant 0 : i32
    %c0_i32_2 = arith.constant 0 : i32
    return %arg1, %c0_i32, %c0_i32_0, %c0_i32_1 : i32, i32, i32, i32
  }
  func.func @transform_6(%arg0: i32, %arg1: i32) -> (i32, i32, i32, i32) {
    %c0_i32 = arith.constant 0 : i32
    %c0_i32_0 = arith.constant 0 : i32
    %c0_i32_1 = arith.constant 0 : i32
    %c0_i32_2 = arith.constant 0 : i32
    return %arg1, %c0_i32, %c0_i32_0, %c0_i32_1 : i32, i32, i32, i32
  }
  func.func @transform_7(%arg0: i32, %arg1: i32) -> (i32, i32, i32) {
    %c0_i32 = arith.constant 0 : i32
    %c0_i32_0 = arith.constant 0 : i32
    %c0_i32_1 = arith.constant 0 : i32
    return %arg1, %c0_i32, %c0_i32_0 : i32, i32, i32
  }
  func.func @transform_8(%arg0: i32, %arg1: i32) -> (i32, i32, i32) {
    %c0_i32 = arith.constant 0 : i32
    %c0_i32_0 = arith.constant 0 : i32
    %c0_i32_1 = arith.constant 0 : i32
    return %arg1, %c0_i32, %c0_i32_0 : i32, i32, i32
  }
  func.func @transform_9(%arg0: i32, %arg1: i32) -> (i32, i32, i32) {
    %c0_i32 = arith.constant 0 : i32
    %c0_i32_0 = arith.constant 0 : i32
    %c0_i32_1 = arith.constant 0 : i32
    return %arg1, %c0_i32, %c0_i32_0 : i32, i32, i32
  }
  func.func @transform_10(%arg0: i32, %arg1: i32) -> (i32, i32, i32, i32) {
    %c0_i32 = arith.constant 0 : i32
    %c0_i32_0 = arith.constant 0 : i32
    %c0_i32_1 = arith.constant 0 : i32
    %c0_i32_2 = arith.constant 0 : i32
    return %arg1, %c0_i32, %c0_i32_0, %c0_i32_1 : i32, i32, i32, i32
  }
  func.func @transform_11(%arg0: i32, %arg1: i32) -> (i32, i32, i32, i32) {
    %c0_i32 = arith.constant 0 : i32
    %c0_i32_0 = arith.constant 0 : i32
    %c0_i32_1 = arith.constant 0 : i32
    %c0_i32_2 = arith.constant 0 : i32
    return %arg1, %c0_i32, %c0_i32_0, %c0_i32_1 : i32, i32, i32, i32
  }
  func.func @transform_12(%arg0: i32, %arg1: i32) -> (i32, i32, i32, i32) {
    %c0_i32 = arith.constant 0 : i32
    %c0_i32_0 = arith.constant 0 : i32
    %c0_i32_1 = arith.constant 0 : i32
    %c0_i32_2 = arith.constant 0 : i32
    return %arg1, %c0_i32, %c0_i32_0, %c0_i32_1 : i32, i32, i32, i32
  }
  func.func @transform_13(%arg0: i32, %arg1: i32) -> (i32, i32, i32, i32) {
    %c0_i32 = arith.constant 0 : i32
    %c0_i32_0 = arith.constant 0 : i32
    %c0_i32_1 = arith.constant 0 : i32
    %c0_i32_2 = arith.constant 0 : i32
    return %arg1, %c0_i32, %c0_i32_0, %c0_i32_1 : i32, i32, i32, i32
  }
  func.func @transform_14(%arg0: i32, %arg1: i32) -> (i32, i32, i32, i32) {
    %c0_i32 = arith.constant 0 : i32
    %c0_i32_0 = arith.constant 0 : i32
    %c0_i32_1 = arith.constant 0 : i32
    %c0_i32_2 = arith.constant 0 : i32
    return %arg1, %c0_i32, %c0_i32_0, %c0_i32_1 : i32, i32, i32, i32
  }
  func.func @transform_15(%arg0: i32, %arg1: i32) -> (i32, i32, i32) {
    %c0_i32 = arith.constant 0 : i32
    %c0_i32_0 = arith.constant 0 : i32
    %c0_i32_1 = arith.constant 0 : i32
    return %arg1, %c0_i32, %c0_i32_0 : i32, i32, i32
  }
  func.func @transform_16(%arg0: i32, %arg1: i32) -> (i32, i32, i32) {
    %c0_i32 = arith.constant 0 : i32
    %c0_i32_0 = arith.constant 0 : i32
    %c0_i32_1 = arith.constant 0 : i32
    return %arg1, %c0_i32, %c0_i32_0 : i32, i32, i32
  }
  func.func @transform_17(%arg0: i32, %arg1: i32) -> (i32, i32, i32) {
    %c0_i32 = arith.constant 0 : i32
    %c0_i32_0 = arith.constant 0 : i32
    %c0_i32_1 = arith.constant 0 : i32
    return %arg1, %c0_i32, %c0_i32_0 : i32, i32, i32
  }
  func.func @transform_18(%arg0: i32, %arg1: i32) -> (i32, i32, i32) {
    %c0_i32 = arith.constant 0 : i32
    %c0_i32_0 = arith.constant 0 : i32
    %c0_i32_1 = arith.constant 0 : i32
    return %arg1, %c0_i32, %c0_i32_0 : i32, i32, i32
  }
  func.func @transform_19(%arg0: i32, %arg1: i32) -> (i32, i32, i32) {
    %c0_i32 = arith.constant 0 : i32
    %c0_i32_0 = arith.constant 0 : i32
    %c0_i32_1 = arith.constant 0 : i32
    return %arg1, %c0_i32, %c0_i32_0 : i32, i32, i32
  }
  func.func @transform_20(%arg0: i32, %arg1: i32) -> (i32, i32, i32) {
    %c0_i32 = arith.constant 0 : i32
    %c0_i32_0 = arith.constant 0 : i32
    %c0_i32_1 = arith.constant 0 : i32
    return %arg1, %c0_i32, %c0_i32_0 : i32, i32, i32
  }
  func.func @transform_21(%arg0: i32, %arg1: i32) -> (i32, i32, i32) {
    %c0_i32 = arith.constant 0 : i32
    %c0_i32_0 = arith.constant 0 : i32
    %c0_i32_1 = arith.constant 0 : i32
    return %arg1, %c0_i32, %c0_i32_0 : i32, i32, i32
  }
  func.func @transform_22(%arg0: i32, %arg1: i32) -> (i32, i32, i32) {
    %c0_i32 = arith.constant 0 : i32
    %c0_i32_0 = arith.constant 0 : i32
    %c0_i32_1 = arith.constant 0 : i32
    return %arg1, %c0_i32, %c0_i32_0 : i32, i32, i32
  }
  func.func @transform_23(%arg0: i32, %arg1: i32) -> (i32, i32, i32) {
    %c0_i32 = arith.constant 0 : i32
    %c0_i32_0 = arith.constant 0 : i32
    %c0_i32_1 = arith.constant 0 : i32
    return %arg1, %c0_i32, %c0_i32_0 : i32, i32, i32
  }
  func.func @transform_24(%arg0: i32, %arg1: i32) -> (i32, i32, i32) {
    %c0_i32 = arith.constant 0 : i32
    %c0_i32_0 = arith.constant 0 : i32
    %c0_i32_1 = arith.constant 0 : i32
    return %arg0, %c0_i32, %c0_i32_0 : i32, i32, i32
  }
  func.func @transform_25(%arg0: i32, %arg1: i32) -> (i32, i32, i32, i32) {
    %c2_i32 = arith.constant 2 : i32
    %0 = arith.muli %arg0, %c2_i32 : i32
    %1 = arith.addi %0, %arg1 : i32
    %c0_i32 = arith.constant 0 : i32
    %c0_i32_0 = arith.constant 0 : i32
    %c0_i32_1 = arith.constant 0 : i32
    %c0_i32_2 = arith.constant 0 : i32
    return %1, %c0_i32, %c0_i32_0, %c0_i32_1 : i32, i32, i32, i32
  }
  func.func @transform_26(%arg0: i32, %arg1: i32) -> (i32, i32, i32, i32) {
    %c2_i32 = arith.constant 2 : i32
    %0 = arith.muli %arg0, %c2_i32 : i32
    %1 = arith.addi %0, %arg1 : i32
    %c0_i32 = arith.constant 0 : i32
    %c0_i32_0 = arith.constant 0 : i32
    %c0_i32_1 = arith.constant 0 : i32
    %c0_i32_2 = arith.constant 0 : i32
    return %1, %c0_i32, %c0_i32_0, %c0_i32_1 : i32, i32, i32, i32
  }
}

</mosaic_0001>

<bundles_post_ra>
// kernel: transformer_forward.5
= control target key start
LH: loop header
LB: loop body
LE: loop exit
PB: predicated region body
PF: predicated region fallthrough
CT: control target
= control target key end

     0   :  { %s356_s12 = smov 0   ;;  %s382_s0 = inlined_call_operand.vmem [shape: f32[16,32], index: 0, kind: input, shape index: {}]   ;;  %s383_s1 = inlined_call_operand.vmem [shape: bf16[32,128], index: 1, kind: input, shape index: {}]   ;;  %s384_s2 = inlined_call_operand.vmem [shape: f32[1,128], index: 2, kind: input, shape index: {}]   ;;  %s385_s3 = inlined_call_operand.vmem [shape: f32[16,128], index: 3, kind: output, shape index: {}]  }
   0x1 LB: > { %s290_s13 = sadd.s32 4294967295, %s332_s12   ;;  %p294_p0 = scmp.ge.s32.totalorder %s332_s12, 1  ;;  %s332_s12 = sphi %s356_s12, %s13_s12  }
   0x2   : > { %p136_p1 = scmp.lt.s32.totalorder %s332_s12, 3 }
   0x4   : > { %p137_p2 = pnand %p294_p0, %p136_p1 }
   0x5   : > { %v324_v0 = vld [vmem:[%s383_s1] sm:$0xff] (!%p137_p2)   ;;  %v334_v1 = vmov (!%p137_p2), 0.0   ;;  %v325_v2 = vld [vmem:[%s383_s1 + $0x8] sm:$0xff] (!%p137_p2)   ;;  %vm335_vm0 = vmmov (!%p137_p2), 0   ;;  %p158_p3 = scmp.lt.s32.totalorder (!%p137_p2), %s290_s13, 1  ;;  %vm192_vm1 = vcmask (!%p137_p2), 261120  }
   0x6   : > { %140 = sbr.rel (%p137_p2) target bundleno = 234 (0xea), region = 32  ;;  %306 = vmatprep.subr.bf16.mxu0 (!%p137_p2), %v334_v1  ;;  %310 = vmatprep.mubr.msk.bf16.mxu0 (!%p137_p2), %vm335_vm0, %v334_v1  ;;  %v297_v5 = vld [vmem:[%s384_s2] ss:$0 sm:$0xff] (!%p137_p2) }
   0x7   : > { %307 = vmatpush3.bf16.msra.mxu0 (!%p137_p2), %v324_v0 }
   0x8   : > { %308 = vmatprep.subr.bf16.mxu0 (!%p137_p2), %v334_v1 }
   0xb   : > { %309 = vmatpush3.bf16.msra.mxu0 (!%p137_p2), %v325_v2 }
   0xd   : > { %s387_s13 = smov (!%p158_p3, %s290_s13), 1 }
   0xe   : > { %s295_s18 = sshll.u32 %s387_s13, 3 }
   0xf   : > { %s161_s21 = scalar_lea.vmem %s382_s0, %s295_s18  ;;  %s165_s26 = scalar_lea.vmem %s385_s3, %s295_s18 }
  0x10   : > { %v167_v3 = vld [vmem:[%s161_s21] sm:$0xff] }
  0x11   : > { %v168_v4 = vpack.c.bf16 %v167_v3, %v167_v3 }
  0x13   : > { %311 = vmatmul.mubr.msk.bf16.vlgmr.msra.gmra.mrb[0].mxu0 %vm192_vm1, %v168_v4 }
  0xe6   : > { %v230_v6 = vpop.f32.mrb[0].mxu0 }
  0xe7   : > { %v231_v7 = vadd.f32 %v297_v5, %v230_v6  ;;  %v312_v8 = vpop.f32.mrb[1].mxu0 }
  0xe8   : > { %v233_v9 = vpop.f32.mrb[2].mxu0 }
  0xe9   : > { %236 = vst [vmem:[%s165_s26] sm:$0xff] %v231_v7  ;;  %v313_v10 = vpop.f32.mrb[3].mxu0 }
  0xea PF: > { %s13_s12 = sadd.s32 1, %s332_s12  }
  0xeb   : > { %p10_p4 = scmp.ge.s32.totalorder %s13_s12, 4  }
  0xed   :  { %12 = sbr.rel (!%p10_p4) target bundleno = 1 (0x1), region = 62 }

// kernel: transformer_forward.3
= control target key start
LH: loop header
LB: loop body
LE: loop exit
PB: predicated region body
PF: predicated region fallthrough
CT: control target
= control target key end

     0   :  { %s3079_s29 = smov 0   ;;  %s3081_s30 = smov 0   ;;  %s3465_s0 = inlined_call_operand.vmem [shape: f32[2,8,32], index: 0, kind: input, shape index: {}]   ;;  %s3466_s1 = inlined_call_operand.vmem [shape: f32[2,1,8], index: 1, kind: input, shape index: {}]   ;;  %s3467_s2 = inlined_call_operand.vmem [shape: bf16[2,12,32,8], index: 2, kind: input, shape index: {}]   ;;  %s3468_s3 = inlined_call_operand.vmem [shape: f32[2,12,1,8], index: 3, kind: input, shape index: {}]   ;;  %s3469_s4 = inlined_call_operand.vmem [shape: bf16[2,4,8,32], index: 4, kind: input, shape index: {}]   ;;  %s3470_s5 = inlined_call_operand.vmem [shape: f32[2,1,32], index: 5, kind: input, shape index: {}]   ;;  %s3471_s6 = inlined_call_operand.vmem [shape: f32[2,1,32], index: 6, kind: input, shape index: {}]   ;;  %s3472_s7 = inlined_call_operand.vmem [shape: f32[2,1,32], index: 7, kind: input, shape index: {}]   ;;  %s3473_s8 = inlined_call_operand.vmem [shape: bf16[2,32,64], index: 8, kind: input, shape index: {}]   ;;  %s3474_s9 = inlined_call_operand.vmem [shape: f32[2,1,64], index: 9, kind: input, shape index: {}]   ;;  %s3475_s10 = inlined_call_operand.vmem [shape: bf16[2,64,32], index: 10, kind: input, shape index: {}]   ;;  %s3476_s11 = inlined_call_operand.vmem [shape: f32[2,1,32], index: 11, kind: input, shape index: {}]   ;;  %s3477_s12 = inlined_call_operand.vmem [shape: f32[2,1,32], index: 12, kind: input, shape index: {}]   ;;  %s3478_s13 = inlined_call_operand.vmem [shape: f32[2,1,32], index: 13, kind: input, shape index: {}]   ;;  %s3479_s14 = inlined_call_operand.vmem [shape: f32[2,8,32], index: 14, kind: output, shape index: {}]  }
   0x1   :  { %3485 = sst [smem:[#allocation9_spill]] %s3465_s0  ;;  %s3083_s15 = smov 0  }
   0x2   :  { %3486 = sst [smem:[#allocation10_spill]] %s3466_s1  ;;  %s3085_s16 = smov 0  }
   0x3   :  { %3487 = sst [smem:[#allocation11_spill]] %s3467_s2  ;;  %s3087_s17 = smov 0  }
   0x4   :  { %3488 = sst [smem:[#allocation12_spill]] %s3468_s3 }
   0x5   :  { %3489 = sst [smem:[#allocation13_spill]] %s3469_s4 }
   0x6   :  { %3490 = sst [smem:[#allocation14_spill]] %s3473_s8 }
   0x7   :  { %3491 = sst [smem:[#allocation15_spill]] %s3474_s9 }
   0x8   :  { %3492 = sst [smem:[#allocation16_spill]] %s3478_s13 }
   0x9   :  { %3493 = sst [smem:[#allocation17_spill]] %s3479_s14 }
   0xa LB: > { %3494 = sst [smem:[#allocation2_spill]] %s2984_s29  ;;  %s33_s18 = sadd.s32 1, %s2992_s15  ;;  %s3000_s17 = sphi %s3087_s17, %s24_s17   ;;  %s2996_s16 = sphi %s3085_s16, %s3524_s16   ;;  %s2992_s15 = sphi %s3083_s15, %s3523_s15   ;;  %s2988_s30 = sphi %s3081_s30, %s3522_s30   ;;  %s2984_s29 = sphi %s3079_s29, %s3521_s29  }
   0xb   : > { %3495 = sst [smem:[#allocation3_spill]] %s2992_s15  ;;  %s36_s19 = sadd.s32 1, %s2996_s16 }
   0xc   : > { %3496 = sst [smem:[#allocation4_spill]] %s2996_s16  ;;  %p34_p0 = scmp.ge.s32.totalorder %s33_s18, 2 }
   0xd   : > { %3497 = sst [smem:[#allocation5_spill]] %s3000_s17  ;;  %p2521_p1 = scmp.ge.s32.totalorder %s3000_s17, 1 }
   0xe   : > { %p536_p2 = scmp.lt.s32.totalorder %s3000_s17, 5  ;;  %s3526_s18 = smov (%p34_p0, %s33_s18), 0 }
   0xf   : > { %3498 = sst [smem:[#allocation6_spill]] %s3526_s18  ;;  %s3528_s19 = smov (!%p34_p0, %s36_s19), %s2996_s16 }
  0x10   : > { %p537_p3 = pnand %p2521_p1, %p536_p2  ;;  %p38_p4 = scmp.ge.s32.totalorder %s3528_s19, 2 }
  0x12   : > { %s3530_s19 = smov (%p38_p4, %s3528_s19), 0  ;;  %540 = sbr.rel (%p537_p3) target bundleno = 2341 (0x925), region = 76 }
  0x13   : > { %3499 = sst [smem:[#allocation7_spill]] %s3530_s19 }
  0x19   : > { %p628_p5 = scmp.lt.s32.totalorder %s2988_s30, 1  ;;  %p635_p6 = scmp.lt.s32.totalorder %s2984_s29, 1 }
  0x1a   : > { %s3502_s0 = sld [smem:[#allocation9_spill]]  ;;  %s3503_s2 = sld [smem:[#allocation11_spill]] }
  0x1b   : > { %s3532_s30 = smov (!%p628_p5, %s2988_s30), 1  ;;  %s3504_s4 = sld [smem:[#allocation13_spill]] }
  0x1c   : > { %3500 = sst [smem:[#allocation8_spill]] %s3532_s30  ;;  %s2522_s21 = sshll.u32 %s3532_s30, 3 }
  0x1d   : > { %s3115_s20 = scalar_select %p635_p6, %s2984_s29, 1 }
  0x1e   : > { %s3505_s3 = sld [smem:[#allocation12_spill]]  ;;  %s3506_s8 = sld [smem:[#allocation14_spill]] }
  0x1f   : > { %s2868_s28 = smul.u32 192, %s3115_s20  ;;  %s2609_s18 = sshll.u32 %s3115_s20, 4 }
  0x20   : > { %s631_s27 = scalar_lea.vmem %s3502_s0, %s2522_s21  ;;  %s2869_s19 = smul.u32 12, %s3115_s20 }
  0x21   : > { %s3131_s17 = scalar_lea.vmem %s3503_s2, %s2868_s28  ;;  %s3136_s13 = scalar_lea.vmem %s3504_s4, %s2609_s18 }
  0x22   : > { %s673_s0 = scalar_lea.vmem %s3476_s11, %s3115_s20  ;;  %s676_s14 = scalar_lea.vmem %s3477_s12, %s3115_s20 }
  0x23   : > { %s3508_s2 = sld [smem:[#allocation16_spill]]  ;;  %s3509_s23 = sld [smem:[#allocation17_spill]] }
  0x24   : > { %s3141_s25 = scalar_lea.vmem %s3505_s3, %s2869_s19  ;;  %s3158_s4 = scalar_lea.vmem %s3506_s8, %s2609_s18 }
  0x25   : > { %s2611_s3 = sshll.u32 %s3115_s20, 5  ;;  %s3510_s24 = sld [smem:[#allocation2_spill]] }
  0x26   : > { %s3172_s15 = scalar_lea.vmem %s3475_s10, %s2611_s3 }
  0x29   : > { %s679_s8 = scalar_lea.vmem %s3508_s2, %s3115_s20  ;;  %s3185_s9 = scalar_lea.vmem %s3509_s23, %s2522_s21 }
  0x2b   : > { %p2531_p7 = scmp.ne.s32.totalorder %s3510_s24, 0 }
  0x2c   : > { %v689_v0 = vld [vmem:[%s631_s27] sm:$0xff] (!%p2531_p7)  ;;  %vm690_vm0 = vcmask (!%p2531_p7), 261120  }
  0x2d   : > { %688 = sbr.rel (%p2531_p7) target bundleno = 52 (0x34), region = 80  ;;  %691 = vst.msk [vmem:[%s3185_s9] sm:$0xff] (!%p2531_p7), %vm690_vm0, %v689_v0 }
  0x34 PF: > { %v2912_v1 = vld [vmem:[%s3131_s17] sm:$0xff]   ;;  %v3002_v2 = vmov 0.0   ;;  %v2913_v3 = vld [vmem:[%s3131_s17 + $0x10] sm:$0xff]   ;;  %v2914_v4 = vld [vmem:[%s3131_s17 + $0x8] sm:$0xff]   ;;  %vm3003_vm1 = vmmov 0   ;;  %vm840_vm2 = vcmask 261120   ;;  %s3514_s23 = scalar_lea.vmem %s3470_s5, %s3115_s20  ;;  %s3515_s1 = scalar_lea.vmem %s3471_s6, %s3115_s20 }
  0x35   : > { %2680 = vmatprep.subr.bf16.mxu0 %v3002_v2  ;;  %2688 = vmatprep.subr.bf16.mxu1 %v3002_v2  ;;  %v2915_v5 = vld [vmem:[%s3131_s17 + $0x18] sm:$0xff]   ;;  %v3202_v6 = vld [vmem:[%s3185_s9] sm:$0xff]  ;;  %v2917_v9 = vld [vmem:[%s3131_s17 + $0x30] sm:$0xff]   ;;  %vm1468_vm3 = vcmask 64512   ;;  %vm1718_vm4 = vcmask 1043456   ;;  %s3511_s2 = sld [smem:[#allocation8_spill]]  ;;  %s3516_s28 = scalar_lea.vmem %s3472_s7, %s3115_s20 }
  0x36   : > { %2681 = vmatpush3.bf16.msra.mxu0 %v2912_v1  ;;  %2684 = vmatprep.mubr.msk.bf16.mxu0 %vm3003_vm1, %v3002_v2  ;;  %v3206_v7 = vpack.c.bf16 %v3202_v6, %v3202_v6  ;;  %v2916_v8 = vld [vmem:[%s3131_s17 + $0x20] sm:$0xff]   ;;  %v2918_v10 = vld [vmem:[%s3131_s17 + $0x28] sm:$0xff]   ;;  %v2919_v11 = vld [vmem:[%s3131_s17 + $0x38] sm:$0xff]   ;;  %s3512_s21 = sld [smem:[#allocation10_spill]]  ;;  %s3517_s22 = sld [smem:[#allocation15_spill]]  ;;  %vm2246_vm5 = vcmask 523264  }
  0x37   : > { %2689 = vmatpush3.bf16.msra.mxu1 %v2913_v3  ;;  %2682 = vmatprep.subr.bf16.mxu0 %v3002_v2  ;;  %v2920_v12 = vld [vmem:[%s3131_s17 + $0x40] sm:$0xff]   ;;  %v2921_v13 = vld [vmem:[%s3131_s17 + $0x50] sm:$0xff]   ;;  %v2922_v14 = vld [vmem:[%s3131_s17 + $0x48] sm:$0xff]  }
  0x38   : > { %2690 = vmatprep.subr.bf16.mxu1 %v3002_v2  ;;  %2692 = vmatprep.mubr.msk.bf16.mxu1 %vm3003_vm1, %v3002_v2  ;;  %v2923_v15 = vld [vmem:[%s3131_s17 + $0x58] sm:$0xff]   ;;  %v2924_v16 = vld [vmem:[%s3131_s17 + $0x60] sm:$0xff]   ;;  %v2925_v17 = vld [vmem:[%s3131_s17 + $0x70] sm:$0xff]  }
  0x39   : > { %v2926_v18 = vld [vmem:[%s3131_s17 + $0x68] sm:$0xff]   ;;  %v2927_v19 = vld [vmem:[%s3131_s17 + $0x78] sm:$0xff]   ;;  %v2928_v20 = vld [vmem:[%s3131_s17 + $0x80] sm:$0xff]  }
  0x3a   : > { %2683 = vmatpush3.bf16.msra.mxu0 %v2914_v4  ;;  %v2929_v21 = vld [vmem:[%s3131_s17 + $0x90] sm:$0xff]   ;;  %v2930_v22 = vld [vmem:[%s3131_s17 + $0x88] sm:$0xff]   ;;  %v2931_v23 = vld [vmem:[%s3131_s17 + $0x98] sm:$0xff]  }
  0x3b   : > { %2691 = vmatpush3.bf16.msra.mxu1 %v2915_v5  ;;  %2696 = vmatprep.subr.bf16.mxu0 %v3002_v2  ;;  %v2932_v24 = vld [vmem:[%s3131_s17 + $0xa0] sm:$0xff]   ;;  %v2933_v25 = vld [vmem:[%s3131_s17 + $0xb0] sm:$0xff]   ;;  %v2934_v26 = vld [vmem:[%s3131_s17 + $0xa8] sm:$0xff]  }
  0x3c   : > { %2704 = vmatprep.subr.bf16.mxu1 %v3002_v2  ;;  %v2935_v27 = vld [vmem:[%s3131_s17 + $0xb8] sm:$0xff]   ;;  %v2536_v44 = vld [vmem:[%s3141_s25 + $0x4] ss:$0 sm:$0xff]  ;;  %v2537_v45 = vld [vmem:[%s3141_s25 + $0x5] ss:$0 sm:$0xff]  ;;  %s3513_s27 = scalar_lea.vmem %s3512_s21, %s3511_s2  ;;  %s3518_s19 = scalar_lea.vmem %s3517_s22, %s3115_s20 }
  0x3d   : > { %2685 = vmatmul.mubr.msk.bf16.vlgmr.msra.gmra.mrb[0].mxu0 %vm840_vm2, %v3206_v7  ;;  %v2532_v56 = vld [vmem:[%s3141_s25] ss:$0 sm:$0xff]  ;;  %v2533_v59 = vld [vmem:[%s3141_s25 + $0x1] ss:$0 sm:$0xff]  ;;  %v2538_v62 = vld [vmem:[%s3141_s25 + $0x6] ss:$0 sm:$0xff] }
  0x3e   : > { %2693 = vmatmul.mubr.msk.bf16.vlgmr.msra.gmra.mrb[0].mxu1 %vm840_vm2, %v3206_v7  ;;  %2697 = vmatpush3.bf16.msra.mxu0 %v2916_v8  ;;  %v2539_v0 = vld [vmem:[%s3141_s25 + $0x7] ss:$0 sm:$0xff] }
  0x3f   : > { %2705 = vmatpush3.bf16.msra.mxu1 %v2917_v9  ;;  %2698 = vmatprep.subr.bf16.mxu0 %v3002_v2 }
  0x40   : > { %2706 = vmatprep.subr.bf16.mxu1 %v3002_v2  ;;  %2700 = vmatprep.mubr.msk.bf16.mxu0 %vm3003_vm1, %v3002_v2 }
  0x41   : > { %2708 = vmatprep.mubr.msk.bf16.mxu1 %vm3003_vm1, %v3002_v2 }
  0x42   : > { %2699 = vmatpush3.bf16.msra.mxu0 %v2918_v10 }
  0x43   : > { %2707 = vmatpush3.bf16.msra.mxu1 %v2919_v11  ;;  %2712 = vmatprep.subr.bf16.mxu0 %v3002_v2 }
  0x44   : > { %2720 = vmatprep.subr.bf16.mxu1 %v3002_v2 }
  0x45   : > { %2701 = vmatmul.mubr.msk.bf16.vlgmr.msra.gmra.mrb[4].mxu0 %vm840_vm2, %v3206_v7 }
  0x46   : > { %2709 = vmatmul.mubr.msk.bf16.vlgmr.msra.gmra.mrb[4].mxu1 %vm840_vm2, %v3206_v7  ;;  %2713 = vmatpush3.bf16.msra.mxu0 %v2920_v12 }
  0x47   : > { %2721 = vmatpush3.bf16.msra.mxu1 %v2921_v13  ;;  %2714 = vmatprep.subr.bf16.mxu0 %v3002_v2 }
  0x48   : > { %2722 = vmatprep.subr.bf16.mxu1 %v3002_v2  ;;  %2716 = vmatprep.mubr.msk.bf16.mxu0 %vm3003_vm1, %v3002_v2 }
  0x49   : > { %2724 = vmatprep.mubr.msk.bf16.mxu1 %vm3003_vm1, %v3002_v2 }
  0x4a   : > { %2715 = vmatpush3.bf16.msra.mxu0 %v2922_v14 }
  0x4b   : > { %2723 = vmatpush3.bf16.msra.mxu1 %v2923_v15  ;;  %2728 = vmatprep.subr.bf16.mxu0 %v3002_v2 }
  0x4c   : > { %2736 = vmatprep.subr.bf16.mxu1 %v3002_v2 }
  0x4d   : > { %2717 = vmatmul.mubr.msk.bf16.vlgmr.msra.gmra.mrb[8].mxu0 %vm840_vm2, %v3206_v7 }
  0x4e   : > { %2725 = vmatmul.mubr.msk.bf16.vlgmr.msra.gmra.mrb[8].mxu1 %vm840_vm2, %v3206_v7  ;;  %2729 = vmatpush3.bf16.msra.mxu0 %v2924_v16  ;;  %v2534_v16 = vld [vmem:[%s3141_s25 + $0x2] ss:$0 sm:$0xff] }
  0x4f   : > { %2737 = vmatpush3.bf16.msra.mxu1 %v2925_v17  ;;  %2730 = vmatprep.subr.bf16.mxu0 %v3002_v2 }
  0x50   : > { %2738 = vmatprep.subr.bf16.mxu1 %v3002_v2  ;;  %2732 = vmatprep.mubr.msk.bf16.mxu0 %vm3003_vm1, %v3002_v2 }
  0x51   : > { %2740 = vmatprep.mubr.msk.bf16.mxu1 %vm3003_vm1, %v3002_v2 }
  0x52   : > { %2731 = vmatpush3.bf16.msra.mxu0 %v2926_v18 }
  0x53   : > { %2739 = vmatpush3.bf16.msra.mxu1 %v2927_v19  ;;  %2744 = vmatprep.subr.bf16.mxu0 %v3002_v2  ;;  %v2535_v19 = vld [vmem:[%s3141_s25 + $0x3] ss:$0 sm:$0xff] }
  0x54   : > { %2752 = vmatprep.subr.bf16.mxu1 %v3002_v2 }
  0x55   : > { %2733 = vmatmul.mubr.msk.bf16.vlgmr.msra.gmra.mrb[12].mxu0 %vm840_vm2, %v3206_v7 }
  0x56   : > { %2741 = vmatmul.mubr.msk.bf16.vlgmr.msra.gmra.mrb[12].mxu1 %vm840_vm2, %v3206_v7  ;;  %2745 = vmatpush3.bf16.msra.mxu0 %v2928_v20 }
  0x57   : > { %2746 = vmatprep.subr.bf16.mxu0 %v3002_v2  ;;  %2748 = vmatprep.mubr.msk.bf16.mxu0 %vm3003_vm1, %v3002_v2 }
  0x58   : > { %2756 = vmatprep.mubr.msk.bf16.mxu1 %vm3003_vm1, %v3002_v2  ;;  %2753 = vmatpush3.bf16.msra.mxu1 %v2929_v21 }
  0x59   : > { %2754 = vmatprep.subr.bf16.mxu1 %v3002_v2 }
  0x5a   : > { %2747 = vmatpush3.bf16.msra.mxu0 %v2930_v22 }
  0x5b   : > { %2760 = vmatprep.subr.bf16.mxu0 %v3002_v2 }
  0x5c   : > { %2755 = vmatpush3.bf16.msra.mxu1 %v2931_v23 }
  0x5d   : > { %2749 = vmatmul.mubr.msk.bf16.vlgmr.msra.gmra.mrb[16].mxu0 %vm840_vm2, %v3206_v7  ;;  %2768 = vmatprep.subr.bf16.mxu1 %v3002_v2 }
  0x5e   : > { %2764 = vmatprep.mubr.msk.bf16.mxu0 %vm3003_vm1, %v3002_v2  ;;  %2761 = vmatpush3.bf16.msra.mxu0 %v2932_v24 }
  0x5f   : > { %2757 = vmatmul.mubr.msk.bf16.vlgmr.msra.gmra.mrb[16].mxu1 %vm840_vm2, %v3206_v7  ;;  %2762 = vmatprep.subr.bf16.mxu0 %v3002_v2 }
  0x60   : > { %2769 = vmatpush3.bf16.msra.mxu1 %v2933_v25  ;;  %2772 = vmatprep.mubr.msk.bf16.mxu1 %vm3003_vm1, %v3002_v2 }
  0x61   : > { %2770 = vmatprep.subr.bf16.mxu1 %v3002_v2 }
  0x62   : > { %2763 = vmatpush3.bf16.msra.mxu0 %v2934_v26  ;;  %v2540_v26 = vld [vmem:[%s3141_s25 + $0x8] ss:$0 sm:$0xff] }
  0x63   : > { %2776 = vmatprep.subr.bf16.mxu0 %v3002_v2 }
  0x64   : > { %2771 = vmatpush3.bf16.msra.mxu1 %v2935_v27 }
  0x65   : > { %2782 = vmatprep.subr.bf16.mxu1 %v3002_v2  ;;  %2765 = vmatmul.mubr.msk.bf16.vlgmr.msra.gmra.mrb[20].mxu0 %vm840_vm2, %v3206_v7 }
  0x66   : > { %2778 = vmatprep.mubr.msk.bf16.mxu0 %vm3003_vm1, %v3002_v2 }
  0x67   : > { %2773 = vmatmul.mubr.msk.bf16.vlgmr.msra.gmra.mrb[20].mxu1 %vm840_vm2, %v3206_v7 }
  0x68   : > { %2784 = vmatprep.mubr.msk.bf16.mxu1 %vm3003_vm1, %v3002_v2 }
 0x110   : > { %v878_v28 = vpop.f32.mrb[0].mxu0 }
 0x111   : > { %v2686_v29 = vpop.f32.mrb[1].mxu0  ;;  %v930_v30 = vpop.f32.mrb[0].mxu1  ;;  %v879_v63 = vadd.f32 %v2532_v56, %v878_v28  ;;  %v2541_v28 = vld [vmem:[%s3141_s25 + $0x9] ss:$0 sm:$0xff] }
 0x112   : > { %v881_v31 = vpop.f32.mrb[2].mxu0  ;;  %v2694_v32 = vpop.f32.mrb[1].mxu1  ;;  %v931_v1 = vadd.f32 %v2533_v59, %v930_v30 }
 0x113   : > { %v2687_v33 = vpop.f32.mrb[3].mxu0  ;;  %v933_v34 = vpop.f32.mrb[2].mxu1  ;;  %v1456_v11 = vpack.c.bf16 %v879_v63, %v879_v63 }
 0x114   : > { %v2695_v35 = vpop.f32.mrb[3].mxu1  ;;  %v1457_v15 = vpack.c.bf16 %v931_v1, %v931_v1 }
 0x118   : > { %v982_v36 = vpop.f32.mrb[4].mxu0 }
 0x119   : > { %v2702_v37 = vpop.f32.mrb[5].mxu0  ;;  %v1034_v38 = vpop.f32.mrb[4].mxu1  ;;  %v983_v22 = vadd.f32 %v2534_v16, %v982_v36 }
 0x11a   : > { %v985_v39 = vpop.f32.mrb[6].mxu0  ;;  %v2710_v40 = vpop.f32.mrb[5].mxu1  ;;  %v1035_v23 = vadd.f32 %v2535_v19, %v1034_v38 }
 0x11b   : > { %v2703_v41 = vpop.f32.mrb[7].mxu0  ;;  %v1037_v42 = vpop.f32.mrb[6].mxu1  ;;  %v1458_v24 = vpack.c.bf16 %v983_v22, %v983_v22 }
 0x11c   : > { %v2711_v43 = vpop.f32.mrb[7].mxu1  ;;  %v1459_v25 = vpack.c.bf16 %v1035_v23, %v1035_v23 }
 0x120   : > { %v1086_v46 = vpop.f32.mrb[8].mxu0 }
 0x121   : > { %v1087_v47 = vadd.f32 %v2536_v44, %v1086_v46  ;;  %v1138_v48 = vpop.f32.mrb[8].mxu1  ;;  %v2718_v49 = vpop.f32.mrb[9].mxu0 }
 0x122   : > { %v1139_v50 = vadd.f32 %v2537_v45, %v1138_v48  ;;  %v1089_v51 = vpop.f32.mrb[10].mxu0  ;;  %v2726_v52 = vpop.f32.mrb[9].mxu1 }
 0x123   : > { %v1460_v53 = vpack.c.bf16 %v1087_v47, %v1087_v47  ;;  %v2719_v54 = vpop.f32.mrb[11].mxu0  ;;  %v1141_v55 = vpop.f32.mrb[10].mxu1  ;;  %v693_v52 = vld [vmem:[%s3513_s27] sm:$0x1] }
 0x124   : > { %v1461_v57 = vpack.c.bf16 %v1139_v50, %v1139_v50  ;;  %v2727_v58 = vpop.f32.mrb[11].mxu1  ;;  %v1658_v50 = vlaneseq }
 0x125   : > { %v1473_v60 = vsel %vm1468_vm3, %v1460_v53, 0  ;;  %v694_v53 = vmul.f32 -1e+09, %v693_v52 }
 0x126   : > { %v1519_v61 = vsel %vm1468_vm3, %v1461_v57, 0  ;;  %2777 = vmatpush3.bf16.xpose.msra.mxu0 %v1473_v60  ;;  %v1659_v51 = vshrl.u32 %v1658_v50, 7 }
 0x127   : > { %2783 = vmatpush3.bf16.xpose.msra.mxu1 %v1519_v61  ;;  %2788 = vmatprep.subr.bf16.mxu0 %v3002_v2 }
 0x128   : > { %v1190_v3 = vpop.f32.mrb[12].mxu0  ;;  %2794 = vmatprep.subr.bf16.mxu1 %v3002_v2  ;;  %v1660_v54 = vsub.s32 0, %v1659_v51 }
 0x129   : > { %v1191_v4 = vadd.f32 %v2538_v62, %v1190_v3  ;;  %v1242_v5 = vpop.f32.mrb[12].mxu1  ;;  %v2734_v7 = vpop.f32.mrb[13].mxu0 }
 0x12a   : > { %v1243_v8 = vadd.f32 %v2539_v0, %v1242_v5  ;;  %v1193_v9 = vpop.f32.mrb[14].mxu0  ;;  %v2742_v10 = vpop.f32.mrb[13].mxu1  ;;  %v1661_v55 = vrot.slane %v694_v53, %v1660_v54 }
 0x12b   : > { %v1462_v12 = vpack.c.bf16 %v1191_v4, %v1191_v4  ;;  %v2735_v13 = vpop.f32.mrb[15].mxu0  ;;  %v1245_v14 = vpop.f32.mrb[14].mxu1 }
 0x12c   : > { %v1463_v17 = vpack.c.bf16 %v1243_v8, %v1243_v8  ;;  %v2743_v18 = vpop.f32.mrb[15].mxu1 }
 0x12d   : > { %v1565_v20 = vsel %vm1468_vm3, %v1462_v12, 0  ;;  %2779 = vmatmul.mubr.msk.bf16.vlgmr.msra.gmra.mrb[24].mxu0 %vm1468_vm3, %v1456_v11 }
 0x12e   : > { %v1611_v21 = vsel %vm1468_vm3, %v1463_v17, 0  ;;  %2785 = vmatmul.mubr.msk.bf16.vlgmr.msra.gmra.mrb[24].mxu1 %vm1468_vm3, %v1457_v15  ;;  %2789 = vmatpush3.bf16.xpose.msra.mxu0 %v1565_v20 }
 0x12f   : > { %2795 = vmatpush3.bf16.xpose.msra.mxu1 %v1611_v21  ;;  %2790 = vmatprep.mubr.msk.bf16.mxu0 %vm3003_vm1, %v3002_v2 }
 0x130   : > { %2796 = vmatprep.mubr.msk.bf16.mxu1 %vm3003_vm1, %v3002_v2  ;;  %2800 = vmatprep.subr.bf16.mxu0 %v3002_v2  ;;  %v1294_v27 = vpop.f32.mrb[16].mxu0 }
 0x131   : > { %2806 = vmatprep.subr.bf16.mxu1 %v3002_v2  ;;  %v1295_v29 = vadd.f32 %v2540_v26, %v1294_v27  ;;  %v2750_v30 = vpop.f32.mrb[17].mxu0 }
 0x132   : > { %v1297_v31 = vpop.f32.mrb[18].mxu0  ;;  %v1346_v32 = vpop.f32.mrb[16].mxu1 }
 0x133   : > { %v1464_v33 = vpack.c.bf16 %v1295_v29, %v1295_v29  ;;  %v2751_v34 = vpop.f32.mrb[19].mxu0  ;;  %v1347_v35 = vadd.f32 %v2541_v28, %v1346_v32  ;;  %v2758_v36 = vpop.f32.mrb[17].mxu1 }
 0x134   : > { %v1349_v37 = vpop.f32.mrb[18].mxu1 }
 0x135   : > { %2791 = vmatmul.mubr.msk.bf16.vlgmr.msra.gmra.mrb[28].mxu0 %vm1468_vm3, %v1458_v24  ;;  %v1720_v38 = vsel %vm1718_vm4, %v1464_v33, 0  ;;  %v1465_v39 = vpack.c.bf16 %v1347_v35, %v1347_v35  ;;  %v2759_v40 = vpop.f32.mrb[19].mxu1 }
 0x136   : > { %2797 = vmatmul.mubr.msk.bf16.vlgmr.msra.gmra.mrb[28].mxu1 %vm1468_vm3, %v1459_v25  ;;  %2802 = vmatprep.mubr.msk.bf16.mxu0 %vm3003_vm1, %v3002_v2 }
 0x137   : > { %2808 = vmatprep.mubr.msk.bf16.mxu1 %vm3003_vm1, %v3002_v2  ;;  %2801 = vmatpush3.bf16.msra.mxu0 %v1720_v38  ;;  %v1766_v41 = vsel %vm1718_vm4, %v1465_v39, 0 }
 0x138   : > { %2812 = vmatprep.subr.bf16.mxu0 %v3002_v2  ;;  %2807 = vmatpush3.bf16.msra.mxu1 %v1766_v41  ;;  %v3332_v42 = vpop.f32.mrb[20].mxu0 }
 0x139   : > { %2818 = vmatprep.subr.bf16.mxu1 %v3002_v2  ;;  %v2766_v44 = vpop.f32.mrb[21].mxu0 }
 0x13a   : > { %v3334_v43 = vpop.f32.mrb[20].mxu1  ;;  %v1401_v46 = vpop.f32.mrb[22].mxu0 }
 0x13b   : > { %v2774_v45 = vpop.f32.mrb[21].mxu1  ;;  %v2767_v48 = vpop.f32.mrb[23].mxu0  ;;  %v2542_v46 = vld [vmem:[%s3141_s25 + $0xa] ss:$0 sm:$0xff] }
 0x13c   : > { %v1453_v47 = vpop.f32.mrb[22].mxu1 }
 0x13d   : > { %v2775_v49 = vpop.f32.mrb[23].mxu1  ;;  %v1399_v47 = vadd.f32 %v2542_v46, %v3332_v42 }
 0x13e   : > { %v2543_v49 = vld [vmem:[%s3141_s25 + $0xb] ss:$0 sm:$0xff] }
 0x13f   : > { %v1466_v51 = vpack.c.bf16 %v1399_v47, %v1399_v47  ;;  %v1451_v52 = vadd.f32 %v2543_v49, %v3334_v43  ;;  %v1900_v43 = vld [vmem:[%s3136_s13] sm:$0xf] }
 0x200   : > { %v1509_v56 = vpop.f32.mrb[24].mxu0 }
 0x201   : > { %v1653_v57 = vmul.f32 0.35355338, %v1509_v56  ;;  %v1555_v58 = vpop.f32.mrb[24].mxu1  ;;  %v2780_v59 = vpop.f32.mrb[25].mxu0 }
 0x202   : > { %v1654_v60 = vmul.f32 0.35355338, %v1555_v58  ;;  %v2786_v61 = vpop.f32.mrb[25].mxu1  ;;  %v1512_v62 = vpop.f32.mrb[26].mxu0  ;;  %v1467_v58 = vpack.c.bf16 %v1451_v52, %v1451_v52  ;;  %v2592_v52 = vld [vmem:[%s3514_s23] ss:$0 sm:$0xff] }
 0x203   : > { %v1558_v63 = vpop.f32.mrb[26].mxu1  ;;  %v2781_v0 = vpop.f32.mrb[27].mxu0  ;;  %v1663_v1 = vadd.f32 %v1661_v55, %v1653_v57  ;;  %v1812_v57 = vsel %vm1718_vm4, %v1466_v51, 0 }
 0x204   : > { %v2787_v3 = vpop.f32.mrb[27].mxu1  ;;  %v1664_v5 = vadd.f32 %v1661_v55, %v1654_v60  ;;  %v1858_v61 = vsel %vm1718_vm4, %v1467_v58, 0  ;;  %v1913_v0 = vsel %vm1718_vm4, %v1900_v43, 0 }
 0x205   : > { %v1667_v4 = vsel %vm1468_vm3, %v1663_v1, -inf }
 0x206   : > { %1668 = vmax.xlane.f32.xlu0 %v1667_v4  ;;  %v1670_v11 = vsel %vm1468_vm3, %v1664_v5, -inf }
 0x208   : > { %v1601_v7 = vpop.f32.mrb[28].mxu0 }
 0x209   : > { %v1655_v8 = vmul.f32 0.35355338, %v1601_v7  ;;  %v1647_v9 = vpop.f32.mrb[28].mxu1  ;;  %v2792_v10 = vpop.f32.mrb[29].mxu0 }
 0x20a   : > { %v1656_v12 = vmul.f32 0.35355338, %v1647_v9  ;;  %v2798_v13 = vpop.f32.mrb[29].mxu1  ;;  %1671 = vmax.xlane.f32.xlu0 %v1670_v11  ;;  %v1604_v14 = vpop.f32.mrb[30].mxu0 }
 0x20b   : > { %v1650_v15 = vpop.f32.mrb[30].mxu1  ;;  %v2793_v16 = vpop.f32.mrb[31].mxu0  ;;  %v1665_v17 = vadd.f32 %v1661_v55, %v1655_v8  ;;  %v1902_v8 = vld [vmem:[%s3136_s13 + $0x8] sm:$0xf]  ;;  %v1903_v14 = vld [vmem:[%s3136_s13 + $0xc] sm:$0xf] }
 0x20c   : > { %v2799_v18 = vpop.f32.mrb[31].mxu1  ;;  %v1666_v20 = vadd.f32 %v1661_v55, %v1656_v12  ;;  %v2005_v12 = vsel %vm1718_vm4, %v1902_v8, 0 }
 0x20d   : > { %v1673_v19 = vsel %vm1468_vm3, %v1665_v17, -inf }
 0x20e   : > { %1674 = vmax.xlane.f32.xlu1 %v1673_v19  ;;  %v1676_v21 = vsel %vm1468_vm3, %v1666_v20, -inf  ;;  %v2051_v19 = vsel %vm1718_vm4, %v1903_v14, 0 }
 0x212   : > { %1677 = vmax.xlane.f32.xlu1 %v1676_v21 }
 0x293   : > { %v1669_v22 = vpop.xlane.xlu0 %1668 }
 0x294   : > { %v1679_v23 = vsub.f32 %v1663_v1, %v1669_v22 }
 0x296   : > { %v1683_v24 = vmul.f32 1.442695, %v1679_v23 }
 0x297   : > { %v1672_v25 = vpop.xlane.xlu0 %1671 }
 0x298   : > { %2942 = vpow2.f32 %v1683_v24  ;;  %v1680_v26 = vsub.f32 %v1664_v5, %v1672_v25  ;;  %v1901_v5 = vld [vmem:[%s3136_s13 + $0x4] sm:$0xf] }
 0x299   : > { %v1959_v7 = vsel %vm1718_vm4, %v1901_v5, 0 }
 0x29a   : > { %v1685_v27 = vmul.f32 1.442695, %v1680_v26 }
 0x29b   : > { %v1675_v28 = vpop.xlane.xlu1 %1674 }
 0x29c   : > { %2944 = vpow2.f32 %v1685_v27  ;;  %v1681_v29 = vsub.f32 %v1665_v17, %v1675_v28 }
 0x29e   : > { %v1687_v30 = vmul.f32 1.442695, %v1681_v29 }
 0x29f   : > { %v1678_v31 = vpop.xlane.xlu1 %1677 }
 0x2a0   : > { %2946 = vpow2.f32 %v1687_v30  ;;  %v1682_v32 = vsub.f32 %v1666_v20, %v1678_v31 }
 0x2a2   : > { %v2943_v33 = vpop.eup %2942  ;;  %v1689_v34 = vmul.f32 1.442695, %v1682_v32 }
 0x2a3   : > { %v1691_v35 = vsel %vm1468_vm3, %v2943_v33, 0.0 }
 0x2a4   : > { %2948 = vpow2.f32 %v1689_v34  ;;  %1692 = vadd.xlane.f32.xlu0 %v1691_v35 }
 0x2a6   : > { %v2945_v36 = vpop.eup %2944 }
 0x2a7   : > { %v1694_v37 = vsel %vm1468_vm3, %v2945_v36, 0.0 }
 0x2a8   : > { %1695 = vadd.xlane.f32.xlu1 %v1694_v37 }
 0x2aa   : > { %v2947_v38 = vpop.eup %2946 }
 0x2ab   : > { %v1697_v39 = vsel %vm1468_vm3, %v2947_v38, 0.0 }
 0x2ac   : > { %1698 = vadd.xlane.f32.xlu0 %v1697_v39 }
 0x2ae   : > { %v2949_v40 = vpop.eup %2948 }
 0x2af   : > { %v1700_v41 = vsel %vm1468_vm3, %v2949_v40, 0.0 }
 0x2b0   : > { %1701 = vadd.xlane.f32.xlu1 %v1700_v41 }
 0x331   : > { %v1693_v44 = vpop.xlane.xlu0 %1692 }
 0x332   : > { %2950 = vrcp.f32 %v1693_v44 }
 0x335   : > { %v1696_v45 = vpop.xlane.xlu1 %1695 }
 0x336   : > { %2952 = vrcp.f32 %v1696_v45 }
 0x339   : > { %v1699_v48 = vpop.xlane.xlu0 %1698 }
 0x33a   : > { %2954 = vrcp.f32 %v1699_v48 }
 0x33c   : > { %v2951_v50 = vpop.eup %2950 }
 0x33d   : > { %v1704_v53 = vmul.f32 %v2951_v50, %v2943_v33  ;;  %v1702_v54 = vpop.xlane.xlu1 %1701 }
 0x33e   : > { %2956 = vrcp.f32 %v1702_v54 }
 0x33f   : > { %v1711_v55 = vpack.c.bf16 %v1704_v53, %v1704_v53 }
 0x340   : > { %v2953_v56 = vpop.eup %2952 }
 0x341   : > { %v1706_v59 = vmul.f32 %v2953_v56, %v2945_v36  ;;  %2803 = vmatmul.mubr.msk.bf16.vlgmr.msra.gmra.mrb[32].mxu0 %vm1468_vm3, %v1711_v55 }
 0x342   : > { %2813 = vmatpush3.bf16.msra.mxu0 %v1812_v57  ;;  %2814 = vmatprep.mubr.msk.bf16.mxu0 %vm3003_vm1, %v3002_v2 }
 0x343   : > { %v1712_v42 = vpack.c.bf16 %v1706_v59, %v1706_v59  ;;  %2824 = vmatprep.subr.bf16.mxu0 %v3002_v2 }
 0x344   : > { %v2955_v60 = vpop.eup %2954 }
 0x345   : > { %v1708_v62 = vmul.f32 %v2955_v60, %v2947_v38  ;;  %2809 = vmatmul.mubr.msk.bf16.vlgmr.msra.gmra.mrb[32].mxu1 %vm1468_vm3, %v1712_v42 }
 0x346   : > { %2819 = vmatpush3.bf16.msra.mxu1 %v1858_v61  ;;  %2820 = vmatprep.mubr.msk.bf16.mxu1 %vm3003_vm1, %v3002_v2 }
 0x347   : > { %v1713_v63 = vpack.c.bf16 %v1708_v62, %v1708_v62  ;;  %2830 = vmatprep.subr.bf16.mxu1 %v3002_v2 }
 0x348   : > { %v2957_v1 = vpop.eup %2956 }
 0x349   : > { %v1710_v3 = vmul.f32 %v2957_v1, %v2949_v40  ;;  %2815 = vmatmul.mubr.msk.bf16.vlgmr.msra.gmra.mrb[36].mxu0 %vm1468_vm3, %v1713_v63  ;;  %v2937_v1 = vld [vmem:[%s3158_s4 + $0x8] sm:$0xff]  }
 0x34a   : > { %2825 = vmatpush3.bf16.msra.mxu0 %v1913_v0  ;;  %2826 = vmatprep.mubr.msk.bf16.mxu0 %vm3003_vm1, %v3002_v2  ;;  %v2936_v0 = vld [vmem:[%s3158_s4] sm:$0xff]  }
 0x34b   : > { %v1714_v4 = vpack.c.bf16 %v1710_v3, %v1710_v3  ;;  %2836 = vmatprep.subr.bf16.mxu0 %v3002_v2  ;;  %v2939_v3 = vld [vmem:[%s3172_s15 + $0x8] sm:$0xff]  }
 0x34d   : > { %2821 = vmatmul.mubr.msk.bf16.vlgmr.msra.gmra.mrb[36].mxu1 %vm1468_vm3, %v1714_v4 }
 0x34e   : > { %2832 = vmatprep.mubr.msk.bf16.mxu1 %vm3003_vm1, %v3002_v2  ;;  %2831 = vmatpush3.bf16.msra.mxu1 %v1959_v7 }
 0x34f   : > { %2842 = vmatprep.subr.bf16.mxu1 %v3002_v2 }
 0x414   : > { %v1756_v9 = vpop.f32.mrb[32].mxu0 }
 0x415   : > { %v1905_v10 = vpack.c.bf16 %v1756_v9, %v1756_v9  ;;  %v2804_v11 = vpop.f32.mrb[33].mxu0  ;;  %v2593_v9 = vld [vmem:[%s3515_s1] ss:$0 sm:$0xff] }
 0x416   : > { %v1759_v13 = vpop.f32.mrb[34].mxu0  ;;  %v2594_v11 = vld [vmem:[%s3516_s28] ss:$0 sm:$0xff] }
 0x417   : > { %v2805_v15 = vpop.f32.mrb[35].mxu0  ;;  %2827 = vmatmul.mubr.msk.bf16.vlgmr.msra.gmra.mrb[40].mxu0 %vm1468_vm3, %v1905_v10 }
 0x418   : > { %v1802_v16 = vpop.f32.mrb[32].mxu1  ;;  %2837 = vmatpush3.bf16.msra.mxu0 %v2005_v12  ;;  %2838 = vmatprep.mubr.msk.bf16.mxu0 %vm3003_vm1, %v3002_v2  ;;  %v2940_v15 = vld [vmem:[%s3172_s15 + $0x10] sm:$0xff]  }
 0x419   : > { %v1906_v17 = vpack.c.bf16 %v1802_v16, %v1802_v16  ;;  %v2810_v18 = vpop.f32.mrb[33].mxu1  ;;  %2848 = vmatprep.subr.bf16.mxu0 %v3002_v2  ;;  %v2941_v16 = vld [vmem:[%s3172_s15 + $0x18] sm:$0xff]  }
 0x41a   : > { %v1805_v20 = vpop.f32.mrb[34].mxu1 }
 0x41b   : > { %v2811_v21 = vpop.f32.mrb[35].mxu1  ;;  %2833 = vmatmul.mubr.msk.bf16.vlgmr.msra.gmra.mrb[40].mxu1 %vm1468_vm3, %v1906_v17  ;;  %v2595_v17 = vld [vmem:[%s3518_s19] ss:$0 sm:$0xff] }
 0x41c   : > { %v1848_v22 = vpop.f32.mrb[36].mxu0  ;;  %2843 = vmatpush3.bf16.msra.mxu1 %v2051_v19  ;;  %2844 = vmatprep.mubr.msk.bf16.mxu1 %vm3003_vm1, %v3002_v2 }
 0x41d   : > { %v1907_v23 = vpack.c.bf16 %v1848_v22, %v1848_v22  ;;  %v2816_v24 = vpop.f32.mrb[37].mxu0  ;;  %2856 = vmatprep.subr.bf16.mxu1 %v3002_v2 }
 0x41e   : > { %v1851_v25 = vpop.f32.mrb[38].mxu0 }
 0x41f   : > { %v2817_v26 = vpop.f32.mrb[39].mxu0  ;;  %2839 = vmatmul.mubr.msk.bf16.vlgmr.msra.gmra.mrb[44].mxu0 %vm1468_vm3, %v1907_v23 }
 0x420   : > { %v1894_v27 = vpop.f32.mrb[36].mxu1  ;;  %2852 = vmatprep.mubr.msk.bf16.mxu0 %vm3003_vm1, %v3002_v2  ;;  %2849 = vmatpush3.bf16.msra.mxu0 %v2936_v0 }
 0x421   : > { %v1908_v28 = vpack.c.bf16 %v1894_v27, %v1894_v27  ;;  %v2822_v29 = vpop.f32.mrb[37].mxu1  ;;  %2850 = vmatprep.subr.bf16.mxu0 %v3002_v2 }
 0x422   : > { %v1897_v30 = vpop.f32.mrb[38].mxu1 }
 0x423   : > { %v2823_v31 = vpop.f32.mrb[39].mxu1  ;;  %2845 = vmatmul.mubr.msk.bf16.vlgmr.msra.gmra.mrb[44].mxu1 %vm1468_vm3, %v1908_v28 }
 0x424   : > { %2864 = vmatprep.mubr.msk.bf16.mxu1 %vm3003_vm1, %v3002_v2  ;;  %2851 = vmatpush3.bf16.msra.mxu0 %v2937_v1 }
 0x4ea   : > { %v1949_v32 = vpop.f32.mrb[40].mxu0 }
 0x4eb   : > { %v2828_v33 = vpop.f32.mrb[41].mxu0  ;;  %v2093_v37 = vsel %vm840_vm2, %v1949_v32, 0.0 }
 0x4ec   : > { %v1952_v34 = vpop.f32.mrb[42].mxu0 }
 0x4ed   : > { %v2829_v35 = vpop.f32.mrb[43].mxu0 }
 0x4ee   : > { %v1995_v36 = vpop.f32.mrb[40].mxu1 }
 0x4ef   : > { %v2094_v38 = vsel %vm840_vm2, %v1995_v36, 0.0  ;;  %v2834_v39 = vpop.f32.mrb[41].mxu1 }
 0x4f0   : > { %v2095_v40 = vadd.f32 %v2094_v38, %v2093_v37  ;;  %v1998_v41 = vpop.f32.mrb[42].mxu1 }
 0x4f1   : > { %v2835_v44 = vpop.f32.mrb[43].mxu1  ;;  %v2605_v41 = vld [vmem:[%s676_s14] ss:$0 sm:$0xff] }
 0x4f2   : > { %v2041_v45 = vpop.f32.mrb[44].mxu0 }
 0x4f3   : > { %v2096_v46 = vsel %vm840_vm2, %v2041_v45, 0.0  ;;  %v2840_v47 = vpop.f32.mrb[45].mxu0  ;;  %v2606_v45 = vld [vmem:[%s679_s8] ss:$0 sm:$0xff] }
 0x4f4   : > { %v2097_v48 = vadd.f32 %v2096_v46, %v2095_v40  ;;  %v2044_v49 = vpop.f32.mrb[46].mxu0 }
 0x4f5   : > { %v2841_v50 = vpop.f32.mrb[47].mxu0 }
 0x4f6   : > { %v2087_v51 = vpop.f32.mrb[44].mxu1 }
 0x4f7   : > { %v2098_v53 = vsel %vm840_vm2, %v2087_v51, 0.0  ;;  %v2846_v54 = vpop.f32.mrb[45].mxu1 }
 0x4f8   : > { %v2099_v55 = vadd.f32 %v2098_v53, %v2097_v48  ;;  %v2090_v56 = vpop.f32.mrb[46].mxu1 }
 0x4f9   : > { %v2847_v57 = vpop.f32.mrb[47].mxu1 }
 0x4fa   : > { %v2106_v58 = vadd.f32 %v2592_v52, %v2099_v55 }
 0x4fc   : > { %v2107_v59 = vadd.f32 %v2106_v58, %v3202_v6  ;;  %v2938_v6 = vld [vmem:[%s3172_s15] sm:$0xff]  }
 0x4fd   : > { %2857 = vmatpush3.bf16.msra.mxu1 %v2938_v6 }
 0x4fe   : > { %v2110_v42 = vsel %vm840_vm2, %v2107_v59, 0.0  ;;  %2858 = vmatprep.subr.bf16.mxu1 %v3002_v2 }
 0x4ff   : > { %2111 = vadd.xlane.f32.xlu0 %v2110_v42 }
 0x501   : > { %2859 = vmatpush3.bf16.msra.mxu1 %v2939_v3 }
 0x502   : > { %2860 = vmatprep.subr.bf16.mxu1 %v3002_v2 }
 0x505   : > { %2861 = vmatpush3.bf16.msra.mxu1 %v2940_v15 }
 0x506   : > { %2862 = vmatprep.subr.bf16.mxu1 %v3002_v2  ;;  %v2599_v2 = vld [vmem:[%s673_s0] ss:$0 sm:$0xff] }
 0x509   : > { %2863 = vmatpush3.bf16.msra.mxu1 %v2941_v16 }
 0x58c   : > { %v2112_v60 = vpop.xlane.xlu0 %2111 }
 0x58d   : > { %v2114_v43 = vmul.f32 0.03125, %v2112_v60 }
 0x58f   : > { %v2115_v61 = vsub.f32 %v2107_v59, %v2114_v43 }
 0x591   : > { %v2116_v62 = vmul.f32 %v2115_v61, %v2115_v61 }
 0x593   : > { %v2117_v63 = vsel %vm840_vm2, %v2116_v62, 0.0 }
 0x594   : > { %2118 = vadd.xlane.f32.xlu1 %v2117_v63 }
 0x621   : > { %v2119_v4 = vpop.xlane.xlu1 %2118 }
 0x622   : > { %v2120_v5 = vmul.f32 0.03125, %v2119_v4 }
 0x624   : > { %v2121_v7 = vadd.f32 1e-05, %v2120_v5 }
 0x626   : > { %2958 = vrsqrt.f32 %v2121_v7 }
 0x630   : > { %v2959_v8 = vpop.eup %2958 }
 0x631   : > { %v2123_v10 = vmul.f32 %v2959_v8, %v2115_v61 }
 0x633   : > { %v2130_v12 = vmul.f32 %v2593_v9, %v2123_v10 }
 0x635   : > { %v2137_v13 = vadd.f32 %v2594_v11, %v2130_v12 }
 0x637   : > { %v2138_v14 = vpack.c.bf16 %v2137_v13, %v2137_v13 }
 0x639   : > { %2853 = vmatmul.mubr.msk.bf16.vlgmr.msra.gmra.mrb[48].mxu0 %vm840_vm2, %v2138_v14 }
 0x70c   : > { %v2199_v18 = vpop.f32.mrb[48].mxu0 }
 0x70d   : > { %v2200_v19 = vadd.f32 %v2595_v17, %v2199_v18  ;;  %v2854_v20 = vpop.f32.mrb[49].mxu0 }
 0x70e   : > { %v2202_v21 = vpop.f32.mrb[50].mxu0 }
 0x70f   : > { %v2205_v22 = vmax.f32 %v2200_v19, 0.0  ;;  %v2855_v23 = vpop.f32.mrb[51].mxu0 }
 0x711   : > { %v2206_v24 = vpack.c.bf16 %v2205_v22, %v2205_v22 }
 0x713   : > { %2865 = vmatmul.mubr.msk.bf16.vlgmr.msra.gmra.mrb[48].mxu1 %vm2246_vm5, %v2206_v24 }
 0x7e6   : > { %v2284_v25 = vpop.f32.mrb[48].mxu1 }
 0x7e7   : > { %v2285_v26 = vadd.f32 %v2599_v2, %v2284_v25  ;;  %v2866_v27 = vpop.f32.mrb[49].mxu1 }
 0x7e8   : > { %v2287_v28 = vpop.f32.mrb[50].mxu1 }
 0x7e9   : > { %v2867_v29 = vpop.f32.mrb[51].mxu1  ;;  %v2290_v30 = vadd.f32 %v2285_v26, %v2137_v13 }
 0x7eb   : > { %v2293_v31 = vsel %vm840_vm2, %v2290_v30, 0.0 }
 0x7ec   : > { %2294 = vadd.xlane.f32.xlu0 %v2293_v31 }
 0x879   : > { %v2295_v32 = vpop.xlane.xlu0 %2294 }
 0x87a   : > { %v2296_v33 = vmul.f32 0.03125, %v2295_v32 }
 0x87c   : > { %v2297_v34 = vsub.f32 %v2290_v30, %v2296_v33 }
 0x87e   : > { %v2298_v35 = vmul.f32 %v2297_v34, %v2297_v34 }
 0x880   : > { %v2299_v36 = vsel %vm840_vm2, %v2298_v35, 0.0 }
 0x881   : > { %2300 = vadd.xlane.f32.xlu1 %v2299_v36 }
 0x90e   : > { %v2301_v37 = vpop.xlane.xlu1 %2300 }
 0x90f   : > { %v2302_v38 = vmul.f32 0.03125, %v2301_v37 }
 0x911   : > { %v2303_v39 = vadd.f32 1e-05, %v2302_v38 }
 0x913   : > { %2960 = vrsqrt.f32 %v2303_v39 }
 0x91d   : > { %v2961_v40 = vpop.eup %2960 }
 0x91e   : > { %v2305_v44 = vmul.f32 %v2961_v40, %v2297_v34 }
 0x920   : > { %v2312_v46 = vmul.f32 %v2605_v41, %v2305_v44 }
 0x922   : > { %v2319_v47 = vadd.f32 %v2606_v45, %v2312_v46 }
 0x924   : > { %2320 = vst.msk [vmem:[%s3185_s9] sm:$0xff] %vm840_vm2, %v2319_v47 }
 0x925 PF: > { %s3520_s27 = sld [smem:[#allocation5_spill]]  ;;  %s3521_s29 = sld [smem:[#allocation3_spill]] }
 0x926   : > { %s3522_s30 = sld [smem:[#allocation4_spill]]  ;;  %s3523_s15 = sld [smem:[#allocation6_spill]] }
 0x927   : > { %s3524_s16 = sld [smem:[#allocation7_spill]] }
 0x92b   : > { %s24_s17 = sadd.s32 1, %s3520_s27  }
 0x92c   : > { %p21_p8 = scmp.ge.s32.totalorder %s24_s17, 6  }
 0x92e   :  { %23 = sbr.rel (!%p21_p8) target bundleno = 10 (0xa), region = 149 }

// kernel: transformer_forward.4
= control target key start
LH: loop header
LB: loop body
LE: loop exit
PB: predicated region body
PF: predicated region fallthrough
CT: control target
= control target key end

     0   :  { %s5674_s27 = smov 0   ;;  %s5680_s28 = smov 0   ;;  %s6362_s0 = inlined_call_operand.vmem [shape: f32[2,8,32], index: 0, kind: input, shape index: {}]   ;;  %s6363_s1 = inlined_call_operand.vmem [shape: f32[2,8,32], index: 1, kind: input, shape index: {}]   ;;  %s6364_s2 = inlined_call_operand.vmem [shape: f32[2,8,8], index: 2, kind: input, shape index: {}]   ;;  %s6365_s3 = inlined_call_operand.vmem [shape: f32[2,1,8], index: 3, kind: input, shape index: {}]   ;;  %s6366_s4 = inlined_call_operand.vmem [shape: bf16[2,12,32,8], index: 4, kind: input, shape index: {}]   ;;  %s6367_s5 = inlined_call_operand.vmem [shape: f32[2,12,1,8], index: 5, kind: input, shape index: {}]   ;;  %s6368_s6 = inlined_call_operand.vmem [shape: bf16[2,4,8,32], index: 6, kind: input, shape index: {}]   ;;  %s6369_s7 = inlined_call_operand.vmem [shape: f32[2,1,32], index: 7, kind: input, shape index: {}]   ;;  %s6370_s8 = inlined_call_operand.vmem [shape: f32[2,1,32], index: 8, kind: input, shape index: {}]   ;;  %s6371_s9 = inlined_call_operand.vmem [shape: f32[2,1,32], index: 9, kind: input, shape index: {}]   ;;  %s6372_s10 = inlined_call_operand.vmem [shape: bf16[2,4,32,8], index: 10, kind: input, shape index: {}]   ;;  %s6373_s11 = inlined_call_operand.vmem [shape: f32[2,4,1,8], index: 11, kind: input, shape index: {}]   ;;  %s6374_s12 = inlined_call_operand.vmem [shape: bf16[2,8,32,8], index: 12, kind: input, shape index: {}]   ;;  %s6375_s13 = inlined_call_operand.vmem [shape: f32[2,8,1,8], index: 13, kind: input, shape index: {}]   ;;  %s6376_s14 = inlined_call_operand.vmem [shape: bf16[2,4,8,32], index: 14, kind: input, shape index: {}]   ;;  %s6377_s15 = inlined_call_operand.vmem [shape: f32[2,1,32], index: 15, kind: input, shape index: {}]   ;;  %s6378_s16 = inlined_call_operand.vmem [shape: f32[2,1,32], index: 16, kind: input, shape index: {}]   ;;  %s6379_s17 = inlined_call_operand.vmem [shape: f32[2,1,32], index: 17, kind: input, shape index: {}]   ;;  %s6380_s18 = inlined_call_operand.vmem [shape: bf16[2,32,64], index: 18, kind: input, shape index: {}]   ;;  %s6381_s19 = inlined_call_operand.vmem [shape: f32[2,1,64], index: 19, kind: input, shape index: {}]   ;;  %s6382_s20 = inlined_call_operand.vmem [shape: bf16[2,64,32], index: 20, kind: input, shape index: {}]   ;;  %s6383_s21 = inlined_call_operand.vmem [shape: f32[2,1,32], index: 21, kind: input, shape index: {}]   ;;  %s6384_s22 = inlined_call_operand.vmem [shape: f32[2,1,32], index: 22, kind: input, shape index: {}]   ;;  %s6385_s23 = inlined_call_operand.vmem [shape: f32[2,1,32], index: 23, kind: input, shape index: {}]   ;;  %s6386_s24 = inlined_call_operand.vmem [shape: f32[2,8,32], index: 24, kind: output, shape index: {0}]   ;;  %s6387_s25 = inlined_call_operand.vmem [shape: f32[4,4,8,8], index: 25, kind: output, shape index: {1}]   ;;  %s6388_s26 = inlined_call_operand.vmem [shape: f32[4,4,8,8], index: 26, kind: output, shape index: {2}]  }
   0x1   :  { %6396 = sst [smem:[#allocation11_spill]] %s6362_s0 }
   0x2   :  { %6397 = sst [smem:[#allocation12_spill]] %s6363_s1 }
   0x3   :  { %6398 = sst [smem:[#allocation13_spill]] %s6364_s2 }
   0x4   :  { %6399 = sst [smem:[#allocation14_spill]] %s6365_s3  ;;  %s5676_s3 = smov 0  }
   0x5   :  { %6400 = sst [smem:[#allocation15_spill]] %s6366_s4 }
   0x6   :  { %6401 = sst [smem:[#allocation16_spill]] %s6367_s5 }
   0x7   :  { %6402 = sst [smem:[#allocation17_spill]] %s6368_s6 }
   0x8   :  { %6403 = sst [smem:[#allocation18_spill]] %s6369_s7  ;;  %s5678_s7 = smov 0  }
   0x9   :  { %6404 = sst [smem:[#allocation19_spill]] %s6370_s8  ;;  %s5682_s8 = smov 0  }
   0xa   :  { %6405 = sst [smem:[#allocation20_spill]] %s6371_s9 }
   0xb   :  { %6406 = sst [smem:[#allocation21_spill]] %s6372_s10 }
   0xc   :  { %6407 = sst [smem:[#allocation22_spill]] %s6373_s11 }
   0xd   :  { %6408 = sst [smem:[#allocation23_spill]] %s6374_s12 }
   0xe   :  { %6409 = sst [smem:[#allocation24_spill]] %s6375_s13 }
   0xf   :  { %6410 = sst [smem:[#allocation25_spill]] %s6376_s14 }
  0x10   :  { %6411 = sst [smem:[#allocation26_spill]] %s6377_s15 }
  0x11   :  { %6412 = sst [smem:[#allocation27_spill]] %s6378_s16 }
  0x12   :  { %6413 = sst [smem:[#allocation28_spill]] %s6379_s17 }
  0x13   :  { %6414 = sst [smem:[#allocation29_spill]] %s6380_s18 }
  0x14   :  { %6415 = sst [smem:[#allocation30_spill]] %s6381_s19 }
  0x15   :  { %6416 = sst [smem:[#allocation31_spill]] %s6382_s20 }
  0x16   :  { %6417 = sst [smem:[#allocation32_spill]] %s6383_s21 }
  0x17   :  { %6418 = sst [smem:[#allocation33_spill]] %s6384_s22 }
  0x18   :  { %6419 = sst [smem:[#allocation34_spill]] %s6385_s23 }
  0x19   :  { %6420 = sst [smem:[#allocation35_spill]] %s6386_s24 }
  0x1a   :  { %6421 = sst [smem:[#allocation36_spill]] %s6387_s25 }
  0x1b   :  { %6422 = sst [smem:[#allocation37_spill]] %s6388_s26 }
  0x1c LB: > { %6423 = sst [smem:[#allocation2_spill]] %s5527_s7  ;;  %s46_s4 = sadd.s32 1, %s5527_s7  ;;  %s5535_s8 = sphi %s5682_s8, %s37_s8   ;;  %s5531_s28 = sphi %s5680_s28, %s6493_s28   ;;  %s5527_s7 = sphi %s5678_s7, %s6492_s7   ;;  %s5523_s3 = sphi %s5676_s3, %s6491_s3   ;;  %s5519_s27 = sphi %s5674_s27, %s6490_s27  }
  0x1d   : > { %6424 = sst [smem:[#allocation3_spill]] %s5531_s28  ;;  %s49_s29 = sadd.s32 1, %s5531_s28 }
  0x1e   : > { %6425 = sst [smem:[#allocation4_spill]] %s5535_s8  ;;  %p47_p0 = scmp.ge.s32.totalorder %s46_s4, 2 }
  0x1f   : > { %p4702_p1 = scmp.ge.s32.totalorder %s5535_s8, 1  ;;  %p939_p2 = scmp.lt.s32.totalorder %s5535_s8, 5 }
  0x20   : > { %s6495_s4 = smov (%p47_p0, %s46_s4), 0  ;;  %s6497_s29 = smov (!%p47_p0, %s49_s29), %s5531_s28 }
  0x21   : > { %6426 = sst [smem:[#allocation5_spill]] %s6495_s4  ;;  %p940_p3 = pnand %p4702_p1, %p939_p2 }
  0x22   : > { %p51_p4 = scmp.ge.s32.totalorder %s6497_s29, 2 }
  0x23   : > { %943 = sbr.rel (%p940_p3) target bundleno = 3897 (0xf39), region = 116 }
  0x24   : > { %s6499_s29 = smov (%p51_p4, %s6497_s29), 0 }
  0x25   : > { %6427 = sst [smem:[#allocation6_spill]] %s6499_s29 }
  0x2a   : > { %p1109_p5 = scmp.lt.s32.totalorder %s5523_s3, 1  ;;  %p1124_p6 = scmp.lt.s32.totalorder %s5519_s27, 1 }
  0x2b   : > { %s6433_s6 = sld [smem:[#allocation15_spill]]  ;;  %s6434_s0 = sld [smem:[#allocation17_spill]] }
  0x2c   : > { %s5712_s9 = scalar_select %p1109_p5, %s5523_s3, 1 }
  0x2d   : > { %s5715_s30 = scalar_select %p1124_p6, %s5519_s27, 1 }
  0x2e   : > { %6428 = sst [smem:[#allocation7_spill]] %s5712_s9  ;;  %s5718_s2 = sshll.u32 %s5712_s9, 3 }
  0x2f   : > { %s5361_s21 = smul.u32 192, %s5715_s30  ;;  %s4869_s10 = sshll.u32 %s5715_s30, 4 }
  0x30   : > { %s5362_s5 = smul.u32 12, %s5715_s30  ;;  %s6436_s23 = sld [smem:[#allocation16_spill]] }
  0x31   : > { %s5742_s1 = scalar_lea.vmem %s6433_s6, %s5361_s21  ;;  %s5747_s7 = scalar_lea.vmem %s6434_s0, %s4869_s10 }
  0x32   : > { %6435 = sst [smem:[#allocation8_spill]] %s5747_s7  ;;  %s4870_s7 = sshll.u32 %s5715_s30, 6 }
  0x33   : > { %s4711_s26 = sshll.u32 %s5715_s30, 2  ;;  %s6442_s11 = sld [smem:[#allocation22_spill]] }
  0x34   : > { %s4871_s18 = sshll.u32 %s5715_s30, 7  ;;  %s4714_s9 = sshll.u32 %s5715_s30, 3 }
  0x35   : > { %s6443_s12 = sld [smem:[#allocation23_spill]]  ;;  %s6444_s13 = sld [smem:[#allocation24_spill]] }
  0x36   : > { %s5752_s22 = scalar_lea.vmem %s6436_s23, %s5362_s5  ;;  %s6441_s23 = sld [smem:[#allocation21_spill]] }
  0x37   : > { %6437 = sst [smem:[#allocation9_spill]] %s5752_s22  ;;  %s6445_s14 = sld [smem:[#allocation25_spill]] }
  0x38   : > { %s6450_s8 = sld [smem:[#allocation29_spill]]  ;;  %s6452_s0 = sld [smem:[#allocation32_spill]] }
  0x39   : > { %s5776_s24 = scalar_lea.vmem %s6442_s11, %s4711_s26  ;;  %s6453_s19 = sld [smem:[#allocation31_spill]] }
  0x3a   : > { %s6454_s11 = sld [smem:[#allocation33_spill]]  ;;  %s6457_s20 = sshll.u32 %s5523_s3, 1 }
  0x3b   : > { %s5783_s4 = scalar_lea.vmem %s6443_s12, %s4871_s18  ;;  %s6458_s28 = sld [smem:[#allocation36_spill]] }
  0x3c   : > { %s5771_s22 = scalar_lea.vmem %s6441_s23, %s4870_s7  ;;  %s5788_s7 = scalar_lea.vmem %s6444_s13, %s4714_s9 }
  0x3d   : > { %s5793_s26 = scalar_lea.vmem %s6445_s14, %s4869_s10  ;;  %s6456_s23 = sld [smem:[#allocation35_spill]] }
  0x3e   : > { %6446 = sst [smem:[#allocation10_spill]] %s5793_s26  ;;  %s5810_s12 = scalar_lea.vmem %s6450_s8, %s4869_s10 }
  0x3f   : > { %s4874_s26 = sshll.u32 %s5715_s30, 5  ;;  %s1194_s15 = scalar_lea.vmem %s6452_s0, %s5715_s30 }
  0x40   : > { %s5824_s16 = scalar_lea.vmem %s6453_s19, %s4874_s26  ;;  %s1197_s29 = scalar_lea.vmem %s6454_s11, %s5715_s30 }
  0x41   : > { %s6455_s8 = sld [smem:[#allocation34_spill]]  ;;  %s1206_s0 = sadd.s32 %s5519_s27, %s6457_s20 }
  0x42   : > { %p1207_p7 = scmp.lt.s32.totalorder %s1206_s0, 3  ;;  %s6459_s21 = sld [smem:[#allocation37_spill]] }
  0x43   : > { %s5838_s14 = scalar_lea.vmem %s6456_s23, %s5718_s2  ;;  %p4728_p8 = scmp.ne.s32.totalorder %s5519_s27, 0 }
  0x44   : > { %s6501_s0 = smov (!%p1207_p7, %s1206_s0), 3  ;;  %s6460_s3 = sld [smem:[#allocation11_spill]] (!%p4728_p8)  ;;  %vm1229_vm0 = vcmask (!%p4728_p8), 261120  }
  0x45   : > { %s4875_s25 = sshll.u32 %s6501_s0, 5  ;;  %1227 = sbr.rel (%p4728_p8) target bundleno = 77 (0x4d), region = 120 }
  0x46   : > { %s5846_s6 = scalar_lea.vmem %s6458_s28, %s4875_s25 }
  0x47   : > { %s1200_s17 = scalar_lea.vmem %s6455_s8, %s5715_s30 }
  0x48   : > { %s5851_s10 = scalar_lea.vmem %s6459_s21, %s4875_s25 }
  0x4a   : > { %s6461_s5 = scalar_lea.vmem (!%p4728_p8), %s6460_s3, %s5718_s2 }
  0x4b   : > { %v1228_v0 = vld [vmem:[%s6461_s5] sm:$0xff] (!%p4728_p8) }
  0x4c   : > { %1230 = vst.msk [vmem:[%s5838_s14] sm:$0xff] %vm1229_vm0, %v1228_v0 }
  0x4d PF: > { %v5405_v1 = vld [vmem:[%s5742_s1] sm:$0xff]   ;;  %v5537_v2 = vmov 0.0   ;;  %v5406_v3 = vld [vmem:[%s5742_s1 + $0x10] sm:$0xff]   ;;  %v5407_v4 = vld [vmem:[%s5742_s1 + $0x8] sm:$0xff]   ;;  %vm5538_vm1 = vmmov 0   ;;  %vm1382_vm2 = vcmask 261120  }
  0x4e   : > { %5005 = vmatprep.subr.bf16.mxu0 %v5537_v2  ;;  %5013 = vmatprep.subr.bf16.mxu1 %v5537_v2  ;;  %v5408_v5 = vld [vmem:[%s5742_s1 + $0x18] sm:$0xff]   ;;  %v5409_v8 = vld [vmem:[%s5742_s1 + $0x20] sm:$0xff]   ;;  %v5410_v9 = vld [vmem:[%s5742_s1 + $0x30] sm:$0xff]   ;;  %s6462_s27 = sld [smem:[#allocation9_spill]]  ;;  %vm2010_vm3 = vcmask 64512   ;;  %vm2254_vm4 = vcmask 1043456  }
  0x4f   : > { %5006 = vmatpush3.bf16.msra.mxu0 %v5405_v1  ;;  %5009 = vmatprep.mubr.msk.bf16.mxu0 %vm5538_vm1, %v5537_v2  ;;  %v5411_v10 = vld [vmem:[%s5742_s1 + $0x28] sm:$0xff]   ;;  %v5412_v11 = vld [vmem:[%s5742_s1 + $0x38] sm:$0xff]   ;;  %v5413_v12 = vld [vmem:[%s5742_s1 + $0x40] sm:$0xff]   ;;  %s6463_s23 = sld [smem:[#allocation13_spill]]  ;;  %s6465_s0 = sld [smem:[#allocation8_spill]]  ;;  %vm4233_vm5 = vcmask 523264  }
  0x50   : > { %5014 = vmatpush3.bf16.msra.mxu1 %v5406_v3  ;;  %5007 = vmatprep.subr.bf16.mxu0 %v5537_v2  ;;  %v5414_v13 = vld [vmem:[%s5742_s1 + $0x50] sm:$0xff]   ;;  %v5415_v14 = vld [vmem:[%s5742_s1 + $0x48] sm:$0xff]   ;;  %v5416_v15 = vld [vmem:[%s5742_s1 + $0x58] sm:$0xff]   ;;  %s6466_s19 = sld [smem:[#allocation18_spill]]  ;;  %s6468_s18 = sld [smem:[#allocation19_spill]] }
  0x51   : > { %5015 = vmatprep.subr.bf16.mxu1 %v5537_v2  ;;  %5017 = vmatprep.mubr.msk.bf16.mxu1 %vm5538_vm1, %v5537_v2  ;;  %v5417_v16 = vld [vmem:[%s5742_s1 + $0x60] sm:$0xff]   ;;  %v5418_v17 = vld [vmem:[%s5742_s1 + $0x70] sm:$0xff]   ;;  %v5419_v18 = vld [vmem:[%s5742_s1 + $0x68] sm:$0xff]   ;;  %s6470_s3 = sld [smem:[#allocation20_spill]]  ;;  %s6478_s25 = sld [smem:[#allocation26_spill]] }
  0x52   : > { %v5420_v19 = vld [vmem:[%s5742_s1 + $0x78] sm:$0xff]   ;;  %v5421_v20 = vld [vmem:[%s5742_s1 + $0x80] sm:$0xff]   ;;  %v5422_v21 = vld [vmem:[%s5742_s1 + $0x90] sm:$0xff]  }
  0x53   : > { %v5873_v6 = vld [vmem:[%s5838_s14] sm:$0xff]  ;;  %5008 = vmatpush3.bf16.msra.mxu0 %v5407_v4  ;;  %v5423_v22 = vld [vmem:[%s5742_s1 + $0x88] sm:$0xff]   ;;  %v5424_v23 = vld [vmem:[%s5742_s1 + $0x98] sm:$0xff]  }
  0x54   : > { %v5877_v7 = vpack.c.bf16 %v5873_v6, %v5873_v6  ;;  %5016 = vmatpush3.bf16.msra.mxu1 %v5408_v5  ;;  %5021 = vmatprep.subr.bf16.mxu0 %v5537_v2  ;;  %v5425_v24 = vld [vmem:[%s5742_s1 + $0xa0] sm:$0xff]   ;;  %v5426_v25 = vld [vmem:[%s5742_s1 + $0xb0] sm:$0xff]   ;;  %v5427_v26 = vld [vmem:[%s5742_s1 + $0xa8] sm:$0xff]  }
  0x55   : > { %5029 = vmatprep.subr.bf16.mxu1 %v5537_v2  ;;  %v5428_v27 = vld [vmem:[%s5742_s1 + $0xb8] sm:$0xff]   ;;  %v4733_v44 = vld [vmem:[%s6462_s27 + $0x4] ss:$0 sm:$0xff]  ;;  %v4734_v45 = vld [vmem:[%s6462_s27 + $0x5] ss:$0 sm:$0xff]  ;;  %s6464_s20 = scalar_lea.vmem %s6463_s23, %s5718_s2  ;;  %s6472_s1 = sld [smem:[#allocation12_spill]] }
  0x56   : > { %5010 = vmatmul.mubr.msk.bf16.vlgmr.msra.gmra.mrb[0].mxu0 %vm1382_vm2, %v5877_v7  ;;  %v4729_v56 = vld [vmem:[%s6462_s27] ss:$0 sm:$0xff]  ;;  %v4730_v59 = vld [vmem:[%s6462_s27 + $0x1] ss:$0 sm:$0xff]  ;;  %v4735_v62 = vld [vmem:[%s6462_s27 + $0x6] ss:$0 sm:$0xff]  ;;  %s6467_s28 = scalar_lea.vmem %s6466_s19, %s5715_s30  ;;  %s6469_s21 = scalar_lea.vmem %s6468_s18, %s5715_s30 }
  0x57   : > { %5018 = vmatmul.mubr.msk.bf16.vlgmr.msra.gmra.mrb[0].mxu1 %vm1382_vm2, %v5877_v7  ;;  %5022 = vmatpush3.bf16.msra.mxu0 %v5409_v8  ;;  %v4736_v0 = vld [vmem:[%s6462_s27 + $0x7] ss:$0 sm:$0xff]  ;;  %s6471_s5 = scalar_lea.vmem %s6470_s3, %s5715_s30  ;;  %s6475_s23 = sld [smem:[#allocation14_spill]] }
  0x58   : > { %5030 = vmatpush3.bf16.msra.mxu1 %v5410_v9  ;;  %5023 = vmatprep.subr.bf16.mxu0 %v5537_v2  ;;  %s6479_s26 = scalar_lea.vmem %s6478_s25, %s5715_s30 }
  0x59   : > { %5031 = vmatprep.subr.bf16.mxu1 %v5537_v2  ;;  %5025 = vmatprep.mubr.msk.bf16.mxu0 %vm5538_vm1, %v5537_v2 }
  0x5a   : > { %5033 = vmatprep.mubr.msk.bf16.mxu1 %vm5538_vm1, %v5537_v2 }
  0x5b   : > { %5024 = vmatpush3.bf16.msra.mxu0 %v5411_v10  ;;  %s6473_s13 = scalar_lea.vmem %s6472_s1, %s5718_s2  ;;  %s6474_s2 = sld [smem:[#allocation7_spill]] }
  0x5c   : > { %5032 = vmatpush3.bf16.msra.mxu1 %v5412_v11  ;;  %5037 = vmatprep.subr.bf16.mxu0 %v5537_v2 }
  0x5d   : > { %5045 = vmatprep.subr.bf16.mxu1 %v5537_v2 }
  0x5e   : > { %5026 = vmatmul.mubr.msk.bf16.vlgmr.msra.gmra.mrb[4].mxu0 %vm1382_vm2, %v5877_v7 }
  0x5f   : > { %5034 = vmatmul.mubr.msk.bf16.vlgmr.msra.gmra.mrb[4].mxu1 %vm1382_vm2, %v5877_v7  ;;  %5038 = vmatpush3.bf16.msra.mxu0 %v5413_v12 }
  0x60   : > { %5046 = vmatpush3.bf16.msra.mxu1 %v5414_v13  ;;  %5039 = vmatprep.subr.bf16.mxu0 %v5537_v2 }
  0x61   : > { %5047 = vmatprep.subr.bf16.mxu1 %v5537_v2  ;;  %5041 = vmatprep.mubr.msk.bf16.mxu0 %vm5538_vm1, %v5537_v2 }
  0x62   : > { %5049 = vmatprep.mubr.msk.bf16.mxu1 %vm5538_vm1, %v5537_v2 }
  0x63   : > { %5040 = vmatpush3.bf16.msra.mxu0 %v5415_v14 }
  0x64   : > { %5048 = vmatpush3.bf16.msra.mxu1 %v5416_v15  ;;  %5053 = vmatprep.subr.bf16.mxu0 %v5537_v2 }
  0x65   : > { %5061 = vmatprep.subr.bf16.mxu1 %v5537_v2 }
  0x66   : > { %5042 = vmatmul.mubr.msk.bf16.vlgmr.msra.gmra.mrb[8].mxu0 %vm1382_vm2, %v5877_v7 }
  0x67   : > { %5050 = vmatmul.mubr.msk.bf16.vlgmr.msra.gmra.mrb[8].mxu1 %vm1382_vm2, %v5877_v7  ;;  %5054 = vmatpush3.bf16.msra.mxu0 %v5417_v16  ;;  %v4731_v16 = vld [vmem:[%s6462_s27 + $0x2] ss:$0 sm:$0xff] }
  0x68   : > { %5062 = vmatpush3.bf16.msra.mxu1 %v5418_v17  ;;  %5055 = vmatprep.subr.bf16.mxu0 %v5537_v2 }
  0x69   : > { %5063 = vmatprep.subr.bf16.mxu1 %v5537_v2  ;;  %5057 = vmatprep.mubr.msk.bf16.mxu0 %vm5538_vm1, %v5537_v2 }
  0x6a   : > { %5065 = vmatprep.mubr.msk.bf16.mxu1 %vm5538_vm1, %v5537_v2 }
  0x6b   : > { %5056 = vmatpush3.bf16.msra.mxu0 %v5419_v18 }
  0x6c   : > { %5064 = vmatpush3.bf16.msra.mxu1 %v5420_v19  ;;  %5069 = vmatprep.subr.bf16.mxu0 %v5537_v2  ;;  %v4732_v19 = vld [vmem:[%s6462_s27 + $0x3] ss:$0 sm:$0xff] }
  0x6d   : > { %5077 = vmatprep.subr.bf16.mxu1 %v5537_v2 }
  0x6e   : > { %5058 = vmatmul.mubr.msk.bf16.vlgmr.msra.gmra.mrb[12].mxu0 %vm1382_vm2, %v5877_v7 }
  0x6f   : > { %5066 = vmatmul.mubr.msk.bf16.vlgmr.msra.gmra.mrb[12].mxu1 %vm1382_vm2, %v5877_v7  ;;  %5070 = vmatpush3.bf16.msra.mxu0 %v5421_v20 }
  0x70   : > { %5071 = vmatprep.subr.bf16.mxu0 %v5537_v2  ;;  %5073 = vmatprep.mubr.msk.bf16.mxu0 %vm5538_vm1, %v5537_v2 }
  0x71   : > { %5081 = vmatprep.mubr.msk.bf16.mxu1 %vm5538_vm1, %v5537_v2  ;;  %5078 = vmatpush3.bf16.msra.mxu1 %v5422_v21 }
  0x72   : > { %5079 = vmatprep.subr.bf16.mxu1 %v5537_v2 }
  0x73   : > { %5072 = vmatpush3.bf16.msra.mxu0 %v5423_v22 }
  0x74   : > { %5085 = vmatprep.subr.bf16.mxu0 %v5537_v2 }
  0x75   : > { %5080 = vmatpush3.bf16.msra.mxu1 %v5424_v23 }
  0x76   : > { %5074 = vmatmul.mubr.msk.bf16.vlgmr.msra.gmra.mrb[16].mxu0 %vm1382_vm2, %v5877_v7  ;;  %5093 = vmatprep.subr.bf16.mxu1 %v5537_v2 }
  0x77   : > { %5089 = vmatprep.mubr.msk.bf16.mxu0 %vm5538_vm1, %v5537_v2  ;;  %5086 = vmatpush3.bf16.msra.mxu0 %v5425_v24 }
  0x78   : > { %5082 = vmatmul.mubr.msk.bf16.vlgmr.msra.gmra.mrb[16].mxu1 %vm1382_vm2, %v5877_v7  ;;  %5087 = vmatprep.subr.bf16.mxu0 %v5537_v2 }
  0x79   : > { %5094 = vmatpush3.bf16.msra.mxu1 %v5426_v25  ;;  %5097 = vmatprep.mubr.msk.bf16.mxu1 %vm5538_vm1, %v5537_v2 }
  0x7a   : > { %5095 = vmatprep.subr.bf16.mxu1 %v5537_v2 }
  0x7b   : > { %5088 = vmatpush3.bf16.msra.mxu0 %v5427_v26  ;;  %v4737_v26 = vld [vmem:[%s6462_s27 + $0x8] ss:$0 sm:$0xff] }
  0x7c   : > { %5101 = vmatprep.subr.bf16.mxu0 %v5537_v2 }
  0x7d   : > { %5096 = vmatpush3.bf16.msra.mxu1 %v5428_v27 }
  0x7e   : > { %5107 = vmatprep.subr.bf16.mxu1 %v5537_v2  ;;  %5090 = vmatmul.mubr.msk.bf16.vlgmr.msra.gmra.mrb[20].mxu0 %vm1382_vm2, %v5877_v7 }
  0x7f   : > { %5103 = vmatprep.mubr.msk.bf16.mxu0 %vm5538_vm1, %v5537_v2 }
  0x80   : > { %5098 = vmatmul.mubr.msk.bf16.vlgmr.msra.gmra.mrb[20].mxu1 %vm1382_vm2, %v5877_v7 }
  0x81   : > { %5109 = vmatprep.mubr.msk.bf16.mxu1 %vm5538_vm1, %v5537_v2 }
 0x129   : > { %v1420_v28 = vpop.f32.mrb[0].mxu0 }
 0x12a   : > { %v5011_v29 = vpop.f32.mrb[1].mxu0  ;;  %v1472_v30 = vpop.f32.mrb[0].mxu1  ;;  %v1421_v63 = vadd.f32 %v4729_v56, %v1420_v28  ;;  %v4738_v28 = vld [vmem:[%s6462_s27 + $0x9] ss:$0 sm:$0xff] }
 0x12b   : > { %v1423_v31 = vpop.f32.mrb[2].mxu0  ;;  %v5019_v32 = vpop.f32.mrb[1].mxu1  ;;  %v1473_v1 = vadd.f32 %v4730_v59, %v1472_v30 }
 0x12c   : > { %v5012_v33 = vpop.f32.mrb[3].mxu0  ;;  %v1475_v34 = vpop.f32.mrb[2].mxu1  ;;  %v1998_v11 = vpack.c.bf16 %v1421_v63, %v1421_v63 }
 0x12d   : > { %v5020_v35 = vpop.f32.mrb[3].mxu1  ;;  %v1999_v15 = vpack.c.bf16 %v1473_v1, %v1473_v1 }
 0x131   : > { %v1524_v36 = vpop.f32.mrb[4].mxu0 }
 0x132   : > { %v5027_v37 = vpop.f32.mrb[5].mxu0  ;;  %v1576_v38 = vpop.f32.mrb[4].mxu1  ;;  %v1525_v22 = vadd.f32 %v4731_v16, %v1524_v36 }
 0x133   : > { %v1527_v39 = vpop.f32.mrb[6].mxu0  ;;  %v5035_v40 = vpop.f32.mrb[5].mxu1  ;;  %v1577_v23 = vadd.f32 %v4732_v19, %v1576_v38 }
 0x134   : > { %v5028_v41 = vpop.f32.mrb[7].mxu0  ;;  %v1579_v42 = vpop.f32.mrb[6].mxu1  ;;  %v2000_v24 = vpack.c.bf16 %v1525_v22, %v1525_v22 }
 0x135   : > { %v5036_v43 = vpop.f32.mrb[7].mxu1  ;;  %v2001_v25 = vpack.c.bf16 %v1577_v23, %v1577_v23 }
 0x139   : > { %v1628_v46 = vpop.f32.mrb[8].mxu0 }
 0x13a   : > { %v1629_v47 = vadd.f32 %v4733_v44, %v1628_v46  ;;  %v1680_v48 = vpop.f32.mrb[8].mxu1  ;;  %v5043_v49 = vpop.f32.mrb[9].mxu0 }
 0x13b   : > { %v1681_v50 = vadd.f32 %v4734_v45, %v1680_v48  ;;  %v1631_v51 = vpop.f32.mrb[10].mxu0  ;;  %v5051_v52 = vpop.f32.mrb[9].mxu1 }
 0x13c   : > { %v2002_v53 = vpack.c.bf16 %v1629_v47, %v1629_v47  ;;  %v5044_v54 = vpop.f32.mrb[11].mxu0  ;;  %v1683_v55 = vpop.f32.mrb[10].mxu1 }
 0x13d   : > { %v2003_v57 = vpack.c.bf16 %v1681_v50, %v1681_v50  ;;  %v5052_v58 = vpop.f32.mrb[11].mxu1  ;;  %v1233_v50 = vld [vmem:[%s6464_s20] sm:$0xff]  ;;  %s6476_s20 = scalar_lea.vmem %s6475_s23, %s6474_s2 }
 0x13e   : > { %v2015_v60 = vsel %vm2010_vm3, %v2002_v53, 0  ;;  %v1234_v51 = vmul.f32 -1e+09, %v1233_v50 }
 0x13f   : > { %v2061_v61 = vsel %vm2010_vm3, %v2003_v57, 0  ;;  %5102 = vmatpush3.bf16.xpose.msra.mxu0 %v2015_v60 }
 0x140   : > { %5108 = vmatpush3.bf16.xpose.msra.mxu1 %v2061_v61  ;;  %5113 = vmatprep.subr.bf16.mxu0 %v5537_v2 }
 0x141   : > { %v1732_v3 = vpop.f32.mrb[12].mxu0  ;;  %5119 = vmatprep.subr.bf16.mxu1 %v5537_v2 }
 0x142   : > { %v1733_v4 = vadd.f32 %v4735_v62, %v1732_v3  ;;  %v1784_v5 = vpop.f32.mrb[12].mxu1  ;;  %v5059_v7 = vpop.f32.mrb[13].mxu0 }
 0x143   : > { %v1785_v8 = vadd.f32 %v4736_v0, %v1784_v5  ;;  %v1735_v9 = vpop.f32.mrb[14].mxu0  ;;  %v5067_v10 = vpop.f32.mrb[13].mxu1 }
 0x144   : > { %v2004_v12 = vpack.c.bf16 %v1733_v4, %v1733_v4  ;;  %v5060_v13 = vpop.f32.mrb[15].mxu0  ;;  %v1787_v14 = vpop.f32.mrb[14].mxu1 }
 0x145   : > { %v2005_v17 = vpack.c.bf16 %v1785_v8, %v1785_v8  ;;  %v5068_v18 = vpop.f32.mrb[15].mxu1 }
 0x146   : > { %v2107_v20 = vsel %vm2010_vm3, %v2004_v12, 0  ;;  %5104 = vmatmul.mubr.msk.bf16.vlgmr.msra.gmra.mrb[24].mxu0 %vm2010_vm3, %v1998_v11 }
 0x147   : > { %v2153_v21 = vsel %vm2010_vm3, %v2005_v17, 0  ;;  %5110 = vmatmul.mubr.msk.bf16.vlgmr.msra.gmra.mrb[24].mxu1 %vm2010_vm3, %v1999_v15  ;;  %5114 = vmatpush3.bf16.xpose.msra.mxu0 %v2107_v20 }
 0x148   : > { %5120 = vmatpush3.bf16.xpose.msra.mxu1 %v2153_v21  ;;  %5115 = vmatprep.mubr.msk.bf16.mxu0 %vm5538_vm1, %v5537_v2 }
 0x149   : > { %5121 = vmatprep.mubr.msk.bf16.mxu1 %vm5538_vm1, %v5537_v2  ;;  %5125 = vmatprep.subr.bf16.mxu0 %v5537_v2  ;;  %v1836_v27 = vpop.f32.mrb[16].mxu0 }
 0x14a   : > { %5131 = vmatprep.subr.bf16.mxu1 %v5537_v2  ;;  %v1837_v29 = vadd.f32 %v4737_v26, %v1836_v27  ;;  %v5075_v30 = vpop.f32.mrb[17].mxu0 }
 0x14b   : > { %v1839_v31 = vpop.f32.mrb[18].mxu0  ;;  %v1888_v32 = vpop.f32.mrb[16].mxu1 }
 0x14c   : > { %v2006_v33 = vpack.c.bf16 %v1837_v29, %v1837_v29  ;;  %v5076_v34 = vpop.f32.mrb[19].mxu0  ;;  %v1889_v35 = vadd.f32 %v4738_v28, %v1888_v32  ;;  %v5083_v36 = vpop.f32.mrb[17].mxu1 }
 0x14d   : > { %v1891_v37 = vpop.f32.mrb[18].mxu1 }
 0x14e   : > { %5116 = vmatmul.mubr.msk.bf16.vlgmr.msra.gmra.mrb[28].mxu0 %vm2010_vm3, %v2000_v24  ;;  %v2256_v38 = vsel %vm2254_vm4, %v2006_v33, 0  ;;  %v2007_v39 = vpack.c.bf16 %v1889_v35, %v1889_v35  ;;  %v5084_v40 = vpop.f32.mrb[19].mxu1 }
 0x14f   : > { %5122 = vmatmul.mubr.msk.bf16.vlgmr.msra.gmra.mrb[28].mxu1 %vm2010_vm3, %v2001_v25  ;;  %5127 = vmatprep.mubr.msk.bf16.mxu0 %vm5538_vm1, %v5537_v2  ;;  %v4739_v40 = vld [vmem:[%s6462_s27 + $0xa] ss:$0 sm:$0xff] }
 0x150   : > { %5133 = vmatprep.mubr.msk.bf16.mxu1 %vm5538_vm1, %v5537_v2  ;;  %5126 = vmatpush3.bf16.msra.mxu0 %v2256_v38  ;;  %v2302_v41 = vsel %vm2254_vm4, %v2007_v39, 0 }
 0x151   : > { %5137 = vmatprep.subr.bf16.mxu0 %v5537_v2  ;;  %5132 = vmatpush3.bf16.msra.mxu1 %v2302_v41  ;;  %v6003_v42 = vpop.f32.mrb[20].mxu0 }
 0x152   : > { %5143 = vmatprep.subr.bf16.mxu1 %v5537_v2  ;;  %v5091_v44 = vpop.f32.mrb[21].mxu0  ;;  %v1941_v41 = vadd.f32 %v4739_v40, %v6003_v42 }
 0x153   : > { %v6005_v43 = vpop.f32.mrb[20].mxu1  ;;  %v1943_v46 = vpop.f32.mrb[22].mxu0 }
 0x154   : > { %v5099_v45 = vpop.f32.mrb[21].mxu1  ;;  %v5092_v48 = vpop.f32.mrb[23].mxu0 }
 0x155   : > { %v1995_v47 = vpop.f32.mrb[22].mxu1  ;;  %v4740_v45 = vld [vmem:[%s6462_s27 + $0xb] ss:$0 sm:$0xff] }
 0x156   : > { %v5100_v49 = vpop.f32.mrb[23].mxu1  ;;  %v2008_v47 = vpack.c.bf16 %v1941_v41, %v1941_v41  ;;  %v1993_v48 = vadd.f32 %v4740_v45, %v6005_v43 }
 0x158   : > { %v2009_v42 = vpack.c.bf16 %v1993_v48, %v1993_v48  ;;  %v4789_v48 = vld [vmem:[%s6467_s28] ss:$0 sm:$0xff]  ;;  %s6480_s28 = sld [smem:[#allocation27_spill]] }
 0x219   : > { %v2051_v52 = vpop.f32.mrb[24].mxu0 }
 0x21a   : > { %v2195_v53 = vmul.f32 0.35355338, %v2051_v52  ;;  %v2097_v54 = vpop.f32.mrb[24].mxu1  ;;  %v5105_v55 = vpop.f32.mrb[25].mxu0 }
 0x21b   : > { %v2196_v56 = vmul.f32 0.35355338, %v2097_v54  ;;  %v5111_v57 = vpop.f32.mrb[25].mxu1  ;;  %v2054_v58 = vpop.f32.mrb[26].mxu0 }
 0x21c   : > { %v2100_v59 = vpop.f32.mrb[26].mxu1  ;;  %v5106_v60 = vpop.f32.mrb[27].mxu0  ;;  %v2199_v61 = vadd.f32 %v2195_v53, %v1234_v51  ;;  %v2348_v53 = vsel %vm2254_vm4, %v2008_v47, 0  ;;  %v2394_v57 = vsel %vm2254_vm4, %v2009_v42, 0 }
 0x21d   : > { %v5112_v62 = vpop.f32.mrb[27].mxu1  ;;  %v2200_v0 = vadd.f32 %v2196_v56, %v1234_v51  ;;  %v2440_v56 = vld [vmem:[%s6465_s0] sm:$0xf] }
 0x21e   : > { %v2203_v63 = vsel %vm2010_vm3, %v2199_v61, -inf  ;;  %v2453_v60 = vsel %vm2254_vm4, %v2440_v56, 0 }
 0x21f   : > { %2204 = vmax.xlane.f32.xlu0 %v2203_v63  ;;  %v2206_v7 = vsel %vm2010_vm3, %v2200_v0, -inf }
 0x221   : > { %v2143_v1 = vpop.f32.mrb[28].mxu0 }
 0x222   : > { %v2197_v3 = vmul.f32 0.35355338, %v2143_v1  ;;  %v2189_v4 = vpop.f32.mrb[28].mxu1  ;;  %v5117_v5 = vpop.f32.mrb[29].mxu0 }
 0x223   : > { %v2198_v8 = vmul.f32 0.35355338, %v2189_v4  ;;  %v5123_v9 = vpop.f32.mrb[29].mxu1  ;;  %2207 = vmax.xlane.f32.xlu0 %v2206_v7  ;;  %v2146_v10 = vpop.f32.mrb[30].mxu0 }
 0x224   : > { %v2192_v11 = vpop.f32.mrb[30].mxu1  ;;  %v5118_v12 = vpop.f32.mrb[31].mxu0  ;;  %v2201_v13 = vadd.f32 %v2197_v3, %v1234_v51  ;;  %v2442_v3 = vld [vmem:[%s6465_s0 + $0x8] sm:$0xf]  ;;  %v2443_v10 = vld [vmem:[%s6465_s0 + $0xc] sm:$0xf] }
 0x225   : > { %v5124_v14 = vpop.f32.mrb[31].mxu1  ;;  %v2202_v16 = vadd.f32 %v2198_v8, %v1234_v51  ;;  %v2545_v8 = vsel %vm2254_vm4, %v2442_v3, 0 }
 0x226   : > { %v2209_v15 = vsel %vm2010_vm3, %v2201_v13, -inf }
 0x227   : > { %2210 = vmax.xlane.f32.xlu1 %v2209_v15  ;;  %v2212_v17 = vsel %vm2010_vm3, %v2202_v16, -inf  ;;  %v2591_v15 = vsel %vm2254_vm4, %v2443_v10, 0  ;;  %v5433_v10 = vld [vmem:[%s5771_s22 + $0x20] sm:$0xff]  }
 0x22b   : > { %2213 = vmax.xlane.f32.xlu1 %v2212_v17 }
 0x2ac   : > { %v2205_v18 = vpop.xlane.xlu0 %2204 }
 0x2ad   : > { %v2215_v19 = vsub.f32 %v2199_v61, %v2205_v18 }
 0x2af   : > { %v2219_v20 = vmul.f32 1.442695, %v2215_v19 }
 0x2b0   : > { %v2208_v21 = vpop.xlane.xlu0 %2207 }
 0x2b1   : > { %5459 = vpow2.f32 %v2219_v20  ;;  %v2216_v22 = vsub.f32 %v2200_v0, %v2208_v21  ;;  %v2441_v0 = vld [vmem:[%s6465_s0 + $0x4] sm:$0xf]  ;;  %s6477_s0 = sld [smem:[#allocation10_spill]] }
 0x2b2   : > { %v2499_v1 = vsel %vm2254_vm4, %v2441_v0, 0 }
 0x2b3   : > { %v2221_v23 = vmul.f32 1.442695, %v2216_v22 }
 0x2b4   : > { %v2211_v24 = vpop.xlane.xlu1 %2210 }
 0x2b5   : > { %5461 = vpow2.f32 %v2221_v23  ;;  %v2217_v25 = vsub.f32 %v2201_v13, %v2211_v24 }
 0x2b7   : > { %v2223_v26 = vmul.f32 1.442695, %v2217_v25 }
 0x2b8   : > { %v2214_v27 = vpop.xlane.xlu1 %2213 }
 0x2b9   : > { %5463 = vpow2.f32 %v2223_v26  ;;  %v2218_v28 = vsub.f32 %v2202_v16, %v2214_v27 }
 0x2bb   : > { %v5460_v29 = vpop.eup %5459  ;;  %v2225_v30 = vmul.f32 1.442695, %v2218_v28 }
 0x2bc   : > { %v2227_v31 = vsel %vm2010_vm3, %v5460_v29, 0.0 }
 0x2bd   : > { %5465 = vpow2.f32 %v2225_v30  ;;  %2228 = vadd.xlane.f32.xlu0 %v2227_v31 }
 0x2bf   : > { %v5462_v32 = vpop.eup %5461 }
 0x2c0   : > { %v2230_v33 = vsel %vm2010_vm3, %v5462_v32, 0.0 }
 0x2c1   : > { %2231 = vadd.xlane.f32.xlu1 %v2230_v33 }
 0x2c3   : > { %v5464_v34 = vpop.eup %5463 }
 0x2c4   : > { %v2233_v35 = vsel %vm2010_vm3, %v5464_v34, 0.0 }
 0x2c5   : > { %2234 = vadd.xlane.f32.xlu0 %v2233_v35 }
 0x2c7   : > { %v5466_v36 = vpop.eup %5465 }
 0x2c8   : > { %v2236_v37 = vsel %vm2010_vm3, %v5466_v36, 0.0 }
 0x2c9   : > { %2237 = vadd.xlane.f32.xlu1 %v2236_v37 }
 0x34a   : > { %v2229_v38 = vpop.xlane.xlu0 %2228 }
 0x34b   : > { %5467 = vrcp.f32 %v2229_v38 }
 0x34e   : > { %v2232_v39 = vpop.xlane.xlu1 %2231 }
 0x34f   : > { %5469 = vrcp.f32 %v2232_v39 }
 0x352   : > { %v2235_v44 = vpop.xlane.xlu0 %2234 }
 0x353   : > { %5471 = vrcp.f32 %v2235_v44 }
 0x355   : > { %v5468_v46 = vpop.eup %5467 }
 0x356   : > { %v2240_v49 = vmul.f32 %v5468_v46, %v5460_v29  ;;  %v2238_v50 = vpop.xlane.xlu1 %2237 }
 0x357   : > { %5473 = vrcp.f32 %v2238_v50 }
 0x358   : > { %2436 = vst.msk [vmem:[%s5846_s6] sm:$0xff] %vm2010_vm3, %v2240_v49  ;;  %v2247_v51 = vpack.c.bf16 %v2240_v49, %v2240_v49 }
 0x359   : > { %v5470_v52 = vpop.eup %5469 }
 0x35a   : > { %v2242_v54 = vmul.f32 %v5470_v52, %v5462_v32  ;;  %5128 = vmatmul.mubr.msk.bf16.vlgmr.msra.gmra.mrb[32].mxu0 %vm2010_vm3, %v2247_v51 }
 0x35b   : > { %5138 = vmatpush3.bf16.msra.mxu0 %v2348_v53  ;;  %5139 = vmatprep.mubr.msk.bf16.mxu0 %vm5538_vm1, %v5537_v2 }
 0x35c   : > { %2437 = vst.msk [vmem:[%s5846_s6 + $0x8] sm:$0xff] %vm2010_vm3, %v2242_v54  ;;  %v2248_v43 = vpack.c.bf16 %v2242_v54, %v2242_v54  ;;  %5149 = vmatprep.subr.bf16.mxu0 %v5537_v2 }
 0x35d   : > { %v5472_v55 = vpop.eup %5471 }
 0x35e   : > { %v2244_v58 = vmul.f32 %v5472_v55, %v5464_v34  ;;  %5134 = vmatmul.mubr.msk.bf16.vlgmr.msra.gmra.mrb[32].mxu1 %vm2010_vm3, %v2248_v43 }
 0x35f   : > { %5144 = vmatpush3.bf16.msra.mxu1 %v2394_v57  ;;  %5145 = vmatprep.mubr.msk.bf16.mxu1 %vm5538_vm1, %v5537_v2 }
 0x360   : > { %2438 = vst.msk [vmem:[%s5846_s6 + $0x10] sm:$0xff] %vm2010_vm3, %v2244_v58  ;;  %v2249_v59 = vpack.c.bf16 %v2244_v58, %v2244_v58  ;;  %5155 = vmatprep.subr.bf16.mxu1 %v5537_v2 }
 0x361   : > { %v5474_v61 = vpop.eup %5473 }
 0x362   : > { %v2246_v62 = vmul.f32 %v5474_v61, %v5466_v36  ;;  %5140 = vmatmul.mubr.msk.bf16.vlgmr.msra.gmra.mrb[36].mxu0 %vm2010_vm3, %v2249_v59  ;;  %v5430_v61 = vld [vmem:[%s5771_s22 + $0x10] sm:$0xff]  }
 0x363   : > { %5150 = vmatpush3.bf16.msra.mxu0 %v2453_v60  ;;  %5151 = vmatprep.mubr.msk.bf16.mxu0 %vm5538_vm1, %v5537_v2  ;;  %v5429_v60 = vld [vmem:[%s5771_s22] sm:$0xff]  }
 0x364   : > { %2439 = vst.msk [vmem:[%s5846_s6 + $0x18] sm:$0xff] %vm2010_vm3, %v2246_v62  ;;  %v2250_v63 = vpack.c.bf16 %v2246_v62, %v2246_v62  ;;  %5161 = vmatprep.subr.bf16.mxu0 %v5537_v2  ;;  %v5431_v62 = vld [vmem:[%s5771_s22 + $0x8] sm:$0xff]   ;;  %s6481_s6 = scalar_lea.vmem %s6480_s28, %s5715_s30 }
 0x366   : > { %5146 = vmatmul.mubr.msk.bf16.vlgmr.msra.gmra.mrb[36].mxu1 %vm2010_vm3, %v2250_v63  ;;  %v5432_v63 = vld [vmem:[%s5771_s22 + $0x18] sm:$0xff]  }
 0x367   : > { %5157 = vmatprep.mubr.msk.bf16.mxu1 %vm5538_vm1, %v5537_v2  ;;  %5156 = vmatpush3.bf16.msra.mxu1 %v2499_v1 }
 0x368   : > { %5167 = vmatprep.subr.bf16.mxu1 %v5537_v2 }
 0x42d   : > { %v2292_v4 = vpop.f32.mrb[32].mxu0 }
 0x42e   : > { %v2445_v5 = vpack.c.bf16 %v2292_v4, %v2292_v4  ;;  %v5129_v7 = vpop.f32.mrb[33].mxu0  ;;  %v4790_v4 = vld [vmem:[%s6469_s21] ss:$0 sm:$0xff]  ;;  %s6482_s21 = sld [smem:[#allocation28_spill]] }
 0x42f   : > { %v2295_v9 = vpop.f32.mrb[34].mxu0  ;;  %v4791_v7 = vld [vmem:[%s6471_s5] ss:$0 sm:$0xff]  ;;  %s6484_s5 = sld [smem:[#allocation30_spill]] }
 0x430   : > { %v5130_v11 = vpop.f32.mrb[35].mxu0  ;;  %5152 = vmatmul.mubr.msk.bf16.vlgmr.msra.gmra.mrb[40].mxu0 %vm2010_vm3, %v2445_v5 }
 0x431   : > { %v2338_v12 = vpop.f32.mrb[32].mxu1  ;;  %5162 = vmatpush3.bf16.msra.mxu0 %v2545_v8  ;;  %5163 = vmatprep.mubr.msk.bf16.mxu0 %vm5538_vm1, %v5537_v2  ;;  %v5434_v11 = vld [vmem:[%s5771_s22 + $0x30] sm:$0xff]  }
 0x432   : > { %v2446_v13 = vpack.c.bf16 %v2338_v12, %v2338_v12  ;;  %v5135_v14 = vpop.f32.mrb[33].mxu1  ;;  %5173 = vmatprep.subr.bf16.mxu0 %v5537_v2 }
 0x433   : > { %v2341_v16 = vpop.f32.mrb[34].mxu1  ;;  %v5436_v14 = vld [vmem:[%s5771_s22 + $0x38] sm:$0xff]  }
 0x434   : > { %v5136_v17 = vpop.f32.mrb[35].mxu1  ;;  %5158 = vmatmul.mubr.msk.bf16.vlgmr.msra.gmra.mrb[40].mxu1 %vm2010_vm3, %v2446_v13  ;;  %v5435_v13 = vld [vmem:[%s5771_s22 + $0x28] sm:$0xff]   ;;  %v5438_v16 = vld [vmem:[%s5783_s4 + $0x10] sm:$0xff]   ;;  %s6483_s9 = scalar_lea.vmem %s6482_s21, %s5715_s30 }
 0x435   : > { %v2384_v18 = vpop.f32.mrb[36].mxu0  ;;  %5168 = vmatpush3.bf16.msra.mxu1 %v2591_v15  ;;  %5169 = vmatprep.mubr.msk.bf16.mxu1 %vm5538_vm1, %v5537_v2  ;;  %v5437_v15 = vld [vmem:[%s5783_s4] sm:$0xff]   ;;  %v5439_v17 = vld [vmem:[%s5783_s4 + $0x8] sm:$0xff]   ;;  %s6485_s22 = scalar_lea.vmem %s6484_s5, %s5715_s30 }
 0x436   : > { %v2447_v19 = vpack.c.bf16 %v2384_v18, %v2384_v18  ;;  %v5141_v20 = vpop.f32.mrb[37].mxu0  ;;  %5181 = vmatprep.subr.bf16.mxu1 %v5537_v2  ;;  %v5440_v18 = vld [vmem:[%s5783_s4 + $0x18] sm:$0xff]  }
 0x437   : > { %v2387_v21 = vpop.f32.mrb[38].mxu0 }
 0x438   : > { %v5142_v22 = vpop.f32.mrb[39].mxu0  ;;  %5164 = vmatmul.mubr.msk.bf16.vlgmr.msra.gmra.mrb[44].mxu0 %vm2010_vm3, %v2447_v19  ;;  %v1232_v19 = vld [vmem:[%s6473_s13] sm:$0xff] }
 0x439   : > { %v2430_v23 = vpop.f32.mrb[36].mxu1  ;;  %5177 = vmatprep.mubr.msk.bf16.mxu0 %vm5538_vm1, %v5537_v2  ;;  %5174 = vmatpush3.bf16.msra.mxu0 %v5429_v60  ;;  %v2938_v20 = vpack.c.bf16 %v1232_v19, %v1232_v19  ;;  %v5441_v21 = vld [vmem:[%s5783_s4 + $0x20] sm:$0xff]   ;;  %v5442_v22 = vld [vmem:[%s5783_s4 + $0x30] sm:$0xff]  }
 0x43a   : > { %v2448_v24 = vpack.c.bf16 %v2430_v23, %v2430_v23  ;;  %v5147_v25 = vpop.f32.mrb[37].mxu1  ;;  %5175 = vmatprep.subr.bf16.mxu0 %v5537_v2  ;;  %v5443_v23 = vld [vmem:[%s5783_s4 + $0x28] sm:$0xff]  }
 0x43b   : > { %v2433_v26 = vpop.f32.mrb[38].mxu1  ;;  %v5445_v25 = vld [vmem:[%s5783_s4 + $0x40] sm:$0xff]  }
 0x43c   : > { %v5148_v27 = vpop.f32.mrb[39].mxu1  ;;  %5170 = vmatmul.mubr.msk.bf16.vlgmr.msra.gmra.mrb[44].mxu1 %vm2010_vm3, %v2448_v24  ;;  %v5444_v24 = vld [vmem:[%s5783_s4 + $0x38] sm:$0xff]   ;;  %v5446_v26 = vld [vmem:[%s5783_s4 + $0x50] sm:$0xff]  }
 0x43d   : > { %5185 = vmatprep.mubr.msk.bf16.mxu1 %vm5538_vm1, %v5537_v2  ;;  %5182 = vmatpush3.bf16.msra.mxu1 %v5430_v61  ;;  %v5447_v27 = vld [vmem:[%s5783_s4 + $0x48] sm:$0xff]  }
 0x43e   : > { %5183 = vmatprep.subr.bf16.mxu1 %v5537_v2  ;;  %5176 = vmatpush3.bf16.msra.mxu0 %v5431_v62 }
 0x43f   : > { %5189 = vmatprep.subr.bf16.mxu0 %v5537_v2 }
 0x441   : > { %5184 = vmatpush3.bf16.msra.mxu1 %v5432_v63  ;;  %v4792_v63 = vld [vmem:[%s5776_s24] ss:$0 sm:$0xff] }
 0x442   : > { %5197 = vmatprep.subr.bf16.mxu1 %v5537_v2 }
 0x503   : > { %v2489_v28 = vpop.f32.mrb[40].mxu0 }
 0x504   : > { %v5153_v29 = vpop.f32.mrb[41].mxu0  ;;  %v2633_v33 = vsel %vm1382_vm2, %v2489_v28, 0.0  ;;  %v5448_v28 = vld [vmem:[%s5783_s4 + $0x58] sm:$0xff]  }
 0x505   : > { %v2492_v30 = vpop.f32.mrb[42].mxu0  ;;  %v5449_v29 = vld [vmem:[%s5783_s4 + $0x60] sm:$0xff]  }
 0x506   : > { %v5154_v31 = vpop.f32.mrb[43].mxu0  ;;  %v5450_v30 = vld [vmem:[%s5783_s4 + $0x70] sm:$0xff]  }
 0x507   : > { %v2535_v32 = vpop.f32.mrb[40].mxu1  ;;  %v5451_v31 = vld [vmem:[%s5783_s4 + $0x68] sm:$0xff]  }
 0x508   : > { %v2634_v34 = vsel %vm1382_vm2, %v2535_v32, 0.0  ;;  %v5159_v35 = vpop.f32.mrb[41].mxu1  ;;  %v5452_v32 = vld [vmem:[%s5783_s4 + $0x78] sm:$0xff]  }
 0x509   : > { %v2635_v36 = vadd.f32 %v2634_v34, %v2633_v33  ;;  %v2538_v37 = vpop.f32.mrb[42].mxu1 }
 0x50a   : > { %v5160_v38 = vpop.f32.mrb[43].mxu1 }
 0x50b   : > { %v2581_v39 = vpop.f32.mrb[44].mxu0 }
 0x50c   : > { %v2636_v40 = vsel %vm1382_vm2, %v2581_v39, 0.0  ;;  %v5165_v41 = vpop.f32.mrb[45].mxu0 }
 0x50d   : > { %v2637_v44 = vadd.f32 %v2636_v40, %v2635_v36  ;;  %v2584_v45 = vpop.f32.mrb[46].mxu0 }
 0x50e   : > { %v5166_v46 = vpop.f32.mrb[47].mxu0 }
 0x50f   : > { %v2627_v47 = vpop.f32.mrb[44].mxu1 }
 0x510   : > { %v2638_v49 = vsel %vm1382_vm2, %v2627_v47, 0.0  ;;  %v5171_v50 = vpop.f32.mrb[45].mxu1 }
 0x511   : > { %v2639_v51 = vadd.f32 %v2638_v49, %v2637_v44  ;;  %v2630_v52 = vpop.f32.mrb[46].mxu1 }
 0x512   : > { %v5172_v53 = vpop.f32.mrb[47].mxu1  ;;  %v4809_v52 = vld [vmem:[%s5788_s7 + $0x1] ss:$0 sm:$0xff] }
 0x513   : > { %v2646_v42 = vadd.f32 %v4789_v48, %v2639_v51  ;;  %v4808_v51 = vld [vmem:[%s5788_s7] ss:$0 sm:$0xff] }
 0x515   : > { %v2647_v54 = vadd.f32 %v2646_v42, %v5873_v6 }
 0x517   : > { %v2650_v43 = vsel %vm1382_vm2, %v2647_v54, 0.0 }
 0x518   : > { %2651 = vadd.xlane.f32.xlu0 %v2650_v43 }
 0x5a5   : > { %v2652_v55 = vpop.xlane.xlu0 %2651 }
 0x5a6   : > { %v2654_v56 = vmul.f32 0.03125, %v2652_v55 }
 0x5a8   : > { %v2655_v57 = vsub.f32 %v2647_v54, %v2654_v56 }
 0x5aa   : > { %v2656_v58 = vmul.f32 %v2655_v57, %v2655_v57 }
 0x5ac   : > { %v2657_v59 = vsel %vm1382_vm2, %v2656_v58, 0.0 }
 0x5ad   : > { %2658 = vadd.xlane.f32.xlu1 %v2657_v59 }
 0x63a   : > { %v2659_v6 = vpop.xlane.xlu1 %2658 }
 0x63b   : > { %v2660_v0 = vmul.f32 0.03125, %v2659_v6  ;;  %v4793_v6 = vld [vmem:[%s5776_s24 + $0x1] ss:$0 sm:$0xff] }
 0x63d   : > { %v2661_v1 = vadd.f32 1e-05, %v2660_v0 }
 0x63f   : > { %5475 = vrsqrt.f32 %v2661_v1 }
 0x649   : > { %v5476_v3 = vpop.eup %5475 }
 0x64a   : > { %v2663_v5 = vmul.f32 %v5476_v3, %v2655_v57  ;;  %v4810_v3 = vld [vmem:[%s5788_s7 + $0x2] ss:$0 sm:$0xff] }
 0x64c   : > { %v2670_v8 = vmul.f32 %v4790_v4, %v2663_v5  ;;  %v4811_v4 = vld [vmem:[%s5788_s7 + $0x3] ss:$0 sm:$0xff] }
 0x64e   : > { %v6102_v9 = vadd.f32 %v4791_v7, %v2670_v8 }
 0x650   : > { %v2678_v12 = vpack.c.bf16 %v6102_v9, %v6102_v9 }
 0x652   : > { %5178 = vmatmul.mubr.msk.bf16.vlgmr.msra.gmra.mrb[48].mxu0 %vm1382_vm2, %v2678_v12  ;;  %5186 = vmatmul.mubr.msk.bf16.vlgmr.msra.gmra.mrb[48].mxu1 %vm1382_vm2, %v2678_v12 }
 0x653   : > { %5190 = vmatpush3.bf16.msra.mxu0 %v5433_v10  ;;  %5198 = vmatpush3.bf16.msra.mxu1 %v5434_v11 }
 0x654   : > { %5191 = vmatprep.subr.bf16.mxu0 %v5537_v2  ;;  %5199 = vmatprep.subr.bf16.mxu1 %v5537_v2 }
 0x655   : > { %5193 = vmatprep.mubr.msk.bf16.mxu0 %vm5538_vm1, %v5537_v2  ;;  %5201 = vmatprep.mubr.msk.bf16.mxu1 %vm5538_vm1, %v5537_v2 }
 0x657   : > { %5192 = vmatpush3.bf16.msra.mxu0 %v5435_v13  ;;  %5200 = vmatpush3.bf16.msra.mxu1 %v5436_v14 }
 0x658   : > { %5205 = vmatprep.subr.bf16.mxu0 %v5537_v2  ;;  %5213 = vmatprep.subr.bf16.mxu1 %v5537_v2 }
 0x65a   : > { %5194 = vmatmul.mubr.msk.bf16.vlgmr.msra.gmra.mrb[52].mxu0 %vm1382_vm2, %v2678_v12  ;;  %5202 = vmatmul.mubr.msk.bf16.vlgmr.msra.gmra.mrb[52].mxu1 %vm1382_vm2, %v2678_v12 }
 0x65b   : > { %5206 = vmatpush3.bf16.msra.mxu0 %v5437_v15  ;;  %5214 = vmatpush3.bf16.msra.mxu1 %v5438_v16 }
 0x65c   : > { %5207 = vmatprep.subr.bf16.mxu0 %v5537_v2  ;;  %5215 = vmatprep.subr.bf16.mxu1 %v5537_v2 }
 0x65d   : > { %5209 = vmatprep.mubr.msk.bf16.mxu0 %vm5538_vm1, %v5537_v2  ;;  %5217 = vmatprep.mubr.msk.bf16.mxu1 %vm5538_vm1, %v5537_v2 }
 0x65f   : > { %5208 = vmatpush3.bf16.msra.mxu0 %v5439_v17  ;;  %5216 = vmatpush3.bf16.msra.mxu1 %v5440_v18 }
 0x660   : > { %5221 = vmatprep.subr.bf16.mxu0 %v5537_v2  ;;  %5229 = vmatprep.subr.bf16.mxu1 %v5537_v2 }
 0x662   : > { %5210 = vmatmul.mubr.msk.bf16.vlgmr.msra.gmra.mrb[56].mxu0 %vm1382_vm2, %v2938_v20  ;;  %5218 = vmatmul.mubr.msk.bf16.vlgmr.msra.gmra.mrb[56].mxu1 %vm1382_vm2, %v2938_v20 }
 0x663   : > { %5222 = vmatpush3.bf16.msra.mxu0 %v5441_v21  ;;  %5230 = vmatpush3.bf16.msra.mxu1 %v5442_v22 }
 0x664   : > { %5223 = vmatprep.subr.bf16.mxu0 %v5537_v2  ;;  %5231 = vmatprep.subr.bf16.mxu1 %v5537_v2 }
 0x665   : > { %5225 = vmatprep.mubr.msk.bf16.mxu0 %vm5538_vm1, %v5537_v2  ;;  %5233 = vmatprep.mubr.msk.bf16.mxu1 %vm5538_vm1, %v5537_v2 }
 0x667   : > { %5224 = vmatpush3.bf16.msra.mxu0 %v5443_v23  ;;  %5232 = vmatpush3.bf16.msra.mxu1 %v5444_v24  ;;  %v4794_v23 = vld [vmem:[%s5776_s24 + $0x2] ss:$0 sm:$0xff]  ;;  %v4795_v24 = vld [vmem:[%s5776_s24 + $0x3] ss:$0 sm:$0xff] }
 0x668   : > { %5237 = vmatprep.subr.bf16.mxu0 %v5537_v2  ;;  %5245 = vmatprep.subr.bf16.mxu1 %v5537_v2 }
 0x66a   : > { %5226 = vmatmul.mubr.msk.bf16.vlgmr.msra.gmra.mrb[60].mxu0 %vm1382_vm2, %v2938_v20  ;;  %5234 = vmatmul.mubr.msk.bf16.vlgmr.msra.gmra.mrb[60].mxu1 %vm1382_vm2, %v2938_v20 }
 0x66b   : > { %5238 = vmatpush3.bf16.msra.mxu0 %v5445_v25  ;;  %5241 = vmatprep.mubr.msk.bf16.mxu0 %vm5538_vm1, %v5537_v2 }
 0x66c   : > { %5239 = vmatprep.subr.bf16.mxu0 %v5537_v2  ;;  %5249 = vmatprep.mubr.msk.bf16.mxu1 %vm5538_vm1, %v5537_v2 }
 0x66d   : > { %5246 = vmatpush3.bf16.msra.mxu1 %v5446_v26 }
 0x66e   : > { %5247 = vmatprep.subr.bf16.mxu1 %v5537_v2 }
 0x66f   : > { %5240 = vmatpush3.bf16.msra.mxu0 %v5447_v27 }
 0x670   : > { %5253 = vmatprep.subr.bf16.mxu0 %v5537_v2 }
 0x671   : > { %5248 = vmatpush3.bf16.msra.mxu1 %v5448_v28 }
 0x672   : > { %5242 = vmatmul.mubr.msk.bf16.vlgmr.msra.gmra.mrb[64].mxu0 %vm1382_vm2, %v2938_v20  ;;  %5261 = vmatprep.subr.bf16.mxu1 %v5537_v2 }
 0x673   : > { %5257 = vmatprep.mubr.msk.bf16.mxu0 %vm5538_vm1, %v5537_v2  ;;  %5254 = vmatpush3.bf16.msra.mxu0 %v5449_v29 }
 0x674   : > { %5250 = vmatmul.mubr.msk.bf16.vlgmr.msra.gmra.mrb[64].mxu1 %vm1382_vm2, %v2938_v20  ;;  %5255 = vmatprep.subr.bf16.mxu0 %v5537_v2 }
 0x675   : > { %5262 = vmatpush3.bf16.msra.mxu1 %v5450_v30  ;;  %5265 = vmatprep.mubr.msk.bf16.mxu1 %vm5538_vm1, %v5537_v2 }
 0x676   : > { %5263 = vmatprep.subr.bf16.mxu1 %v5537_v2 }
 0x677   : > { %5256 = vmatpush3.bf16.msra.mxu0 %v5451_v31  ;;  %v4812_v31 = vld [vmem:[%s5788_s7 + $0x4] ss:$0 sm:$0xff] }
 0x678   : > { %5269 = vmatprep.subr.bf16.mxu0 %v5537_v2 }
 0x679   : > { %5264 = vmatpush3.bf16.msra.mxu1 %v5452_v32 }
 0x67a   : > { %5275 = vmatprep.subr.bf16.mxu1 %v5537_v2  ;;  %5258 = vmatmul.mubr.msk.bf16.vlgmr.msra.gmra.mrb[68].mxu0 %vm1382_vm2, %v2938_v20 }
 0x67b   : > { %5271 = vmatprep.mubr.msk.bf16.mxu0 %vm5538_vm1, %v5537_v2 }
 0x67c   : > { %5266 = vmatmul.mubr.msk.bf16.vlgmr.msra.gmra.mrb[68].mxu1 %vm1382_vm2, %v2938_v20 }
 0x67d   : > { %5277 = vmatprep.mubr.msk.bf16.mxu1 %vm5538_vm1, %v5537_v2 }
 0x725   : > { %v2772_v33 = vpop.f32.mrb[48].mxu0  ;;  %v2824_v34 = vpop.f32.mrb[48].mxu1 }
 0x726   : > { %v5179_v35 = vpop.f32.mrb[49].mxu0  ;;  %v5187_v36 = vpop.f32.mrb[49].mxu1  ;;  %v2773_v5 = vadd.f32 %v4792_v63, %v2772_v33  ;;  %v2825_v7 = vadd.f32 %v4793_v6, %v2824_v34  ;;  %v4813_v33 = vld [vmem:[%s5788_s7 + $0x5] ss:$0 sm:$0xff] }
 0x727   : > { %v2775_v37 = vpop.f32.mrb[50].mxu0  ;;  %v2827_v38 = vpop.f32.mrb[50].mxu1 }
 0x728   : > { %v5180_v39 = vpop.f32.mrb[51].mxu0  ;;  %v5188_v40 = vpop.f32.mrb[51].mxu1  ;;  %v2934_v17 = vpack.c.bf16 %v2773_v5, %v2773_v5  ;;  %v2935_v18 = vpack.c.bf16 %v2825_v7, %v2825_v7 }
 0x72d   : > { %v2876_v41 = vpop.f32.mrb[52].mxu0  ;;  %v2928_v44 = vpop.f32.mrb[52].mxu1 }
 0x72e   : > { %v5195_v45 = vpop.f32.mrb[53].mxu0  ;;  %v5203_v46 = vpop.f32.mrb[53].mxu1  ;;  %v2877_v27 = vadd.f32 %v4794_v23, %v2876_v41  ;;  %v2929_v28 = vadd.f32 %v4795_v24, %v2928_v44 }
 0x72f   : > { %v2879_v47 = vpop.f32.mrb[54].mxu0  ;;  %v2931_v48 = vpop.f32.mrb[54].mxu1 }
 0x730   : > { %v5196_v49 = vpop.f32.mrb[55].mxu0  ;;  %v5204_v50 = vpop.f32.mrb[55].mxu1  ;;  %v2936_v29 = vpack.c.bf16 %v2877_v27, %v2877_v27  ;;  %v2937_v30 = vpack.c.bf16 %v2929_v28, %v2929_v28 }
 0x735   : > { %v3076_v53 = vpop.f32.mrb[56].mxu0  ;;  %v3128_v42 = vpop.f32.mrb[56].mxu1 }
 0x736   : > { %v3077_v54 = vadd.f32 %v4808_v51, %v3076_v53  ;;  %v3129_v43 = vadd.f32 %v4809_v52, %v3128_v42  ;;  %v5211_v55 = vpop.f32.mrb[57].mxu0  ;;  %v5219_v56 = vpop.f32.mrb[57].mxu1 }
 0x737   : > { %v3079_v57 = vpop.f32.mrb[58].mxu0  ;;  %v3131_v58 = vpop.f32.mrb[58].mxu1  ;;  %v3643_v55 = vlaneseq }
 0x738   : > { %v3446_v59 = vpack.c.bf16 %v3077_v54, %v3077_v54  ;;  %v3447_v60 = vpack.c.bf16 %v3129_v43, %v3129_v43  ;;  %v5212_v61 = vpop.f32.mrb[59].mxu0  ;;  %v5220_v62 = vpop.f32.mrb[59].mxu1  ;;  %v1235_v57 = vld [vmem:[%s6476_s20] sm:$0x1] }
 0x739   : > { %v3644_v56 = vshrl.u32 %v3643_v55, 7  ;;  %v1236_v58 = vmul.f32 -1e+09, %v1235_v57 }
 0x73a   : > { %v3458_v0 = vsel %vm2010_vm3, %v3446_v59, 0  ;;  %v3504_v1 = vsel %vm2010_vm3, %v3447_v60, 0 }
 0x73b   : > { %5270 = vmatpush3.bf16.xpose.msra.mxu0 %v3458_v0  ;;  %5276 = vmatpush3.bf16.xpose.msra.mxu1 %v3504_v1  ;;  %v3645_v59 = vsub.s32 0, %v3644_v56 }
 0x73c   : > { %5281 = vmatprep.subr.bf16.mxu0 %v5537_v2  ;;  %5287 = vmatprep.subr.bf16.mxu1 %v5537_v2 }
 0x73d   : > { %v3180_v8 = vpop.f32.mrb[60].mxu0  ;;  %v3232_v10 = vpop.f32.mrb[60].mxu1  ;;  %v3646_v60 = vrot.slane %v1236_v58, %v3645_v59 }
 0x73e   : > { %v3181_v11 = vadd.f32 %v4810_v3, %v3180_v8  ;;  %v3233_v12 = vadd.f32 %v4811_v4, %v3232_v10  ;;  %v5227_v13 = vpop.f32.mrb[61].mxu0  ;;  %v5235_v14 = vpop.f32.mrb[61].mxu1 }
 0x73f   : > { %v3183_v15 = vpop.f32.mrb[62].mxu0  ;;  %v3235_v16 = vpop.f32.mrb[62].mxu1 }
 0x740   : > { %v3448_v19 = vpack.c.bf16 %v3181_v11, %v3181_v11  ;;  %v3449_v20 = vpack.c.bf16 %v3233_v12, %v3233_v12  ;;  %v5228_v21 = vpop.f32.mrb[63].mxu0  ;;  %v5236_v22 = vpop.f32.mrb[63].mxu1 }
 0x742   : > { %v3550_v25 = vsel %vm2010_vm3, %v3448_v19, 0  ;;  %v3596_v26 = vsel %vm2010_vm3, %v3449_v20, 0  ;;  %5272 = vmatmul.mubr.msk.bf16.vlgmr.msra.gmra.mrb[72].mxu0 %vm2010_vm3, %v2934_v17  ;;  %5278 = vmatmul.mubr.msk.bf16.vlgmr.msra.gmra.mrb[72].mxu1 %vm2010_vm3, %v2935_v18 }
 0x743   : > { %5282 = vmatpush3.bf16.xpose.msra.mxu0 %v3550_v25  ;;  %5288 = vmatpush3.bf16.xpose.msra.mxu1 %v3596_v26 }
 0x744   : > { %5283 = vmatprep.mubr.msk.bf16.mxu0 %vm5538_vm1, %v5537_v2  ;;  %5289 = vmatprep.mubr.msk.bf16.mxu1 %vm5538_vm1, %v5537_v2 }
 0x745   : > { %5293 = vmatprep.subr.bf16.mxu0 %v5537_v2  ;;  %5299 = vmatprep.subr.bf16.mxu1 %v5537_v2  ;;  %v3284_v32 = vpop.f32.mrb[64].mxu0 }
 0x746   : > { %v3285_v34 = vadd.f32 %v4812_v31, %v3284_v32  ;;  %v5243_v35 = vpop.f32.mrb[65].mxu0 }
 0x747   : > { %v3287_v36 = vpop.f32.mrb[66].mxu0  ;;  %v3336_v37 = vpop.f32.mrb[64].mxu1 }
 0x748   : > { %v3450_v38 = vpack.c.bf16 %v3285_v34, %v3285_v34  ;;  %v3337_v39 = vadd.f32 %v4813_v33, %v3336_v37  ;;  %v5244_v40 = vpop.f32.mrb[67].mxu0  ;;  %v5251_v41 = vpop.f32.mrb[65].mxu1 }
 0x749   : > { %v3339_v44 = vpop.f32.mrb[66].mxu1 }
 0x74a   : > { %5284 = vmatmul.mubr.msk.bf16.vlgmr.msra.gmra.mrb[76].mxu0 %vm2010_vm3, %v2936_v29  ;;  %5290 = vmatmul.mubr.msk.bf16.vlgmr.msra.gmra.mrb[76].mxu1 %vm2010_vm3, %v2937_v30  ;;  %v3704_v45 = vsel %vm2254_vm4, %v3450_v38, 0  ;;  %v3451_v46 = vpack.c.bf16 %v3337_v39, %v3337_v39  ;;  %v5252_v47 = vpop.f32.mrb[67].mxu1 }
 0x74b   : > { %5295 = vmatprep.mubr.msk.bf16.mxu0 %vm5538_vm1, %v5537_v2  ;;  %5301 = vmatprep.mubr.msk.bf16.mxu1 %vm5538_vm1, %v5537_v2 }
 0x74c   : > { %5294 = vmatpush3.bf16.msra.mxu0 %v3704_v45  ;;  %v3750_v48 = vsel %vm2254_vm4, %v3451_v46, 0 }
 0x74d   : > { %5305 = vmatprep.subr.bf16.mxu0 %v5537_v2  ;;  %5300 = vmatpush3.bf16.msra.mxu1 %v3750_v48  ;;  %v6221_v49 = vpop.f32.mrb[68].mxu0 }
 0x74e   : > { %5311 = vmatprep.subr.bf16.mxu1 %v5537_v2  ;;  %v5259_v51 = vpop.f32.mrb[69].mxu0 }
 0x74f   : > { %v6223_v50 = vpop.f32.mrb[68].mxu1  ;;  %v3391_v53 = vpop.f32.mrb[70].mxu0 }
 0x750   : > { %v5267_v52 = vpop.f32.mrb[69].mxu1  ;;  %v5260_v54 = vpop.f32.mrb[71].mxu0  ;;  %v4815_v53 = vld [vmem:[%s5788_s7 + $0x7] ss:$0 sm:$0xff] }
 0x751   : > { %v3443_v42 = vpop.f32.mrb[70].mxu1  ;;  %v3441_v54 = vadd.f32 %v4815_v53, %v6223_v50 }
 0x752   : > { %v5268_v43 = vpop.f32.mrb[71].mxu1  ;;  %v4814_v42 = vld [vmem:[%s5788_s7 + $0x6] ss:$0 sm:$0xff] }
 0x753   : > { %v3389_v55 = vadd.f32 %v4814_v42, %v6221_v49  ;;  %v3453_v59 = vpack.c.bf16 %v3441_v54, %v3441_v54 }
 0x815   : > { %v3494_v61 = vpop.f32.mrb[72].mxu0  ;;  %v3540_v62 = vpop.f32.mrb[72].mxu1 }
 0x816   : > { %v3638_v63 = vmul.f32 0.35355338, %v3494_v61  ;;  %v3639_v6 = vmul.f32 0.35355338, %v3540_v62  ;;  %v5273_v0 = vpop.f32.mrb[73].mxu0  ;;  %v5279_v1 = vpop.f32.mrb[73].mxu1  ;;  %v3452_v61 = vpack.c.bf16 %v3389_v55, %v3389_v55 }
 0x817   : > { %v3497_v3 = vpop.f32.mrb[74].mxu0  ;;  %v3543_v4 = vpop.f32.mrb[74].mxu1  ;;  %v3889_v1 = vld [vmem:[%s6477_s0 + $0x4] sm:$0xf] }
 0x818   : > { %v5274_v5 = vpop.f32.mrb[75].mxu0  ;;  %v5280_v7 = vpop.f32.mrb[75].mxu1  ;;  %v3649_v8 = vadd.f32 %v3646_v60, %v3639_v6  ;;  %v3648_v10 = vadd.f32 %v3646_v60, %v3638_v63  ;;  %v3842_v6 = vsel %vm2254_vm4, %v3453_v59, 0  ;;  %v3796_v49 = vsel %vm2254_vm4, %v3452_v61, 0  ;;  %v4852_v59 = vld [vmem:[%s6479_s26] ss:$0 sm:$0xff] }
 0x819   : > { %v3888_v5 = vld [vmem:[%s6477_s0] sm:$0xf] }
 0x81a   : > { %v3655_v11 = vsel %vm2010_vm3, %v3649_v8, -inf  ;;  %v3652_v12 = vsel %vm2010_vm3, %v3648_v10, -inf }
 0x81b   : > { %3656 = vmax.xlane.f32.xlu1 %v3655_v11  ;;  %3653 = vmax.xlane.f32.xlu0 %v3652_v12  ;;  %v3901_v12 = vsel %vm2254_vm4, %v3888_v5, 0  ;;  %v5453_v5 = vld [vmem:[%s5810_s12] sm:$0xff]  }
 0x81d   : > { %v3586_v13 = vpop.f32.mrb[76].mxu0  ;;  %v3632_v14 = vpop.f32.mrb[76].mxu1 }
 0x81e   : > { %v3640_v15 = vmul.f32 0.35355338, %v3586_v13  ;;  %v3641_v16 = vmul.f32 0.35355338, %v3632_v14  ;;  %v5285_v17 = vpop.f32.mrb[77].mxu0  ;;  %v5291_v18 = vpop.f32.mrb[77].mxu1 }
 0x81f   : > { %v3589_v19 = vpop.f32.mrb[78].mxu0  ;;  %v3635_v20 = vpop.f32.mrb[78].mxu1  ;;  %v3891_v13 = vld [vmem:[%s6477_s0 + $0xc] sm:$0xf]  ;;  %v3890_v14 = vld [vmem:[%s6477_s0 + $0x8] sm:$0xf] }
 0x820   : > { %v5286_v21 = vpop.f32.mrb[79].mxu0  ;;  %v5292_v22 = vpop.f32.mrb[79].mxu1  ;;  %v3651_v23 = vadd.f32 %v3646_v60, %v3641_v16  ;;  %v3650_v24 = vadd.f32 %v3646_v60, %v3640_v15  ;;  %v4039_v19 = vsel %vm2254_vm4, %v3891_v13, 0 }
 0x822   : > { %v3661_v25 = vsel %vm2010_vm3, %v3651_v23, -inf  ;;  %v3658_v26 = vsel %vm2010_vm3, %v3650_v24, -inf }
 0x823   : > { %3662 = vmax.xlane.f32.xlu1 %v3661_v25  ;;  %3659 = vmax.xlane.f32.xlu0 %v3658_v26 }
 0x8a8   : > { %v3657_v27 = vpop.xlane.xlu1 %3656  ;;  %v3654_v28 = vpop.xlane.xlu0 %3653 }
 0x8a9   : > { %v3665_v29 = vsub.f32 %v3649_v8, %v3657_v27  ;;  %v3664_v30 = vsub.f32 %v3648_v10, %v3654_v28  ;;  %v3947_v10 = vsel %vm2254_vm4, %v3889_v1, 0 }
 0x8ab   : > { %v3670_v31 = vmul.f32 1.442695, %v3665_v29  ;;  %v3668_v32 = vmul.f32 1.442695, %v3664_v30 }
 0x8ad   : > { %5477 = vpow2.f32 %v3670_v31 }
 0x8ae   : > { %5479 = vpow2.f32 %v3668_v32 }
 0x8b0   : > { %v3663_v33 = vpop.xlane.xlu1 %3662  ;;  %v3660_v34 = vpop.xlane.xlu0 %3659 }
 0x8b1   : > { %v3667_v35 = vsub.f32 %v3651_v23, %v3663_v33  ;;  %v3666_v36 = vsub.f32 %v3650_v24, %v3660_v34  ;;  %v3993_v23 = vsel %vm2254_vm4, %v3890_v14, 0  ;;  %v4853_v14 = vld [vmem:[%s6481_s6] ss:$0 sm:$0xff] }
 0x8b3   : > { %v3674_v37 = vmul.f32 1.442695, %v3667_v35  ;;  %v3672_v38 = vmul.f32 1.442695, %v3666_v36 }
 0x8b5   : > { %5481 = vpow2.f32 %v3674_v37 }
 0x8b6   : > { %5483 = vpow2.f32 %v3672_v38 }
 0x8b7   : > { %v5478_v39 = vpop.eup %5477 }
 0x8b8   : > { %v5480_v40 = vpop.eup %5479  ;;  %v3679_v41 = vsel %vm2010_vm3, %v5478_v39, 0.0 }
 0x8b9   : > { %3680 = vadd.xlane.f32.xlu1 %v3679_v41  ;;  %v3676_v44 = vsel %vm2010_vm3, %v5480_v40, 0.0 }
 0x8ba   : > { %3677 = vadd.xlane.f32.xlu0 %v3676_v44 }
 0x8bf   : > { %v5482_v45 = vpop.eup %5481 }
 0x8c0   : > { %v5484_v46 = vpop.eup %5483  ;;  %v3685_v47 = vsel %vm2010_vm3, %v5482_v45, 0.0 }
 0x8c1   : > { %3686 = vadd.xlane.f32.xlu1 %v3685_v47  ;;  %v3682_v48 = vsel %vm2010_vm3, %v5484_v46, 0.0 }
 0x8c2   : > { %3683 = vadd.xlane.f32.xlu0 %v3682_v48 }
 0x946   : > { %v3681_v51 = vpop.xlane.xlu1 %3680 }
 0x947   : > { %5485 = vrcp.f32 %v3681_v51  ;;  %v3678_v52 = vpop.xlane.xlu0 %3677 }
 0x948   : > { %5487 = vrcp.f32 %v3678_v52 }
 0x94e   : > { %v3687_v43 = vpop.xlane.xlu1 %3686 }
 0x94f   : > { %5489 = vrcp.f32 %v3687_v43  ;;  %v3684_v56 = vpop.xlane.xlu0 %3683 }
 0x950   : > { %5491 = vrcp.f32 %v3684_v56 }
 0x951   : > { %v5486_v57 = vpop.eup %5485 }
 0x952   : > { %v5488_v58 = vpop.eup %5487  ;;  %v3691_v60 = vmul.f32 %v5486_v57, %v5478_v39 }
 0x953   : > { %v3689_v62 = vmul.f32 %v5488_v58, %v5480_v40 }
 0x954   : > { %3885 = vst.msk [vmem:[%s5851_s10 + $0x8] sm:$0xff] %vm2010_vm3, %v3691_v60  ;;  %v3697_v63 = vpack.c.bf16 %v3691_v60, %v3691_v60 }
 0x955   : > { %3884 = vst.msk [vmem:[%s5851_s10] sm:$0xff] %vm2010_vm3, %v3689_v62  ;;  %v3696_v50 = vpack.c.bf16 %v3689_v62, %v3689_v62 }
 0x956   : > { %5302 = vmatmul.mubr.msk.bf16.vlgmr.msra.gmra.mrb[80].mxu1 %vm2010_vm3, %v3697_v63 }
 0x957   : > { %5296 = vmatmul.mubr.msk.bf16.vlgmr.msra.gmra.mrb[80].mxu0 %vm2010_vm3, %v3696_v50  ;;  %5312 = vmatpush3.bf16.msra.mxu1 %v3842_v6 }
 0x958   : > { %5306 = vmatpush3.bf16.msra.mxu0 %v3796_v49  ;;  %5307 = vmatprep.mubr.msk.bf16.mxu0 %vm5538_vm1, %v5537_v2 }
 0x959   : > { %v5490_v0 = vpop.eup %5489  ;;  %5313 = vmatprep.mubr.msk.bf16.mxu1 %vm5538_vm1, %v5537_v2  ;;  %5317 = vmatprep.subr.bf16.mxu0 %v5537_v2 }
 0x95a   : > { %v5492_v3 = vpop.eup %5491  ;;  %v3695_v4 = vmul.f32 %v5490_v0, %v5482_v45  ;;  %5323 = vmatprep.subr.bf16.mxu1 %v5537_v2 }
 0x95b   : > { %v3693_v7 = vmul.f32 %v5492_v3, %v5484_v46 }
 0x95c   : > { %3887 = vst.msk [vmem:[%s5851_s10 + $0x18] sm:$0xff] %vm2010_vm3, %v3695_v4  ;;  %v3699_v8 = vpack.c.bf16 %v3695_v4, %v3695_v4 }
 0x95d   : > { %3886 = vst.msk [vmem:[%s5851_s10 + $0x10] sm:$0xff] %vm2010_vm3, %v3693_v7  ;;  %v3698_v11 = vpack.c.bf16 %v3693_v7, %v3693_v7  ;;  %v5454_v7 = vld [vmem:[%s5810_s12 + $0x8] sm:$0xff]  }
 0x95e   : > { %5314 = vmatmul.mubr.msk.bf16.vlgmr.msra.gmra.mrb[84].mxu1 %vm2010_vm3, %v3699_v8  ;;  %v5456_v8 = vld [vmem:[%s5824_s16 + $0x8] sm:$0xff]  }
 0x95f   : > { %5308 = vmatmul.mubr.msk.bf16.vlgmr.msra.gmra.mrb[84].mxu0 %vm2010_vm3, %v3698_v11  ;;  %5324 = vmatpush3.bf16.msra.mxu1 %v3947_v10 }
 0x960   : > { %5318 = vmatpush3.bf16.msra.mxu0 %v3901_v12  ;;  %5319 = vmatprep.mubr.msk.bf16.mxu0 %vm5538_vm1, %v5537_v2 }
 0x961   : > { %5325 = vmatprep.mubr.msk.bf16.mxu1 %vm5538_vm1, %v5537_v2  ;;  %5329 = vmatprep.subr.bf16.mxu0 %v5537_v2 }
 0x962   : > { %5335 = vmatprep.subr.bf16.mxu1 %v5537_v2 }
 0xa29   : > { %v3786_v15 = vpop.f32.mrb[80].mxu1 }
 0xa2a   : > { %v3740_v16 = vpop.f32.mrb[80].mxu0  ;;  %v3894_v17 = vpack.c.bf16 %v3786_v15, %v3786_v15  ;;  %v5303_v18 = vpop.f32.mrb[81].mxu1 }
 0xa2b   : > { %v3893_v20 = vpack.c.bf16 %v3740_v16, %v3740_v16  ;;  %v5297_v21 = vpop.f32.mrb[81].mxu0  ;;  %v3789_v22 = vpop.f32.mrb[82].mxu1  ;;  %v4854_v16 = vld [vmem:[%s6483_s9] ss:$0 sm:$0xff] }
 0xa2c   : > { %v3743_v24 = vpop.f32.mrb[82].mxu0  ;;  %v5304_v25 = vpop.f32.mrb[83].mxu1  ;;  %5326 = vmatmul.mubr.msk.bf16.vlgmr.msra.gmra.mrb[88].mxu1 %vm2010_vm3, %v3894_v17  ;;  %v5458_v21 = vld [vmem:[%s5824_s16 + $0x18] sm:$0xff]   ;;  %v4855_v22 = vld [vmem:[%s6485_s22] ss:$0 sm:$0xff] }
 0xa2d   : > { %v5298_v26 = vpop.f32.mrb[83].mxu0  ;;  %5320 = vmatmul.mubr.msk.bf16.vlgmr.msra.gmra.mrb[88].mxu0 %vm2010_vm3, %v3893_v20  ;;  %5336 = vmatpush3.bf16.msra.mxu1 %v4039_v19  ;;  %v5457_v20 = vld [vmem:[%s5824_s16 + $0x10] sm:$0xff]  }
 0xa2e   : > { %5330 = vmatpush3.bf16.msra.mxu0 %v3993_v23  ;;  %5331 = vmatprep.mubr.msk.bf16.mxu0 %vm5538_vm1, %v5537_v2 }
 0xa2f   : > { %5337 = vmatprep.mubr.msk.bf16.mxu1 %vm5538_vm1, %v5537_v2  ;;  %5341 = vmatprep.subr.bf16.mxu0 %v5537_v2 }
 0xa30   : > { %5349 = vmatprep.subr.bf16.mxu1 %v5537_v2 }
 0xa31   : > { %v3878_v27 = vpop.f32.mrb[84].mxu1 }
 0xa32   : > { %v3832_v28 = vpop.f32.mrb[84].mxu0  ;;  %v3896_v29 = vpack.c.bf16 %v3878_v27, %v3878_v27  ;;  %v5315_v30 = vpop.f32.mrb[85].mxu1 }
 0xa33   : > { %v3895_v31 = vpack.c.bf16 %v3832_v28, %v3832_v28  ;;  %v5309_v32 = vpop.f32.mrb[85].mxu0  ;;  %v3881_v33 = vpop.f32.mrb[86].mxu1 }
 0xa34   : > { %v3835_v34 = vpop.f32.mrb[86].mxu0  ;;  %v5316_v35 = vpop.f32.mrb[87].mxu1  ;;  %5338 = vmatmul.mubr.msk.bf16.vlgmr.msra.gmra.mrb[92].mxu1 %vm2010_vm3, %v3896_v29 }
 0xa35   : > { %v5310_v36 = vpop.f32.mrb[87].mxu0  ;;  %5332 = vmatmul.mubr.msk.bf16.vlgmr.msra.gmra.mrb[92].mxu0 %vm2010_vm3, %v3895_v31  ;;  %5357 = vmatprep.mubr.msk.bf16.mxu1 %vm5538_vm1, %v5537_v2 }
 0xa36   : > { %5345 = vmatprep.mubr.msk.bf16.mxu0 %vm5538_vm1, %v5537_v2  ;;  %5342 = vmatpush3.bf16.msra.mxu0 %v5453_v5 }
 0xa37   : > { %5343 = vmatprep.subr.bf16.mxu0 %v5537_v2 }
 0xa3a   : > { %5344 = vmatpush3.bf16.msra.mxu0 %v5454_v7 }
 0xaff   : > { %v3983_v37 = vpop.f32.mrb[88].mxu1 }
 0xb00   : > { %v3937_v38 = vpop.f32.mrb[88].mxu0  ;;  %v4082_v39 = vsel %vm1382_vm2, %v3983_v37, 0.0  ;;  %v5327_v40 = vpop.f32.mrb[89].mxu1 }
 0xb01   : > { %v4081_v41 = vsel %vm1382_vm2, %v3937_v38, 0.0  ;;  %v5321_v44 = vpop.f32.mrb[89].mxu0  ;;  %v3986_v45 = vpop.f32.mrb[90].mxu1 }
 0xb02   : > { %v4083_v46 = vadd.f32 %v4082_v39, %v4081_v41  ;;  %v3940_v47 = vpop.f32.mrb[90].mxu0  ;;  %v5328_v48 = vpop.f32.mrb[91].mxu1 }
 0xb03   : > { %v5322_v51 = vpop.f32.mrb[91].mxu0  ;;  %v4865_v48 = vld [vmem:[%s1197_s29] ss:$0 sm:$0xff] }
 0xb07   : > { %v4075_v52 = vpop.f32.mrb[92].mxu1 }
 0xb08   : > { %v4029_v53 = vpop.f32.mrb[92].mxu0  ;;  %v5339_v42 = vpop.f32.mrb[93].mxu1  ;;  %v4086_v60 = vsel %vm1382_vm2, %v4075_v52, 0.0  ;;  %v4866_v52 = vld [vmem:[%s1200_s17] ss:$0 sm:$0xff] }
 0xb09   : > { %v4084_v54 = vsel %vm1382_vm2, %v4029_v53, 0.0  ;;  %v5333_v43 = vpop.f32.mrb[93].mxu0  ;;  %v4078_v55 = vpop.f32.mrb[94].mxu1 }
 0xb0a   : > { %v4085_v56 = vadd.f32 %v4084_v54, %v4083_v46  ;;  %v4032_v57 = vpop.f32.mrb[94].mxu0  ;;  %v5340_v58 = vpop.f32.mrb[95].mxu1 }
 0xb0b   : > { %v5334_v61 = vpop.f32.mrb[95].mxu0 }
 0xb0c   : > { %v4087_v62 = vadd.f32 %v4086_v60, %v4085_v56 }
 0xb0e   : > { %v4094_v63 = vadd.f32 %v4852_v59, %v4087_v62 }
 0xb10   : > { %v4095_v50 = vadd.f32 %v4094_v63, %v6102_v9  ;;  %v5455_v9 = vld [vmem:[%s5824_s16] sm:$0xff]  }
 0xb11   : > { %5350 = vmatpush3.bf16.msra.mxu1 %v5455_v9 }
 0xb12   : > { %v4098_v6 = vsel %vm1382_vm2, %v4095_v50, 0.0  ;;  %5351 = vmatprep.subr.bf16.mxu1 %v5537_v2 }
 0xb13   : > { %4099 = vadd.xlane.f32.xlu0 %v4098_v6 }
 0xb15   : > { %5352 = vmatpush3.bf16.msra.mxu1 %v5456_v8 }
 0xb16   : > { %5353 = vmatprep.subr.bf16.mxu1 %v5537_v2 }
 0xb19   : > { %5354 = vmatpush3.bf16.msra.mxu1 %v5457_v20 }
 0xb1a   : > { %5355 = vmatprep.subr.bf16.mxu1 %v5537_v2  ;;  %v4859_v2 = vld [vmem:[%s1194_s15] ss:$0 sm:$0xff] }
 0xb1d   : > { %5356 = vmatpush3.bf16.msra.mxu1 %v5458_v21 }
 0xba0   : > { %v4100_v49 = vpop.xlane.xlu0 %4099 }
 0xba1   : > { %v4101_v0 = vmul.f32 0.03125, %v4100_v49 }
 0xba3   : > { %v4102_v1 = vsub.f32 %v4095_v50, %v4101_v0 }
 0xba5   : > { %v4103_v3 = vmul.f32 %v4102_v1, %v4102_v1 }
 0xba7   : > { %v4104_v4 = vsel %vm1382_vm2, %v4103_v3, 0.0 }
 0xba8   : > { %4105 = vadd.xlane.f32.xlu1 %v4104_v4 }
 0xc35   : > { %v4106_v10 = vpop.xlane.xlu1 %4105 }
 0xc36   : > { %v4107_v11 = vmul.f32 0.03125, %v4106_v10 }
 0xc38   : > { %v4108_v12 = vadd.f32 1e-05, %v4107_v11 }
 0xc3a   : > { %5493 = vrsqrt.f32 %v4108_v12 }
 0xc44   : > { %v5494_v13 = vpop.eup %5493 }
 0xc45   : > { %v4110_v15 = vmul.f32 %v5494_v13, %v4102_v1 }
 0xc47   : > { %v4117_v17 = vmul.f32 %v4853_v14, %v4110_v15 }
 0xc49   : > { %v4124_v18 = vadd.f32 %v4854_v16, %v4117_v17 }
 0xc4b   : > { %v4125_v19 = vpack.c.bf16 %v4124_v18, %v4124_v18 }
 0xc4d   : > { %5346 = vmatmul.mubr.msk.bf16.vlgmr.msra.gmra.mrb[96].mxu0 %vm1382_vm2, %v4125_v19 }
 0xd20   : > { %v4186_v23 = vpop.f32.mrb[96].mxu0 }
 0xd21   : > { %v4187_v24 = vadd.f32 %v4855_v22, %v4186_v23  ;;  %v5347_v25 = vpop.f32.mrb[97].mxu0 }
 0xd22   : > { %v4189_v26 = vpop.f32.mrb[98].mxu0 }
 0xd23   : > { %v4192_v27 = vmax.f32 %v4187_v24, 0.0  ;;  %v5348_v28 = vpop.f32.mrb[99].mxu0 }
 0xd25   : > { %v4193_v29 = vpack.c.bf16 %v4192_v27, %v4192_v27 }
 0xd27   : > { %5358 = vmatmul.mubr.msk.bf16.vlgmr.msra.gmra.mrb[96].mxu1 %vm4233_vm5, %v4193_v29 }
 0xdfa   : > { %v4271_v30 = vpop.f32.mrb[96].mxu1 }
 0xdfb   : > { %v4272_v31 = vadd.f32 %v4859_v2, %v4271_v30  ;;  %v5359_v32 = vpop.f32.mrb[97].mxu1 }
 0xdfc   : > { %v4274_v33 = vpop.f32.mrb[98].mxu1 }
 0xdfd   : > { %v5360_v34 = vpop.f32.mrb[99].mxu1  ;;  %v4277_v35 = vadd.f32 %v4272_v31, %v4124_v18 }
 0xdff   : > { %v4280_v36 = vsel %vm1382_vm2, %v4277_v35, 0.0 }
 0xe00   : > { %4281 = vadd.xlane.f32.xlu0 %v4280_v36 }
 0xe8d   : > { %v4282_v37 = vpop.xlane.xlu0 %4281 }
 0xe8e   : > { %v4283_v38 = vmul.f32 0.03125, %v4282_v37 }
 0xe90   : > { %v4284_v39 = vsub.f32 %v4277_v35, %v4283_v38 }
 0xe92   : > { %v4285_v40 = vmul.f32 %v4284_v39, %v4284_v39 }
 0xe94   : > { %v4286_v41 = vsel %vm1382_vm2, %v4285_v40, 0.0 }
 0xe95   : > { %4287 = vadd.xlane.f32.xlu1 %v4286_v41 }
 0xf22   : > { %v4288_v44 = vpop.xlane.xlu1 %4287 }
 0xf23   : > { %v4289_v45 = vmul.f32 0.03125, %v4288_v44 }
 0xf25   : > { %v4290_v46 = vadd.f32 1e-05, %v4289_v45 }
 0xf27   : > { %5495 = vrsqrt.f32 %v4290_v46 }
 0xf31   : > { %v5496_v47 = vpop.eup %5495 }
 0xf32   : > { %v4292_v51 = vmul.f32 %v5496_v47, %v4284_v39 }
 0xf34   : > { %v4299_v53 = vmul.f32 %v4865_v48, %v4292_v51 }
 0xf36   : > { %v4306_v42 = vadd.f32 %v4866_v52, %v4299_v53 }
 0xf38   : > { %4307 = vst.msk [vmem:[%s5838_s14] sm:$0xff] %vm1382_vm2, %v4306_v42 }
 0xf39 PF: > { %s6489_s20 = sld [smem:[#allocation4_spill]]  ;;  %s6490_s27 = sld [smem:[#allocation2_spill]] }
 0xf3a   : > { %s6491_s3 = sld [smem:[#allocation3_spill]]  ;;  %s6492_s7 = sld [smem:[#allocation5_spill]] }
 0xf3b   : > { %s6493_s28 = sld [smem:[#allocation6_spill]] }
 0xf3f   : > { %s37_s8 = sadd.s32 1, %s6489_s20  }
 0xf40   : > { %p34_p9 = scmp.ge.s32.totalorder %s37_s8, 6  }
 0xf42   :  { %36 = sbr.rel (!%p34_p9) target bundleno = 28 (0x1c), region = 243 }

</bundles_post_ra>
